<compile_context>
chip_gen: v6e
topology: v6e:2x2x1
jax: 0.10.0
libtpu: 0.0.40
codegen_flags: <defaults>
</compile_context>

<pallas_src>
import jax
import jax.numpy as jnp
from jax import lax
from jax.experimental import pallas as pl
from jax.experimental.pallas import tpu as pltpu


def _round_up(x, m):
    return (x + m - 1) // m * m


def bigru_kernel(x_ref, h0_ref, wih_ref, bih_ref, whh_ref, bhh_ref,
                 w1_ref, b1_ref, w2_ref, b2_ref,
                 out_ref, lasth_ref, xg_ref):
    # x_ref:     (L*Bp, Ep)   bf16  time-major embedded input (rows t*Bp:(t+1)*Bp)
    # h0_ref:    (2, Bp, Hp)  f32   initial hidden (fwd, bwd)
    # wih_ref:   (Ep, 6*Hp)   bf16  pre-transposed input->gate weights [fwd r|z|n, bwd r|z|n]
    # bih_ref:   (1, 6*Hp)    f32
    # whh_ref:   (2, Hp, 3Hp) f32   pre-transposed hidden->gate weights per direction
    # bhh_ref:   (2, 1, 3Hp)  f32
    # w1_ref:    (2*Hp, Hp), b1_ref: (1, Hp)   linear1 (pre-transposed)
    # w2_ref:    (Hp, Cp),   b2_ref: (1, Cp)   linear2 (pre-transposed, lane-dense out)
    # out_ref:   (Bp, Cp)  logits slab     lasth_ref: (2, Bp, Hp)
    # xg_ref:    (L*Bp, 6*Hp) f32 scratch: precomputed input projections
    _, Bp, Hp = h0_ref.shape
    L = x_ref.shape[0] // Bp
    G = 3 * Hp

    # (1) One big MXU pass: input projections for every timestep and both
    #     directions, with the input bias folded in (removed from the loop).
    xg_ref[...] = (
        jnp.dot(x_ref[...], wih_ref[...], preferred_element_type=jnp.float32)
        + bih_ref[...])

    # (2) Hoist loop-invariant weights and bias broadcasts out of the recurrence.
    whh_f = whh_ref[0]                                   # (Hp, 3Hp)
    whh_b = whh_ref[1]
    bhh_f = jnp.broadcast_to(bhh_ref[0], (Bp, G))        # (Bp, 3Hp)
    bhh_b = jnp.broadcast_to(bhh_ref[1], (Bp, G))

    def gru_cell(xg, hg, h):
        # PyTorch GRU gate math (gate order r, z, n; b_hn stays inside r*(...)).
        xr, xz, xn = xg[:, 0:Hp], xg[:, Hp:2 * Hp], xg[:, 2 * Hp:G]
        hr, hz, hn = hg[:, 0:Hp], hg[:, Hp:2 * Hp], hg[:, 2 * Hp:G]
        r = jax.nn.sigmoid(xr + hr)
        z = jax.nn.sigmoid(xz + hz)
        n = jnp.tanh(xn + r * hn)
        return (1.0 - z) * n + z * h

    def step(i, carry):
        h_f, h_b = carry
        row_f = pl.multiple_of(i * Bp, Bp)               # fwd consumes time i
        row_b = pl.multiple_of((L - 1 - i) * Bp, Bp)     # bwd consumes time L-1-i
        xg_f = xg_ref[pl.ds(row_f, Bp), pl.ds(0, G)]
        xg_b = xg_ref[pl.ds(row_b, Bp), pl.ds(G, G)]
        # Two independent MXU pushes per iteration (fwd/bwd chains overlap).
        hg_f = jnp.dot(h_f, whh_f, preferred_element_type=jnp.float32) + bhh_f
        hg_b = jnp.dot(h_b, whh_b, preferred_element_type=jnp.float32) + bhh_b
        return gru_cell(xg_f, hg_f, h_f), gru_cell(xg_b, hg_b, h_b)

    h_f, h_b = lax.fori_loop(0, L, step, (h0_ref[0], h0_ref[1]),
                             unroll=True if L <= 64 else 2)

    lasth_ref[0] = h_f
    lasth_ref[1] = h_b

    # (3) Classifier heads: concat(h_fwd, h_bwd) -> linear1 -> linear2.
    concated = jnp.concatenate([h_f, h_b], axis=1)                       # (Bp, 2Hp)
    o1 = jnp.dot(concated, w1_ref[...],
                 preferred_element_type=jnp.float32) + b1_ref[...]       # (Bp, Hp)
    out_ref[...] = (jnp.dot(o1, w2_ref[...],
                            preferred_element_type=jnp.float32)
                    + b2_ref[...])                                       # (Bp, Cp)


@jax.jit
def bigru_forward(token_ids, h0, params):
    """token_ids: (B, L) int32; h0: (2, B, H) f32. Returns (logits (B,C), last_h (2,B,H))."""
    B, L = token_ids.shape
    H = h0.shape[2]
    E = params["embedding"].shape[1]
    C = params["w2"].shape[0]

    Bp = _round_up(B, 8)        # sublane-aligned batch
    Hp = _round_up(H, 128)      # lane-aligned hidden (gate slices land on 128 boundaries)
    Ep = _round_up(E, 128)
    Cp = _round_up(C, 128)      # lane-dense logits output
    G = 3 * Hp

    # --- activations: embed -> (eval) dropout identity -> time-major, padded, bf16 ---
    emb = params["embedding"][token_ids].astype(jnp.float32)            # (B, L, E) gather
    x = jnp.transpose(emb, (1, 0, 2))                                   # (L, B, E)
    x = jnp.pad(x, ((0, 0), (0, Bp - B), (0, Ep - E)))
    x2d = x.reshape(L * Bp, Ep).astype(jnp.bfloat16)

    h0_p = jnp.pad(h0.astype(jnp.float32), ((0, 0), (0, Bp - B), (0, Hp - H)))

    # --- weights: pre-transposed + zero-padded (free layout plumbing, done once) ---
    f32 = jnp.float32
    wih_t = jnp.zeros((Ep, 2 * G), f32)
    bih_p = jnp.zeros((1, 2 * G), f32)
    whh_t = jnp.zeros((2, Hp, G), f32)
    bhh_p = jnp.zeros((2, 1, G), f32)
    for d in range(2):
        for g in range(3):
            col = d * G + g * Hp
            wih_t = wih_t.at[:E, col:col + H].set(params["wih"][d, g * H:(g + 1) * H, :].T)
            bih_p = bih_p.at[0, col:col + H].set(params["bih"][d, g * H:(g + 1) * H])
            whh_t = whh_t.at[d, :H, g * Hp:g * Hp + H].set(
                params["whh"][d, g * H:(g + 1) * H, :].T)
            bhh_p = bhh_p.at[d, 0, g * Hp:g * Hp + H].set(params["bhh"][d, g * H:(g + 1) * H])
    wih_t = wih_t.astype(jnp.bfloat16)

    w1_t = jnp.zeros((2 * Hp, Hp), f32)
    w1_t = w1_t.at[:H, :H].set(params["w1"][:, :H].T)                   # fwd half
    w1_t = w1_t.at[Hp:Hp + H, :H].set(params["w1"][:, H:].T)            # bwd half
    b1_p = jnp.zeros((1, Hp), f32).at[0, :H].set(params["b1"])
    w2_t = jnp.zeros((Hp, Cp), f32).at[:H, :C].set(params["w2"].T)
    b2_p = jnp.zeros((1, Cp), f32).at[0, :C].set(params["b2"])

    vmem = pl.BlockSpec(memory_space=pltpu.MemorySpace.VMEM)
    logits_p, lasth_p = pl.pallas_call(
        bigru_kernel,
        out_shape=(
            jax.ShapeDtypeStruct((Bp, Cp), jnp.float32),
            jax.ShapeDtypeStruct((2, Bp, Hp), jnp.float32),
        ),
        in_specs=[vmem] * 10,
        out_specs=(vmem, vmem),
        scratch_shapes=[pltpu.VMEM((L * Bp, 2 * G), jnp.float32)],
        compiler_params=pltpu.CompilerParams(vmem_limit_bytes=32 * 1024 * 1024),
    )(x2d, h0_p, wih_t, bih_p, whh_t, bhh_p, w1_t, b1_p, w2_t, b2_p)

    # dropout on last_h: eval mode -> identity
    return logits_p[:B, :C], lasth_p[:, :B, :H]


def init_params(key, vocab, emb_dim, hidden, num_classes):
    ks = jax.random.split(key, 9)
    s_gru = 1.0 / jnp.sqrt(hidden)
    s_l1 = 1.0 / jnp.sqrt(2 * hidden)
    s_l2 = 1.0 / jnp.sqrt(hidden)
    u = lambda k, shape, s: jax.random.uniform(k, shape, jnp.float32, -s, s)
    return {
        "embedding": jax.random.normal(ks[0], (vocab, emb_dim), jnp.float32),
        "wih": u(ks[1], (2, 3 * hidden, emb_dim), s_gru),   # gate order: r, z, n
        "whh": u(ks[2], (2, 3 * hidden, hidden), s_gru),
        "bih": u(ks[3], (2, 3 * hidden), s_gru),
        "bhh": u(ks[4], (2, 3 * hidden), s_gru),
        "w1": u(ks[5], (hidden, 2 * hidden), s_l1),
        "b1": u(ks[6], (hidden,), s_l1),
        "w2": u(ks[7], (num_classes, hidden), s_l2),
        "b2": u(ks[8], (num_classes,), s_l2),
    }


if __name__ == "__main__":
    # Small shapes consistent with the module's forward.
    B, L = 2, 8            # batch, sequence length
    VOCAB = 100            # MAX_WORDS (small synthetic vocab)
    E = 32                 # emb_dim
    H = 16                 # context_dim
    C = 2                  # num_classes

    key = jax.random.PRNGKey(0)
    k_tok, k_par = jax.random.split(key)

    token_ids = jax.random.randint(k_tok, (B, L), 0, VOCAB, dtype=jnp.int32)
    h0 = jnp.zeros((2, B, H), jnp.float32)          # init_hidden
    params = init_params(k_par, VOCAB, E, H, C)

    logits, last_h = bigru_forward(token_ids, h0, params)
    jax.block_until_ready((logits, last_h))

    assert logits.shape == (B, C) and last_h.shape == (2, B, H)
    assert bool(jnp.all(jnp.isfinite(logits))) and bool(jnp.all(jnp.isfinite(last_h)))
    print("KERNEL_OK")
</pallas_src>

<mosaic_0001>
module attributes {stable_mosaic.version = 11 : i64} {
  func.func @bigru_kernel(%arg0: memref<64x128xbf16, #tpu.memory_space<vmem>>, %arg1: memref<2x8x128xf32, #tpu.memory_space<vmem>>, %arg2: memref<128x768xbf16, #tpu.memory_space<vmem>>, %arg3: memref<1x768xf32, #tpu.memory_space<vmem>>, %arg4: memref<2x128x384xf32, #tpu.memory_space<vmem>>, %arg5: memref<2x1x384xf32, #tpu.memory_space<vmem>>, %arg6: memref<256x128xf32, #tpu.memory_space<vmem>>, %arg7: memref<1x128xf32, #tpu.memory_space<vmem>>, %arg8: memref<128x128xf32, #tpu.memory_space<vmem>>, %arg9: memref<1x128xf32, #tpu.memory_space<vmem>>, %arg10: memref<8x128xf32, #tpu.memory_space<vmem>>, %arg11: memref<2x8x128xf32, #tpu.memory_space<vmem>>, %arg12: memref<64x768xf32, #tpu.memory_space<vmem>>) attributes {dimension_semantics = [], scalar_prefetch = 0 : i64, scratch_operands = 1 : i64, tpu.core_type = #tpu.core_type<tc>} {
    %c0 = arith.constant 0 : index
    %c0_0 = arith.constant 0 : index
    %0 = vector.load %arg0[%c0, %c0_0] : memref<64x128xbf16, #tpu.memory_space<vmem>>, vector<64x128xbf16>
    %c0_1 = arith.constant 0 : index
    %c0_2 = arith.constant 0 : index
    %1 = vector.load %arg2[%c0_1, %c0_2] : memref<128x768xbf16, #tpu.memory_space<vmem>>, vector<128x768xbf16>
    %cst = arith.constant dense<0.000000e+00> : vector<64x768xf32>
    %2 = tpu.matmul %0, %1, %cst {dimension_numbers = #tpu.dot_dimension_numbers<[1], [0], [0], [1], [0, 0, 1, 1], [], []>} : vector<64x128xbf16>, vector<128x768xbf16>, vector<64x768xf32> -> vector<64x768xf32>
    %c0_3 = arith.constant 0 : index
    %c0_4 = arith.constant 0 : index
    %3 = vector.load %arg3[%c0_3, %c0_4] : memref<1x768xf32, #tpu.memory_space<vmem>>, vector<1x768xf32>
    %4 = vector.broadcast %3 : vector<1x768xf32> to vector<64x768xf32>
    %5 = arith.addf %2, %4 : vector<64x768xf32>
    %c0_5 = arith.constant 0 : index
    %c0_6 = arith.constant 0 : index
    %6 = vector.load %arg12[%c0_5, %c0_6] : memref<64x768xf32, #tpu.memory_space<vmem>>, vector<64x768xf32>
    tpu.vector_store %arg12[%c0_5, %c0_6], %5 {strides = array<i32>} : memref<64x768xf32, #tpu.memory_space<vmem>>, vector<64x768xf32>,
    %c0_7 = arith.constant 0 : index
    %c0_8 = arith.constant 0 : index
    %c0_9 = arith.constant 0 : index
    %7 = vector.load %arg4[%c0_7, %c0_8, %c0_9] : memref<2x128x384xf32, #tpu.memory_space<vmem>>, vector<1x128x384xf32>
    %8 = vector.shape_cast %7 : vector<1x128x384xf32> to vector<128x384xf32>
    %c1 = arith.constant 1 : index
    %c0_10 = arith.constant 0 : index
    %c0_11 = arith.constant 0 : index
    %9 = vector.load %arg4[%c1, %c0_10, %c0_11] : memref<2x128x384xf32, #tpu.memory_space<vmem>>, vector<1x128x384xf32>
    %10 = vector.shape_cast %9 : vector<1x128x384xf32> to vector<128x384xf32>
    %c0_12 = arith.constant 0 : index
    %c0_13 = arith.constant 0 : index
    %c0_14 = arith.constant 0 : index
    %11 = vector.load %arg5[%c0_12, %c0_13, %c0_14] : memref<2x1x384xf32, #tpu.memory_space<vmem>>, vector<1x1x384xf32>
    %12 = vector.shape_cast %11 : vector<1x1x384xf32> to vector<1x384xf32>
    %13 = vector.shape_cast %12 : vector<1x384xf32> to vector<1x384xf32>
    %14 = vector.broadcast %13 : vector<1x384xf32> to vector<8x384xf32>
    %c1_15 = arith.constant 1 : index
    %c0_16 = arith.constant 0 : index
    %c0_17 = arith.constant 0 : index
    %15 = vector.load %arg5[%c1_15, %c0_16, %c0_17] : memref<2x1x384xf32, #tpu.memory_space<vmem>>, vector<1x1x384xf32>
    %16 = vector.shape_cast %15 : vector<1x1x384xf32> to vector<1x384xf32>
    %17 = vector.shape_cast %16 : vector<1x384xf32> to vector<1x384xf32>
    %18 = vector.broadcast %17 : vector<1x384xf32> to vector<8x384xf32>
    %c0_18 = arith.constant 0 : index
    %c0_19 = arith.constant 0 : index
    %c0_20 = arith.constant 0 : index
    %19 = vector.load %arg1[%c0_18, %c0_19, %c0_20] : memref<2x8x128xf32, #tpu.memory_space<vmem>>, vector<1x8x128xf32>
    %20 = vector.shape_cast %19 : vector<1x8x128xf32> to vector<8x128xf32>
    %c1_21 = arith.constant 1 : index
    %c0_22 = arith.constant 0 : index
    %c0_23 = arith.constant 0 : index
    %21 = vector.load %arg1[%c1_21, %c0_22, %c0_23] : memref<2x8x128xf32, #tpu.memory_space<vmem>>, vector<1x8x128xf32>
    %22 = vector.shape_cast %21 : vector<1x8x128xf32> to vector<8x128xf32>
    %c0_i32 = arith.constant 0 : i32
    %c8_i32 = arith.constant 8 : i32
    %23 = arith.muli %c0_i32, %c8_i32 : i32
    %24 = tpu.assume_multiple %23, 8 : i32
    %c7_i32 = arith.constant 7 : i32
    %25 = arith.subi %c7_i32, %c0_i32 : i32
    %c8_i32_24 = arith.constant 8 : i32
    %26 = arith.muli %25, %c8_i32_24 : i32
    %27 = tpu.assume_multiple %26, 8 : i32
    %28 = arith.index_cast %24 : i32 to index
    %c0_25 = arith.constant 0 : index
    %29 = vector.load %arg12[%28, %c0_25] : memref<64x768xf32, #tpu.memory_space<vmem>>, vector<8x384xf32>
    %30 = arith.index_cast %27 : i32 to index
    %c384 = arith.constant 384 : index
    %31 = vector.load %arg12[%30, %c384] : memref<64x768xf32, #tpu.memory_space<vmem>>, vector<8x384xf32>
    %cst_26 = arith.constant dense<0.000000e+00> : vector<8x384xf32>
    %32 = tpu.matmul %20, %8, %cst_26 {dimension_numbers = #tpu.dot_dimension_numbers<[1], [0], [0], [1], [0, 0, 1, 1], [], []>} : vector<8x128xf32>, vector<128x384xf32>, vector<8x384xf32> -> vector<8x384xf32>
    %33 = arith.addf %32, %14 : vector<8x384xf32>
    %cst_27 = arith.constant dense<0.000000e+00> : vector<8x384xf32>
    %34 = tpu.matmul %22, %10, %cst_27 {dimension_numbers = #tpu.dot_dimension_numbers<[1], [0], [0], [1], [0, 0, 1, 1], [], []>} : vector<8x128xf32>, vector<128x384xf32>, vector<8x384xf32> -> vector<8x384xf32>
    %35 = arith.addf %34, %18 : vector<8x384xf32>
    %36 = vector.extract_strided_slice %29 {offsets = [0, 0], sizes = [8, 128], strides = [1, 1]} : vector<8x384xf32> to vector<8x128xf32>
    %37 = vector.extract_strided_slice %29 {offsets = [0, 128], sizes = [8, 128], strides = [1, 1]} : vector<8x384xf32> to vector<8x128xf32>
    %38 = vector.extract_strided_slice %29 {offsets = [0, 256], sizes = [8, 128], strides = [1, 1]} : vector<8x384xf32> to vector<8x128xf32>
    %39 = vector.extract_strided_slice %33 {offsets = [0, 0], sizes = [8, 128], strides = [1, 1]} : vector<8x384xf32> to vector<8x128xf32>
    %40 = vector.extract_strided_slice %33 {offsets = [0, 128], sizes = [8, 128], strides = [1, 1]} : vector<8x384xf32> to vector<8x128xf32>
    %41 = vector.extract_strided_slice %33 {offsets = [0, 256], sizes = [8, 128], strides = [1, 1]} : vector<8x384xf32> to vector<8x128xf32>
    %42 = arith.addf %36, %39 : vector<8x128xf32>
    %43 = arith.negf %42 : vector<8x128xf32>
    %44 = math.exp %43 : vector<8x128xf32>
    %cst_28 = arith.constant 1.000000e+00 : f32
    %45 = vector.broadcast %cst_28 : f32 to vector<8x128xf32>
    %46 = arith.addf %45, %44 : vector<8x128xf32>
    %47 = arith.divf %45, %46 : vector<8x128xf32>
    %48 = arith.addf %37, %40 : vector<8x128xf32>
    %49 = arith.negf %48 : vector<8x128xf32>
    %50 = math.exp %49 : vector<8x128xf32>
    %cst_29 = arith.constant 1.000000e+00 : f32
    %51 = vector.broadcast %cst_29 : f32 to vector<8x128xf32>
    %52 = arith.addf %51, %50 : vector<8x128xf32>
    %53 = arith.divf %51, %52 : vector<8x128xf32>
    %54 = arith.mulf %47, %41 : vector<8x128xf32>
    %55 = arith.addf %38, %54 : vector<8x128xf32>
    %56 = math.tanh %55 : vector<8x128xf32>
    %cst_30 = arith.constant 1.000000e+00 : f32
    %57 = vector.broadcast %cst_30 : f32 to vector<8x128xf32>
    %58 = arith.subf %57, %53 : vector<8x128xf32>
    %59 = arith.mulf %58, %56 : vector<8x128xf32>
    %60 = arith.mulf %53, %20 : vector<8x128xf32>
    %61 = arith.addf %59, %60 : vector<8x128xf32>
    %62 = vector.extract_strided_slice %31 {offsets = [0, 0], sizes = [8, 128], strides = [1, 1]} : vector<8x384xf32> to vector<8x128xf32>
    %63 = vector.extract_strided_slice %31 {offsets = [0, 128], sizes = [8, 128], strides = [1, 1]} : vector<8x384xf32> to vector<8x128xf32>
    %64 = vector.extract_strided_slice %31 {offsets = [0, 256], sizes = [8, 128], strides = [1, 1]} : vector<8x384xf32> to vector<8x128xf32>
    %65 = vector.extract_strided_slice %35 {offsets = [0, 0], sizes = [8, 128], strides = [1, 1]} : vector<8x384xf32> to vector<8x128xf32>
    %66 = vector.extract_strided_slice %35 {offsets = [0, 128], sizes = [8, 128], strides = [1, 1]} : vector<8x384xf32> to vector<8x128xf32>
    %67 = vector.extract_strided_slice %35 {offsets = [0, 256], sizes = [8, 128], strides = [1, 1]} : vector<8x384xf32> to vector<8x128xf32>
    %68 = arith.addf %62, %65 : vector<8x128xf32>
    %69 = arith.negf %68 : vector<8x128xf32>
    %70 = math.exp %69 : vector<8x128xf32>
    %cst_31 = arith.constant 1.000000e+00 : f32
    %71 = vector.broadcast %cst_31 : f32 to vector<8x128xf32>
    %72 = arith.addf %71, %70 : vector<8x128xf32>
    %73 = arith.divf %71, %72 : vector<8x128xf32>
    %74 = arith.addf %63, %66 : vector<8x128xf32>
    %75 = arith.negf %74 : vector<8x128xf32>
    %76 = math.exp %75 : vector<8x128xf32>
    %cst_32 = arith.constant 1.000000e+00 : f32
    %77 = vector.broadcast %cst_32 : f32 to vector<8x128xf32>
    %78 = arith.addf %77, %76 : vector<8x128xf32>
    %79 = arith.divf %77, %78 : vector<8x128xf32>
    %80 = arith.mulf %73, %67 : vector<8x128xf32>
    %81 = arith.addf %64, %80 : vector<8x128xf32>
    %82 = math.tanh %81 : vector<8x128xf32>
    %cst_33 = arith.constant 1.000000e+00 : f32
    %83 = vector.broadcast %cst_33 : f32 to vector<8x128xf32>
    %84 = arith.subf %83, %79 : vector<8x128xf32>
    %85 = arith.mulf %84, %82 : vector<8x128xf32>
    %86 = arith.mulf %79, %22 : vector<8x128xf32>
    %87 = arith.addf %85, %86 : vector<8x128xf32>
    %c1_i32 = arith.constant 1 : i32
    %c8_i32_34 = arith.constant 8 : i32
    %88 = arith.muli %c1_i32, %c8_i32_34 : i32
    %89 = tpu.assume_multiple %88, 8 : i32
    %c7_i32_35 = arith.constant 7 : i32
    %90 = arith.subi %c7_i32_35, %c1_i32 : i32
    %c8_i32_36 = arith.constant 8 : i32
    %91 = arith.muli %90, %c8_i32_36 : i32
    %92 = tpu.assume_multiple %91, 8 : i32
    %93 = arith.index_cast %89 : i32 to index
    %c0_37 = arith.constant 0 : index
    %94 = vector.load %arg12[%93, %c0_37] : memref<64x768xf32, #tpu.memory_space<vmem>>, vector<8x384xf32>
    %95 = arith.index_cast %92 : i32 to index
    %c384_38 = arith.constant 384 : index
    %96 = vector.load %arg12[%95, %c384_38] : memref<64x768xf32, #tpu.memory_space<vmem>>, vector<8x384xf32>
    %cst_39 = arith.constant dense<0.000000e+00> : vector<8x384xf32>
    %97 = tpu.matmul %61, %8, %cst_39 {dimension_numbers = #tpu.dot_dimension_numbers<[1], [0], [0], [1], [0, 0, 1, 1], [], []>} : vector<8x128xf32>, vector<128x384xf32>, vector<8x384xf32> -> vector<8x384xf32>
    %98 = arith.addf %97, %14 : vector<8x384xf32>
    %cst_40 = arith.constant dense<0.000000e+00> : vector<8x384xf32>
    %99 = tpu.matmul %87, %10, %cst_40 {dimension_numbers = #tpu.dot_dimension_numbers<[1], [0], [0], [1], [0, 0, 1, 1], [], []>} : vector<8x128xf32>, vector<128x384xf32>, vector<8x384xf32> -> vector<8x384xf32>
    %100 = arith.addf %99, %18 : vector<8x384xf32>
    %101 = vector.extract_strided_slice %94 {offsets = [0, 0], sizes = [8, 128], strides = [1, 1]} : vector<8x384xf32> to vector<8x128xf32>
    %102 = vector.extract_strided_slice %94 {offsets = [0, 128], sizes = [8, 128], strides = [1, 1]} : vector<8x384xf32> to vector<8x128xf32>
    %103 = vector.extract_strided_slice %94 {offsets = [0, 256], sizes = [8, 128], strides = [1, 1]} : vector<8x384xf32> to vector<8x128xf32>
    %104 = vector.extract_strided_slice %98 {offsets = [0, 0], sizes = [8, 128], strides = [1, 1]} : vector<8x384xf32> to vector<8x128xf32>
    %105 = vector.extract_strided_slice %98 {offsets = [0, 128], sizes = [8, 128], strides = [1, 1]} : vector<8x384xf32> to vector<8x128xf32>
    %106 = vector.extract_strided_slice %98 {offsets = [0, 256], sizes = [8, 128], strides = [1, 1]} : vector<8x384xf32> to vector<8x128xf32>
    %107 = arith.addf %101, %104 : vector<8x128xf32>
    %108 = arith.negf %107 : vector<8x128xf32>
    %109 = math.exp %108 : vector<8x128xf32>
    %cst_41 = arith.constant 1.000000e+00 : f32
    %110 = vector.broadcast %cst_41 : f32 to vector<8x128xf32>
    %111 = arith.addf %110, %109 : vector<8x128xf32>
    %112 = arith.divf %110, %111 : vector<8x128xf32>
    %113 = arith.addf %102, %105 : vector<8x128xf32>
    %114 = arith.negf %113 : vector<8x128xf32>
    %115 = math.exp %114 : vector<8x128xf32>
    %cst_42 = arith.constant 1.000000e+00 : f32
    %116 = vector.broadcast %cst_42 : f32 to vector<8x128xf32>
    %117 = arith.addf %116, %115 : vector<8x128xf32>
    %118 = arith.divf %116, %117 : vector<8x128xf32>
    %119 = arith.mulf %112, %106 : vector<8x128xf32>
    %120 = arith.addf %103, %119 : vector<8x128xf32>
    %121 = math.tanh %120 : vector<8x128xf32>
    %cst_43 = arith.constant 1.000000e+00 : f32
    %122 = vector.broadcast %cst_43 : f32 to vector<8x128xf32>
    %123 = arith.subf %122, %118 : vector<8x128xf32>
    %124 = arith.mulf %123, %121 : vector<8x128xf32>
    %125 = arith.mulf %118, %61 : vector<8x128xf32>
    %126 = arith.addf %124, %125 : vector<8x128xf32>
    %127 = vector.extract_strided_slice %96 {offsets = [0, 0], sizes = [8, 128], strides = [1, 1]} : vector<8x384xf32> to vector<8x128xf32>
    %128 = vector.extract_strided_slice %96 {offsets = [0, 128], sizes = [8, 128], strides = [1, 1]} : vector<8x384xf32> to vector<8x128xf32>
    %129 = vector.extract_strided_slice %96 {offsets = [0, 256], sizes = [8, 128], strides = [1, 1]} : vector<8x384xf32> to vector<8x128xf32>
    %130 = vector.extract_strided_slice %100 {offsets = [0, 0], sizes = [8, 128], strides = [1, 1]} : vector<8x384xf32> to vector<8x128xf32>
    %131 = vector.extract_strided_slice %100 {offsets = [0, 128], sizes = [8, 128], strides = [1, 1]} : vector<8x384xf32> to vector<8x128xf32>
    %132 = vector.extract_strided_slice %100 {offsets = [0, 256], sizes = [8, 128], strides = [1, 1]} : vector<8x384xf32> to vector<8x128xf32>
    %133 = arith.addf %127, %130 : vector<8x128xf32>
    %134 = arith.negf %133 : vector<8x128xf32>
    %135 = math.exp %134 : vector<8x128xf32>
    %cst_44 = arith.constant 1.000000e+00 : f32
    %136 = vector.broadcast %cst_44 : f32 to vector<8x128xf32>
    %137 = arith.addf %136, %135 : vector<8x128xf32>
    %138 = arith.divf %136, %137 : vector<8x128xf32>
    %139 = arith.addf %128, %131 : vector<8x128xf32>
    %140 = arith.negf %139 : vector<8x128xf32>
    %141 = math.exp %140 : vector<8x128xf32>
    %cst_45 = arith.constant 1.000000e+00 : f32
    %142 = vector.broadcast %cst_45 : f32 to vector<8x128xf32>
    %143 = arith.addf %142, %141 : vector<8x128xf32>
    %144 = arith.divf %142, %143 : vector<8x128xf32>
    %145 = arith.mulf %138, %132 : vector<8x128xf32>
    %146 = arith.addf %129, %145 : vector<8x128xf32>
    %147 = math.tanh %146 : vector<8x128xf32>
    %cst_46 = arith.constant 1.000000e+00 : f32
    %148 = vector.broadcast %cst_46 : f32 to vector<8x128xf32>
    %149 = arith.subf %148, %144 : vector<8x128xf32>
    %150 = arith.mulf %149, %147 : vector<8x128xf32>
    %151 = arith.mulf %144, %87 : vector<8x128xf32>
    %152 = arith.addf %150, %151 : vector<8x128xf32>
    %c2_i32 = arith.constant 2 : i32
    %c8_i32_47 = arith.constant 8 : i32
    %153 = arith.muli %c2_i32, %c8_i32_47 : i32
    %154 = tpu.assume_multiple %153, 8 : i32
    %c7_i32_48 = arith.constant 7 : i32
    %155 = arith.subi %c7_i32_48, %c2_i32 : i32
    %c8_i32_49 = arith.constant 8 : i32
    %156 = arith.muli %155, %c8_i32_49 : i32
    %157 = tpu.assume_multiple %156, 8 : i32
    %158 = arith.index_cast %154 : i32 to index
    %c0_50 = arith.constant 0 : index
    %159 = vector.load %arg12[%158, %c0_50] : memref<64x768xf32, #tpu.memory_space<vmem>>, vector<8x384xf32>
    %160 = arith.index_cast %157 : i32 to index
    %c384_51 = arith.constant 384 : index
    %161 = vector.load %arg12[%160, %c384_51] : memref<64x768xf32, #tpu.memory_space<vmem>>, vector<8x384xf32>
    %cst_52 = arith.constant dense<0.000000e+00> : vector<8x384xf32>
    %162 = tpu.matmul %126, %8, %cst_52 {dimension_numbers = #tpu.dot_dimension_numbers<[1], [0], [0], [1], [0, 0, 1, 1], [], []>} : vector<8x128xf32>, vector<128x384xf32>, vector<8x384xf32> -> vector<8x384xf32>
    %163 = arith.addf %162, %14 : vector<8x384xf32>
    %cst_53 = arith.constant dense<0.000000e+00> : vector<8x384xf32>
    %164 = tpu.matmul %152, %10, %cst_53 {dimension_numbers = #tpu.dot_dimension_numbers<[1], [0], [0], [1], [0, 0, 1, 1], [], []>} : vector<8x128xf32>, vector<128x384xf32>, vector<8x384xf32> -> vector<8x384xf32>
    %165 = arith.addf %164, %18 : vector<8x384xf32>
    %166 = vector.extract_strided_slice %159 {offsets = [0, 0], sizes = [8, 128], strides = [1, 1]} : vector<8x384xf32> to vector<8x128xf32>
    %167 = vector.extract_strided_slice %159 {offsets = [0, 128], sizes = [8, 128], strides = [1, 1]} : vector<8x384xf32> to vector<8x128xf32>
    %168 = vector.extract_strided_slice %159 {offsets = [0, 256], sizes = [8, 128], strides = [1, 1]} : vector<8x384xf32> to vector<8x128xf32>
    %169 = vector.extract_strided_slice %163 {offsets = [0, 0], sizes = [8, 128], strides = [1, 1]} : vector<8x384xf32> to vector<8x128xf32>
    %170 = vector.extract_strided_slice %163 {offsets = [0, 128], sizes = [8, 128], strides = [1, 1]} : vector<8x384xf32> to vector<8x128xf32>
    %171 = vector.extract_strided_slice %163 {offsets = [0, 256], sizes = [8, 128], strides = [1, 1]} : vector<8x384xf32> to vector<8x128xf32>
    %172 = arith.addf %166, %169 : vector<8x128xf32>
    %173 = arith.negf %172 : vector<8x128xf32>
    %174 = math.exp %173 : vector<8x128xf32>
    %cst_54 = arith.constant 1.000000e+00 : f32
    %175 = vector.broadcast %cst_54 : f32 to vector<8x128xf32>
    %176 = arith.addf %175, %174 : vector<8x128xf32>
    %177 = arith.divf %175, %176 : vector<8x128xf32>
    %178 = arith.addf %167, %170 : vector<8x128xf32>
    %179 = arith.negf %178 : vector<8x128xf32>
    %180 = math.exp %179 : vector<8x128xf32>
    %cst_55 = arith.constant 1.000000e+00 : f32
    %181 = vector.broadcast %cst_55 : f32 to vector<8x128xf32>
    %182 = arith.addf %181, %180 : vector<8x128xf32>
    %183 = arith.divf %181, %182 : vector<8x128xf32>
    %184 = arith.mulf %177, %171 : vector<8x128xf32>
    %185 = arith.addf %168, %184 : vector<8x128xf32>
    %186 = math.tanh %185 : vector<8x128xf32>
    %cst_56 = arith.constant 1.000000e+00 : f32
    %187 = vector.broadcast %cst_56 : f32 to vector<8x128xf32>
    %188 = arith.subf %187, %183 : vector<8x128xf32>
    %189 = arith.mulf %188, %186 : vector<8x128xf32>
    %190 = arith.mulf %183, %126 : vector<8x128xf32>
    %191 = arith.addf %189, %190 : vector<8x128xf32>
    %192 = vector.extract_strided_slice %161 {offsets = [0, 0], sizes = [8, 128], strides = [1, 1]} : vector<8x384xf32> to vector<8x128xf32>
    %193 = vector.extract_strided_slice %161 {offsets = [0, 128], sizes = [8, 128], strides = [1, 1]} : vector<8x384xf32> to vector<8x128xf32>
    %194 = vector.extract_strided_slice %161 {offsets = [0, 256], sizes = [8, 128], strides = [1, 1]} : vector<8x384xf32> to vector<8x128xf32>
    %195 = vector.extract_strided_slice %165 {offsets = [0, 0], sizes = [8, 128], strides = [1, 1]} : vector<8x384xf32> to vector<8x128xf32>
    %196 = vector.extract_strided_slice %165 {offsets = [0, 128], sizes = [8, 128], strides = [1, 1]} : vector<8x384xf32> to vector<8x128xf32>
    %197 = vector.extract_strided_slice %165 {offsets = [0, 256], sizes = [8, 128], strides = [1, 1]} : vector<8x384xf32> to vector<8x128xf32>
    %198 = arith.addf %192, %195 : vector<8x128xf32>
    %199 = arith.negf %198 : vector<8x128xf32>
    %200 = math.exp %199 : vector<8x128xf32>
    %cst_57 = arith.constant 1.000000e+00 : f32
    %201 = vector.broadcast %cst_57 : f32 to vector<8x128xf32>
    %202 = arith.addf %201, %200 : vector<8x128xf32>
    %203 = arith.divf %201, %202 : vector<8x128xf32>
    %204 = arith.addf %193, %196 : vector<8x128xf32>
    %205 = arith.negf %204 : vector<8x128xf32>
    %206 = math.exp %205 : vector<8x128xf32>
    %cst_58 = arith.constant 1.000000e+00 : f32
    %207 = vector.broadcast %cst_58 : f32 to vector<8x128xf32>
    %208 = arith.addf %207, %206 : vector<8x128xf32>
    %209 = arith.divf %207, %208 : vector<8x128xf32>
    %210 = arith.mulf %203, %197 : vector<8x128xf32>
    %211 = arith.addf %194, %210 : vector<8x128xf32>
    %212 = math.tanh %211 : vector<8x128xf32>
    %cst_59 = arith.constant 1.000000e+00 : f32
    %213 = vector.broadcast %cst_59 : f32 to vector<8x128xf32>
    %214 = arith.subf %213, %209 : vector<8x128xf32>
    %215 = arith.mulf %214, %212 : vector<8x128xf32>
    %216 = arith.mulf %209, %152 : vector<8x128xf32>
    %217 = arith.addf %215, %216 : vector<8x128xf32>
    %c3_i32 = arith.constant 3 : i32
    %c8_i32_60 = arith.constant 8 : i32
    %218 = arith.muli %c3_i32, %c8_i32_60 : i32
    %219 = tpu.assume_multiple %218, 8 : i32
    %c7_i32_61 = arith.constant 7 : i32
    %220 = arith.subi %c7_i32_61, %c3_i32 : i32
    %c8_i32_62 = arith.constant 8 : i32
    %221 = arith.muli %220, %c8_i32_62 : i32
    %222 = tpu.assume_multiple %221, 8 : i32
    %223 = arith.index_cast %219 : i32 to index
    %c0_63 = arith.constant 0 : index
    %224 = vector.load %arg12[%223, %c0_63] : memref<64x768xf32, #tpu.memory_space<vmem>>, vector<8x384xf32>
    %225 = arith.index_cast %222 : i32 to index
    %c384_64 = arith.constant 384 : index
    %226 = vector.load %arg12[%225, %c384_64] : memref<64x768xf32, #tpu.memory_space<vmem>>, vector<8x384xf32>
    %cst_65 = arith.constant dense<0.000000e+00> : vector<8x384xf32>
    %227 = tpu.matmul %191, %8, %cst_65 {dimension_numbers = #tpu.dot_dimension_numbers<[1], [0], [0], [1], [0, 0, 1, 1], [], []>} : vector<8x128xf32>, vector<128x384xf32>, vector<8x384xf32> -> vector<8x384xf32>
    %228 = arith.addf %227, %14 : vector<8x384xf32>
    %cst_66 = arith.constant dense<0.000000e+00> : vector<8x384xf32>
    %229 = tpu.matmul %217, %10, %cst_66 {dimension_numbers = #tpu.dot_dimension_numbers<[1], [0], [0], [1], [0, 0, 1, 1], [], []>} : vector<8x128xf32>, vector<128x384xf32>, vector<8x384xf32> -> vector<8x384xf32>
    %230 = arith.addf %229, %18 : vector<8x384xf32>
    %231 = vector.extract_strided_slice %224 {offsets = [0, 0], sizes = [8, 128], strides = [1, 1]} : vector<8x384xf32> to vector<8x128xf32>
    %232 = vector.extract_strided_slice %224 {offsets = [0, 128], sizes = [8, 128], strides = [1, 1]} : vector<8x384xf32> to vector<8x128xf32>
    %233 = vector.extract_strided_slice %224 {offsets = [0, 256], sizes = [8, 128], strides = [1, 1]} : vector<8x384xf32> to vector<8x128xf32>
    %234 = vector.extract_strided_slice %228 {offsets = [0, 0], sizes = [8, 128], strides = [1, 1]} : vector<8x384xf32> to vector<8x128xf32>
    %235 = vector.extract_strided_slice %228 {offsets = [0, 128], sizes = [8, 128], strides = [1, 1]} : vector<8x384xf32> to vector<8x128xf32>
    %236 = vector.extract_strided_slice %228 {offsets = [0, 256], sizes = [8, 128], strides = [1, 1]} : vector<8x384xf32> to vector<8x128xf32>
    %237 = arith.addf %231, %234 : vector<8x128xf32>
    %238 = arith.negf %237 : vector<8x128xf32>
    %239 = math.exp %238 : vector<8x128xf32>
    %cst_67 = arith.constant 1.000000e+00 : f32
    %240 = vector.broadcast %cst_67 : f32 to vector<8x128xf32>
    %241 = arith.addf %240, %239 : vector<8x128xf32>
    %242 = arith.divf %240, %241 : vector<8x128xf32>
    %243 = arith.addf %232, %235 : vector<8x128xf32>
    %244 = arith.negf %243 : vector<8x128xf32>
    %245 = math.exp %244 : vector<8x128xf32>
    %cst_68 = arith.constant 1.000000e+00 : f32
    %246 = vector.broadcast %cst_68 : f32 to vector<8x128xf32>
    %247 = arith.addf %246, %245 : vector<8x128xf32>
    %248 = arith.divf %246, %247 : vector<8x128xf32>
    %249 = arith.mulf %242, %236 : vector<8x128xf32>
    %250 = arith.addf %233, %249 : vector<8x128xf32>
    %251 = math.tanh %250 : vector<8x128xf32>
    %cst_69 = arith.constant 1.000000e+00 : f32
    %252 = vector.broadcast %cst_69 : f32 to vector<8x128xf32>
    %253 = arith.subf %252, %248 : vector<8x128xf32>
    %254 = arith.mulf %253, %251 : vector<8x128xf32>
    %255 = arith.mulf %248, %191 : vector<8x128xf32>
    %256 = arith.addf %254, %255 : vector<8x128xf32>
    %257 = vector.extract_strided_slice %226 {offsets = [0, 0], sizes = [8, 128], strides = [1, 1]} : vector<8x384xf32> to vector<8x128xf32>
    %258 = vector.extract_strided_slice %226 {offsets = [0, 128], sizes = [8, 128], strides = [1, 1]} : vector<8x384xf32> to vector<8x128xf32>
    %259 = vector.extract_strided_slice %226 {offsets = [0, 256], sizes = [8, 128], strides = [1, 1]} : vector<8x384xf32> to vector<8x128xf32>
    %260 = vector.extract_strided_slice %230 {offsets = [0, 0], sizes = [8, 128], strides = [1, 1]} : vector<8x384xf32> to vector<8x128xf32>
    %261 = vector.extract_strided_slice %230 {offsets = [0, 128], sizes = [8, 128], strides = [1, 1]} : vector<8x384xf32> to vector<8x128xf32>
    %262 = vector.extract_strided_slice %230 {offsets = [0, 256], sizes = [8, 128], strides = [1, 1]} : vector<8x384xf32> to vector<8x128xf32>
    %263 = arith.addf %257, %260 : vector<8x128xf32>
    %264 = arith.negf %263 : vector<8x128xf32>
    %265 = math.exp %264 : vector<8x128xf32>
    %cst_70 = arith.constant 1.000000e+00 : f32
    %266 = vector.broadcast %cst_70 : f32 to vector<8x128xf32>
    %267 = arith.addf %266, %265 : vector<8x128xf32>
    %268 = arith.divf %266, %267 : vector<8x128xf32>
    %269 = arith.addf %258, %261 : vector<8x128xf32>
    %270 = arith.negf %269 : vector<8x128xf32>
    %271 = math.exp %270 : vector<8x128xf32>
    %cst_71 = arith.constant 1.000000e+00 : f32
    %272 = vector.broadcast %cst_71 : f32 to vector<8x128xf32>
    %273 = arith.addf %272, %271 : vector<8x128xf32>
    %274 = arith.divf %272, %273 : vector<8x128xf32>
    %275 = arith.mulf %268, %262 : vector<8x128xf32>
    %276 = arith.addf %259, %275 : vector<8x128xf32>
    %277 = math.tanh %276 : vector<8x128xf32>
    %cst_72 = arith.constant 1.000000e+00 : f32
    %278 = vector.broadcast %cst_72 : f32 to vector<8x128xf32>
    %279 = arith.subf %278, %274 : vector<8x128xf32>
    %280 = arith.mulf %279, %277 : vector<8x128xf32>
    %281 = arith.mulf %274, %217 : vector<8x128xf32>
    %282 = arith.addf %280, %281 : vector<8x128xf32>
    %c4_i32 = arith.constant 4 : i32
    %c8_i32_73 = arith.constant 8 : i32
    %283 = arith.muli %c4_i32, %c8_i32_73 : i32
    %284 = tpu.assume_multiple %283, 8 : i32
    %c7_i32_74 = arith.constant 7 : i32
    %285 = arith.subi %c7_i32_74, %c4_i32 : i32
    %c8_i32_75 = arith.constant 8 : i32
    %286 = arith.muli %285, %c8_i32_75 : i32
    %287 = tpu.assume_multiple %286, 8 : i32
    %288 = arith.index_cast %284 : i32 to index
    %c0_76 = arith.constant 0 : index
    %289 = vector.load %arg12[%288, %c0_76] : memref<64x768xf32, #tpu.memory_space<vmem>>, vector<8x384xf32>
    %290 = arith.index_cast %287 : i32 to index
    %c384_77 = arith.constant 384 : index
    %291 = vector.load %arg12[%290, %c384_77] : memref<64x768xf32, #tpu.memory_space<vmem>>, vector<8x384xf32>
    %cst_78 = arith.constant dense<0.000000e+00> : vector<8x384xf32>
    %292 = tpu.matmul %256, %8, %cst_78 {dimension_numbers = #tpu.dot_dimension_numbers<[1], [0], [0], [1], [0, 0, 1, 1], [], []>} : vector<8x128xf32>, vector<128x384xf32>, vector<8x384xf32> -> vector<8x384xf32>
    %293 = arith.addf %292, %14 : vector<8x384xf32>
    %cst_79 = arith.constant dense<0.000000e+00> : vector<8x384xf32>
    %294 = tpu.matmul %282, %10, %cst_79 {dimension_numbers = #tpu.dot_dimension_numbers<[1], [0], [0], [1], [0, 0, 1, 1], [], []>} : vector<8x128xf32>, vector<128x384xf32>, vector<8x384xf32> -> vector<8x384xf32>
    %295 = arith.addf %294, %18 : vector<8x384xf32>
    %296 = vector.extract_strided_slice %289 {offsets = [0, 0], sizes = [8, 128], strides = [1, 1]} : vector<8x384xf32> to vector<8x128xf32>
    %297 = vector.extract_strided_slice %289 {offsets = [0, 128], sizes = [8, 128], strides = [1, 1]} : vector<8x384xf32> to vector<8x128xf32>
    %298 = vector.extract_strided_slice %289 {offsets = [0, 256], sizes = [8, 128], strides = [1, 1]} : vector<8x384xf32> to vector<8x128xf32>
    %299 = vector.extract_strided_slice %293 {offsets = [0, 0], sizes = [8, 128], strides = [1, 1]} : vector<8x384xf32> to vector<8x128xf32>
    %300 = vector.extract_strided_slice %293 {offsets = [0, 128], sizes = [8, 128], strides = [1, 1]} : vector<8x384xf32> to vector<8x128xf32>
    %301 = vector.extract_strided_slice %293 {offsets = [0, 256], sizes = [8, 128], strides = [1, 1]} : vector<8x384xf32> to vector<8x128xf32>
    %302 = arith.addf %296, %299 : vector<8x128xf32>
    %303 = arith.negf %302 : vector<8x128xf32>
    %304 = math.exp %303 : vector<8x128xf32>
    %cst_80 = arith.constant 1.000000e+00 : f32
    %305 = vector.broadcast %cst_80 : f32 to vector<8x128xf32>
    %306 = arith.addf %305, %304 : vector<8x128xf32>
    %307 = arith.divf %305, %306 : vector<8x128xf32>
    %308 = arith.addf %297, %300 : vector<8x128xf32>
    %309 = arith.negf %308 : vector<8x128xf32>
    %310 = math.exp %309 : vector<8x128xf32>
    %cst_81 = arith.constant 1.000000e+00 : f32
    %311 = vector.broadcast %cst_81 : f32 to vector<8x128xf32>
    %312 = arith.addf %311, %310 : vector<8x128xf32>
    %313 = arith.divf %311, %312 : vector<8x128xf32>
    %314 = arith.mulf %307, %301 : vector<8x128xf32>
    %315 = arith.addf %298, %314 : vector<8x128xf32>
    %316 = math.tanh %315 : vector<8x128xf32>
    %cst_82 = arith.constant 1.000000e+00 : f32
    %317 = vector.broadcast %cst_82 : f32 to vector<8x128xf32>
    %318 = arith.subf %317, %313 : vector<8x128xf32>
    %319 = arith.mulf %318, %316 : vector<8x128xf32>
    %320 = arith.mulf %313, %256 : vector<8x128xf32>
    %321 = arith.addf %319, %320 : vector<8x128xf32>
    %322 = vector.extract_strided_slice %291 {offsets = [0, 0], sizes = [8, 128], strides = [1, 1]} : vector<8x384xf32> to vector<8x128xf32>
    %323 = vector.extract_strided_slice %291 {offsets = [0, 128], sizes = [8, 128], strides = [1, 1]} : vector<8x384xf32> to vector<8x128xf32>
    %324 = vector.extract_strided_slice %291 {offsets = [0, 256], sizes = [8, 128], strides = [1, 1]} : vector<8x384xf32> to vector<8x128xf32>
    %325 = vector.extract_strided_slice %295 {offsets = [0, 0], sizes = [8, 128], strides = [1, 1]} : vector<8x384xf32> to vector<8x128xf32>
    %326 = vector.extract_strided_slice %295 {offsets = [0, 128], sizes = [8, 128], strides = [1, 1]} : vector<8x384xf32> to vector<8x128xf32>
    %327 = vector.extract_strided_slice %295 {offsets = [0, 256], sizes = [8, 128], strides = [1, 1]} : vector<8x384xf32> to vector<8x128xf32>
    %328 = arith.addf %322, %325 : vector<8x128xf32>
    %329 = arith.negf %328 : vector<8x128xf32>
    %330 = math.exp %329 : vector<8x128xf32>
    %cst_83 = arith.constant 1.000000e+00 : f32
    %331 = vector.broadcast %cst_83 : f32 to vector<8x128xf32>
    %332 = arith.addf %331, %330 : vector<8x128xf32>
    %333 = arith.divf %331, %332 : vector<8x128xf32>
    %334 = arith.addf %323, %326 : vector<8x128xf32>
    %335 = arith.negf %334 : vector<8x128xf32>
    %336 = math.exp %335 : vector<8x128xf32>
    %cst_84 = arith.constant 1.000000e+00 : f32
    %337 = vector.broadcast %cst_84 : f32 to vector<8x128xf32>
    %338 = arith.addf %337, %336 : vector<8x128xf32>
    %339 = arith.divf %337, %338 : vector<8x128xf32>
    %340 = arith.mulf %333, %327 : vector<8x128xf32>
    %341 = arith.addf %324, %340 : vector<8x128xf32>
    %342 = math.tanh %341 : vector<8x128xf32>
    %cst_85 = arith.constant 1.000000e+00 : f32
    %343 = vector.broadcast %cst_85 : f32 to vector<8x128xf32>
    %344 = arith.subf %343, %339 : vector<8x128xf32>
    %345 = arith.mulf %344, %342 : vector<8x128xf32>
    %346 = arith.mulf %339, %282 : vector<8x128xf32>
    %347 = arith.addf %345, %346 : vector<8x128xf32>
    %c5_i32 = arith.constant 5 : i32
    %c8_i32_86 = arith.constant 8 : i32
    %348 = arith.muli %c5_i32, %c8_i32_86 : i32
    %349 = tpu.assume_multiple %348, 8 : i32
    %c7_i32_87 = arith.constant 7 : i32
    %350 = arith.subi %c7_i32_87, %c5_i32 : i32
    %c8_i32_88 = arith.constant 8 : i32
    %351 = arith.muli %350, %c8_i32_88 : i32
    %352 = tpu.assume_multiple %351, 8 : i32
    %353 = arith.index_cast %349 : i32 to index
    %c0_89 = arith.constant 0 : index
    %354 = vector.load %arg12[%353, %c0_89] : memref<64x768xf32, #tpu.memory_space<vmem>>, vector<8x384xf32>
    %355 = arith.index_cast %352 : i32 to index
    %c384_90 = arith.constant 384 : index
    %356 = vector.load %arg12[%355, %c384_90] : memref<64x768xf32, #tpu.memory_space<vmem>>, vector<8x384xf32>
    %cst_91 = arith.constant dense<0.000000e+00> : vector<8x384xf32>
    %357 = tpu.matmul %321, %8, %cst_91 {dimension_numbers = #tpu.dot_dimension_numbers<[1], [0], [0], [1], [0, 0, 1, 1], [], []>} : vector<8x128xf32>, vector<128x384xf32>, vector<8x384xf32> -> vector<8x384xf32>
    %358 = arith.addf %357, %14 : vector<8x384xf32>
    %cst_92 = arith.constant dense<0.000000e+00> : vector<8x384xf32>
    %359 = tpu.matmul %347, %10, %cst_92 {dimension_numbers = #tpu.dot_dimension_numbers<[1], [0], [0], [1], [0, 0, 1, 1], [], []>} : vector<8x128xf32>, vector<128x384xf32>, vector<8x384xf32> -> vector<8x384xf32>
    %360 = arith.addf %359, %18 : vector<8x384xf32>
    %361 = vector.extract_strided_slice %354 {offsets = [0, 0], sizes = [8, 128], strides = [1, 1]} : vector<8x384xf32> to vector<8x128xf32>
    %362 = vector.extract_strided_slice %354 {offsets = [0, 128], sizes = [8, 128], strides = [1, 1]} : vector<8x384xf32> to vector<8x128xf32>
    %363 = vector.extract_strided_slice %354 {offsets = [0, 256], sizes = [8, 128], strides = [1, 1]} : vector<8x384xf32> to vector<8x128xf32>
    %364 = vector.extract_strided_slice %358 {offsets = [0, 0], sizes = [8, 128], strides = [1, 1]} : vector<8x384xf32> to vector<8x128xf32>
    %365 = vector.extract_strided_slice %358 {offsets = [0, 128], sizes = [8, 128], strides = [1, 1]} : vector<8x384xf32> to vector<8x128xf32>
    %366 = vector.extract_strided_slice %358 {offsets = [0, 256], sizes = [8, 128], strides = [1, 1]} : vector<8x384xf32> to vector<8x128xf32>
    %367 = arith.addf %361, %364 : vector<8x128xf32>
    %368 = arith.negf %367 : vector<8x128xf32>
    %369 = math.exp %368 : vector<8x128xf32>
    %cst_93 = arith.constant 1.000000e+00 : f32
    %370 = vector.broadcast %cst_93 : f32 to vector<8x128xf32>
    %371 = arith.addf %370, %369 : vector<8x128xf32>
    %372 = arith.divf %370, %371 : vector<8x128xf32>
    %373 = arith.addf %362, %365 : vector<8x128xf32>
    %374 = arith.negf %373 : vector<8x128xf32>
    %375 = math.exp %374 : vector<8x128xf32>
    %cst_94 = arith.constant 1.000000e+00 : f32
    %376 = vector.broadcast %cst_94 : f32 to vector<8x128xf32>
    %377 = arith.addf %376, %375 : vector<8x128xf32>
    %378 = arith.divf %376, %377 : vector<8x128xf32>
    %379 = arith.mulf %372, %366 : vector<8x128xf32>
    %380 = arith.addf %363, %379 : vector<8x128xf32>
    %381 = math.tanh %380 : vector<8x128xf32>
    %cst_95 = arith.constant 1.000000e+00 : f32
    %382 = vector.broadcast %cst_95 : f32 to vector<8x128xf32>
    %383 = arith.subf %382, %378 : vector<8x128xf32>
    %384 = arith.mulf %383, %381 : vector<8x128xf32>
    %385 = arith.mulf %378, %321 : vector<8x128xf32>
    %386 = arith.addf %384, %385 : vector<8x128xf32>
    %387 = vector.extract_strided_slice %356 {offsets = [0, 0], sizes = [8, 128], strides = [1, 1]} : vector<8x384xf32> to vector<8x128xf32>
    %388 = vector.extract_strided_slice %356 {offsets = [0, 128], sizes = [8, 128], strides = [1, 1]} : vector<8x384xf32> to vector<8x128xf32>
    %389 = vector.extract_strided_slice %356 {offsets = [0, 256], sizes = [8, 128], strides = [1, 1]} : vector<8x384xf32> to vector<8x128xf32>
    %390 = vector.extract_strided_slice %360 {offsets = [0, 0], sizes = [8, 128], strides = [1, 1]} : vector<8x384xf32> to vector<8x128xf32>
    %391 = vector.extract_strided_slice %360 {offsets = [0, 128], sizes = [8, 128], strides = [1, 1]} : vector<8x384xf32> to vector<8x128xf32>
    %392 = vector.extract_strided_slice %360 {offsets = [0, 256], sizes = [8, 128], strides = [1, 1]} : vector<8x384xf32> to vector<8x128xf32>
    %393 = arith.addf %387, %390 : vector<8x128xf32>
    %394 = arith.negf %393 : vector<8x128xf32>
    %395 = math.exp %394 : vector<8x128xf32>
    %cst_96 = arith.constant 1.000000e+00 : f32
    %396 = vector.broadcast %cst_96 : f32 to vector<8x128xf32>
    %397 = arith.addf %396, %395 : vector<8x128xf32>
    %398 = arith.divf %396, %397 : vector<8x128xf32>
    %399 = arith.addf %388, %391 : vector<8x128xf32>
    %400 = arith.negf %399 : vector<8x128xf32>
    %401 = math.exp %400 : vector<8x128xf32>
    %cst_97 = arith.constant 1.000000e+00 : f32
    %402 = vector.broadcast %cst_97 : f32 to vector<8x128xf32>
    %403 = arith.addf %402, %401 : vector<8x128xf32>
    %404 = arith.divf %402, %403 : vector<8x128xf32>
    %405 = arith.mulf %398, %392 : vector<8x128xf32>
    %406 = arith.addf %389, %405 : vector<8x128xf32>
    %407 = math.tanh %406 : vector<8x128xf32>
    %cst_98 = arith.constant 1.000000e+00 : f32
    %408 = vector.broadcast %cst_98 : f32 to vector<8x128xf32>
    %409 = arith.subf %408, %404 : vector<8x128xf32>
    %410 = arith.mulf %409, %407 : vector<8x128xf32>
    %411 = arith.mulf %404, %347 : vector<8x128xf32>
    %412 = arith.addf %410, %411 : vector<8x128xf32>
    %c6_i32 = arith.constant 6 : i32
    %c8_i32_99 = arith.constant 8 : i32
    %413 = arith.muli %c6_i32, %c8_i32_99 : i32
    %414 = tpu.assume_multiple %413, 8 : i32
    %c7_i32_100 = arith.constant 7 : i32
    %415 = arith.subi %c7_i32_100, %c6_i32 : i32
    %c8_i32_101 = arith.constant 8 : i32
    %416 = arith.muli %415, %c8_i32_101 : i32
    %417 = tpu.assume_multiple %416, 8 : i32
    %418 = arith.index_cast %414 : i32 to index
    %c0_102 = arith.constant 0 : index
    %419 = vector.load %arg12[%418, %c0_102] : memref<64x768xf32, #tpu.memory_space<vmem>>, vector<8x384xf32>
    %420 = arith.index_cast %417 : i32 to index
    %c384_103 = arith.constant 384 : index
    %421 = vector.load %arg12[%420, %c384_103] : memref<64x768xf32, #tpu.memory_space<vmem>>, vector<8x384xf32>
    %cst_104 = arith.constant dense<0.000000e+00> : vector<8x384xf32>
    %422 = tpu.matmul %386, %8, %cst_104 {dimension_numbers = #tpu.dot_dimension_numbers<[1], [0], [0], [1], [0, 0, 1, 1], [], []>} : vector<8x128xf32>, vector<128x384xf32>, vector<8x384xf32> -> vector<8x384xf32>
    %423 = arith.addf %422, %14 : vector<8x384xf32>
    %cst_105 = arith.constant dense<0.000000e+00> : vector<8x384xf32>
    %424 = tpu.matmul %412, %10, %cst_105 {dimension_numbers = #tpu.dot_dimension_numbers<[1], [0], [0], [1], [0, 0, 1, 1], [], []>} : vector<8x128xf32>, vector<128x384xf32>, vector<8x384xf32> -> vector<8x384xf32>
    %425 = arith.addf %424, %18 : vector<8x384xf32>
    %426 = vector.extract_strided_slice %419 {offsets = [0, 0], sizes = [8, 128], strides = [1, 1]} : vector<8x384xf32> to vector<8x128xf32>
    %427 = vector.extract_strided_slice %419 {offsets = [0, 128], sizes = [8, 128], strides = [1, 1]} : vector<8x384xf32> to vector<8x128xf32>
    %428 = vector.extract_strided_slice %419 {offsets = [0, 256], sizes = [8, 128], strides = [1, 1]} : vector<8x384xf32> to vector<8x128xf32>
    %429 = vector.extract_strided_slice %423 {offsets = [0, 0], sizes = [8, 128], strides = [1, 1]} : vector<8x384xf32> to vector<8x128xf32>
    %430 = vector.extract_strided_slice %423 {offsets = [0, 128], sizes = [8, 128], strides = [1, 1]} : vector<8x384xf32> to vector<8x128xf32>
    %431 = vector.extract_strided_slice %423 {offsets = [0, 256], sizes = [8, 128], strides = [1, 1]} : vector<8x384xf32> to vector<8x128xf32>
    %432 = arith.addf %426, %429 : vector<8x128xf32>
    %433 = arith.negf %432 : vector<8x128xf32>
    %434 = math.exp %433 : vector<8x128xf32>
    %cst_106 = arith.constant 1.000000e+00 : f32
    %435 = vector.broadcast %cst_106 : f32 to vector<8x128xf32>
    %436 = arith.addf %435, %434 : vector<8x128xf32>
    %437 = arith.divf %435, %436 : vector<8x128xf32>
    %438 = arith.addf %427, %430 : vector<8x128xf32>
    %439 = arith.negf %438 : vector<8x128xf32>
    %440 = math.exp %439 : vector<8x128xf32>
    %cst_107 = arith.constant 1.000000e+00 : f32
    %441 = vector.broadcast %cst_107 : f32 to vector<8x128xf32>
    %442 = arith.addf %441, %440 : vector<8x128xf32>
    %443 = arith.divf %441, %442 : vector<8x128xf32>
    %444 = arith.mulf %437, %431 : vector<8x128xf32>
    %445 = arith.addf %428, %444 : vector<8x128xf32>
    %446 = math.tanh %445 : vector<8x128xf32>
    %cst_108 = arith.constant 1.000000e+00 : f32
    %447 = vector.broadcast %cst_108 : f32 to vector<8x128xf32>
    %448 = arith.subf %447, %443 : vector<8x128xf32>
    %449 = arith.mulf %448, %446 : vector<8x128xf32>
    %450 = arith.mulf %443, %386 : vector<8x128xf32>
    %451 = arith.addf %449, %450 : vector<8x128xf32>
    %452 = vector.extract_strided_slice %421 {offsets = [0, 0], sizes = [8, 128], strides = [1, 1]} : vector<8x384xf32> to vector<8x128xf32>
    %453 = vector.extract_strided_slice %421 {offsets = [0, 128], sizes = [8, 128], strides = [1, 1]} : vector<8x384xf32> to vector<8x128xf32>
    %454 = vector.extract_strided_slice %421 {offsets = [0, 256], sizes = [8, 128], strides = [1, 1]} : vector<8x384xf32> to vector<8x128xf32>
    %455 = vector.extract_strided_slice %425 {offsets = [0, 0], sizes = [8, 128], strides = [1, 1]} : vector<8x384xf32> to vector<8x128xf32>
    %456 = vector.extract_strided_slice %425 {offsets = [0, 128], sizes = [8, 128], strides = [1, 1]} : vector<8x384xf32> to vector<8x128xf32>
    %457 = vector.extract_strided_slice %425 {offsets = [0, 256], sizes = [8, 128], strides = [1, 1]} : vector<8x384xf32> to vector<8x128xf32>
    %458 = arith.addf %452, %455 : vector<8x128xf32>
    %459 = arith.negf %458 : vector<8x128xf32>
    %460 = math.exp %459 : vector<8x128xf32>
    %cst_109 = arith.constant 1.000000e+00 : f32
    %461 = vector.broadcast %cst_109 : f32 to vector<8x128xf32>
    %462 = arith.addf %461, %460 : vector<8x128xf32>
    %463 = arith.divf %461, %462 : vector<8x128xf32>
    %464 = arith.addf %453, %456 : vector<8x128xf32>
    %465 = arith.negf %464 : vector<8x128xf32>
    %466 = math.exp %465 : vector<8x128xf32>
    %cst_110 = arith.constant 1.000000e+00 : f32
    %467 = vector.broadcast %cst_110 : f32 to vector<8x128xf32>
    %468 = arith.addf %467, %466 : vector<8x128xf32>
    %469 = arith.divf %467, %468 : vector<8x128xf32>
    %470 = arith.mulf %463, %457 : vector<8x128xf32>
    %471 = arith.addf %454, %470 : vector<8x128xf32>
    %472 = math.tanh %471 : vector<8x128xf32>
    %cst_111 = arith.constant 1.000000e+00 : f32
    %473 = vector.broadcast %cst_111 : f32 to vector<8x128xf32>
    %474 = arith.subf %473, %469 : vector<8x128xf32>
    %475 = arith.mulf %474, %472 : vector<8x128xf32>
    %476 = arith.mulf %469, %412 : vector<8x128xf32>
    %477 = arith.addf %475, %476 : vector<8x128xf32>
    %c7_i32_112 = arith.constant 7 : i32
    %c8_i32_113 = arith.constant 8 : i32
    %478 = arith.muli %c7_i32_112, %c8_i32_113 : i32
    %479 = tpu.assume_multiple %478, 8 : i32
    %c7_i32_114 = arith.constant 7 : i32
    %480 = arith.subi %c7_i32_114, %c7_i32_112 : i32
    %c8_i32_115 = arith.constant 8 : i32
    %481 = arith.muli %480, %c8_i32_115 : i32
    %482 = tpu.assume_multiple %481, 8 : i32
    %483 = arith.index_cast %479 : i32 to index
    %c0_116 = arith.constant 0 : index
    %484 = vector.load %arg12[%483, %c0_116] : memref<64x768xf32, #tpu.memory_space<vmem>>, vector<8x384xf32>
    %485 = arith.index_cast %482 : i32 to index
    %c384_117 = arith.constant 384 : index
    %486 = vector.load %arg12[%485, %c384_117] : memref<64x768xf32, #tpu.memory_space<vmem>>, vector<8x384xf32>
    %cst_118 = arith.constant dense<0.000000e+00> : vector<8x384xf32>
    %487 = tpu.matmul %451, %8, %cst_118 {dimension_numbers = #tpu.dot_dimension_numbers<[1], [0], [0], [1], [0, 0, 1, 1], [], []>} : vector<8x128xf32>, vector<128x384xf32>, vector<8x384xf32> -> vector<8x384xf32>
    %488 = arith.addf %487, %14 : vector<8x384xf32>
    %cst_119 = arith.constant dense<0.000000e+00> : vector<8x384xf32>
    %489 = tpu.matmul %477, %10, %cst_119 {dimension_numbers = #tpu.dot_dimension_numbers<[1], [0], [0], [1], [0, 0, 1, 1], [], []>} : vector<8x128xf32>, vector<128x384xf32>, vector<8x384xf32> -> vector<8x384xf32>
    %490 = arith.addf %489, %18 : vector<8x384xf32>
    %491 = vector.extract_strided_slice %484 {offsets = [0, 0], sizes = [8, 128], strides = [1, 1]} : vector<8x384xf32> to vector<8x128xf32>
    %492 = vector.extract_strided_slice %484 {offsets = [0, 128], sizes = [8, 128], strides = [1, 1]} : vector<8x384xf32> to vector<8x128xf32>
    %493 = vector.extract_strided_slice %484 {offsets = [0, 256], sizes = [8, 128], strides = [1, 1]} : vector<8x384xf32> to vector<8x128xf32>
    %494 = vector.extract_strided_slice %488 {offsets = [0, 0], sizes = [8, 128], strides = [1, 1]} : vector<8x384xf32> to vector<8x128xf32>
    %495 = vector.extract_strided_slice %488 {offsets = [0, 128], sizes = [8, 128], strides = [1, 1]} : vector<8x384xf32> to vector<8x128xf32>
    %496 = vector.extract_strided_slice %488 {offsets = [0, 256], sizes = [8, 128], strides = [1, 1]} : vector<8x384xf32> to vector<8x128xf32>
    %497 = arith.addf %491, %494 : vector<8x128xf32>
    %498 = arith.negf %497 : vector<8x128xf32>
    %499 = math.exp %498 : vector<8x128xf32>
    %cst_120 = arith.constant 1.000000e+00 : f32
    %500 = vector.broadcast %cst_120 : f32 to vector<8x128xf32>
    %501 = arith.addf %500, %499 : vector<8x128xf32>
    %502 = arith.divf %500, %501 : vector<8x128xf32>
    %503 = arith.addf %492, %495 : vector<8x128xf32>
    %504 = arith.negf %503 : vector<8x128xf32>
    %505 = math.exp %504 : vector<8x128xf32>
    %cst_121 = arith.constant 1.000000e+00 : f32
    %506 = vector.broadcast %cst_121 : f32 to vector<8x128xf32>
    %507 = arith.addf %506, %505 : vector<8x128xf32>
    %508 = arith.divf %506, %507 : vector<8x128xf32>
    %509 = arith.mulf %502, %496 : vector<8x128xf32>
    %510 = arith.addf %493, %509 : vector<8x128xf32>
    %511 = math.tanh %510 : vector<8x128xf32>
    %cst_122 = arith.constant 1.000000e+00 : f32
    %512 = vector.broadcast %cst_122 : f32 to vector<8x128xf32>
    %513 = arith.subf %512, %508 : vector<8x128xf32>
    %514 = arith.mulf %513, %511 : vector<8x128xf32>
    %515 = arith.mulf %508, %451 : vector<8x128xf32>
    %516 = arith.addf %514, %515 : vector<8x128xf32>
    %517 = vector.extract_strided_slice %486 {offsets = [0, 0], sizes = [8, 128], strides = [1, 1]} : vector<8x384xf32> to vector<8x128xf32>
    %518 = vector.extract_strided_slice %486 {offsets = [0, 128], sizes = [8, 128], strides = [1, 1]} : vector<8x384xf32> to vector<8x128xf32>
    %519 = vector.extract_strided_slice %486 {offsets = [0, 256], sizes = [8, 128], strides = [1, 1]} : vector<8x384xf32> to vector<8x128xf32>
    %520 = vector.extract_strided_slice %490 {offsets = [0, 0], sizes = [8, 128], strides = [1, 1]} : vector<8x384xf32> to vector<8x128xf32>
    %521 = vector.extract_strided_slice %490 {offsets = [0, 128], sizes = [8, 128], strides = [1, 1]} : vector<8x384xf32> to vector<8x128xf32>
    %522 = vector.extract_strided_slice %490 {offsets = [0, 256], sizes = [8, 128], strides = [1, 1]} : vector<8x384xf32> to vector<8x128xf32>
    %523 = arith.addf %517, %520 : vector<8x128xf32>
    %524 = arith.negf %523 : vector<8x128xf32>
    %525 = math.exp %524 : vector<8x128xf32>
    %cst_123 = arith.constant 1.000000e+00 : f32
    %526 = vector.broadcast %cst_123 : f32 to vector<8x128xf32>
    %527 = arith.addf %526, %525 : vector<8x128xf32>
    %528 = arith.divf %526, %527 : vector<8x128xf32>
    %529 = arith.addf %518, %521 : vector<8x128xf32>
    %530 = arith.negf %529 : vector<8x128xf32>
    %531 = math.exp %530 : vector<8x128xf32>
    %cst_124 = arith.constant 1.000000e+00 : f32
    %532 = vector.broadcast %cst_124 : f32 to vector<8x128xf32>
    %533 = arith.addf %532, %531 : vector<8x128xf32>
    %534 = arith.divf %532, %533 : vector<8x128xf32>
    %535 = arith.mulf %528, %522 : vector<8x128xf32>
    %536 = arith.addf %519, %535 : vector<8x128xf32>
    %537 = math.tanh %536 : vector<8x128xf32>
    %cst_125 = arith.constant 1.000000e+00 : f32
    %538 = vector.broadcast %cst_125 : f32 to vector<8x128xf32>
    %539 = arith.subf %538, %534 : vector<8x128xf32>
    %540 = arith.mulf %539, %537 : vector<8x128xf32>
    %541 = arith.mulf %534, %477 : vector<8x128xf32>
    %542 = arith.addf %540, %541 : vector<8x128xf32>
    %c8_i32_126 = arith.constant 8 : i32
    %c0_127 = arith.constant 0 : index
    %c0_128 = arith.constant 0 : index
    %c0_129 = arith.constant 0 : index
    %543 = vector.load %arg11[%c0_127, %c0_128, %c0_129] : memref<2x8x128xf32, #tpu.memory_space<vmem>>, vector<1x8x128xf32>
    %544 = vector.shape_cast %543 : vector<1x8x128xf32> to vector<8x128xf32>
    %545 = vector.shape_cast %516 : vector<8x128xf32> to vector<1x8x128xf32>
    tpu.vector_store %arg11[%c0_127, %c0_128, %c0_129], %545 {strides = array<i32>} : memref<2x8x128xf32, #tpu.memory_space<vmem>>, vector<1x8x128xf32>,
    %c1_130 = arith.constant 1 : index
    %c0_131 = arith.constant 0 : index
    %c0_132 = arith.constant 0 : index
    %546 = vector.load %arg11[%c1_130, %c0_131, %c0_132] : memref<2x8x128xf32, #tpu.memory_space<vmem>>, vector<1x8x128xf32>
    %547 = vector.shape_cast %546 : vector<1x8x128xf32> to vector<8x128xf32>
    %548 = vector.shape_cast %542 : vector<8x128xf32> to vector<1x8x128xf32>
    tpu.vector_store %arg11[%c1_130, %c0_131, %c0_132], %548 {strides = array<i32>} : memref<2x8x128xf32, #tpu.memory_space<vmem>>, vector<1x8x128xf32>,
    %549 = tpu.concatenate %516, %542 in 1 : vector<8x128xf32>, vector<8x128xf32> -> vector<8x256xf32>
    %c0_133 = arith.constant 0 : index
    %c0_134 = arith.constant 0 : index
    %550 = vector.load %arg6[%c0_133, %c0_134] : memref<256x128xf32, #tpu.memory_space<vmem>>, vector<256x128xf32>
    %cst_135 = arith.constant dense<0.000000e+00> : vector<8x128xf32>
    %551 = tpu.matmul %549, %550, %cst_135 {dimension_numbers = #tpu.dot_dimension_numbers<[1], [0], [0], [1], [0, 0, 1, 1], [], []>} : vector<8x256xf32>, vector<256x128xf32>, vector<8x128xf32> -> vector<8x128xf32>
    %c0_136 = arith.constant 0 : index
    %c0_137 = arith.constant 0 : index
    %552 = vector.load %arg7[%c0_136, %c0_137] : memref<1x128xf32, #tpu.memory_space<vmem>>, vector<1x128xf32>
    %553 = vector.broadcast %552 : vector<1x128xf32> to vector<8x128xf32>
    %554 = arith.addf %551, %553 : vector<8x128xf32>
    %c0_138 = arith.constant 0 : index
    %c0_139 = arith.constant 0 : index
    %555 = vector.load %arg8[%c0_138, %c0_139] : memref<128x128xf32, #tpu.memory_space<vmem>>, vector<128x128xf32>
    %cst_140 = arith.constant dense<0.000000e+00> : vector<8x128xf32>
    %556 = tpu.matmul %554, %555, %cst_140 {dimension_numbers = #tpu.dot_dimension_numbers<[1], [0], [0], [1], [0, 0, 1, 1], [], []>} : vector<8x128xf32>, vector<128x128xf32>, vector<8x128xf32> -> vector<8x128xf32>
    %c0_141 = arith.constant 0 : index
    %c0_142 = arith.constant 0 : index
    %557 = vector.load %arg9[%c0_141, %c0_142] : memref<1x128xf32, #tpu.memory_space<vmem>>, vector<1x128xf32>
    %558 = vector.broadcast %557 : vector<1x128xf32> to vector<8x128xf32>
    %559 = arith.addf %556, %558 : vector<8x128xf32>
    %c0_143 = arith.constant 0 : index
    %c0_144 = arith.constant 0 : index
    %560 = vector.load %arg10[%c0_143, %c0_144] : memref<8x128xf32, #tpu.memory_space<vmem>>, vector<8x128xf32>
    tpu.vector_store %arg10[%c0_143, %c0_144], %559 {strides = array<i32>} : memref<8x128xf32, #tpu.memory_space<vmem>>, vector<8x128xf32>,
    return
  }
}

</mosaic_0001>

<bundles_post_ra>
// kernel: bigru_forward.1
= control target key start
LH: loop header
LB: loop body
LE: loop exit
PB: predicated region body
PF: predicated region fallthrough
CT: control target
= control target key end

     0   :  { %v8500_v1 = vmov 0   ;;  %vm5166_vm0 = vmmov 0   ;;  %s8488_s2 = inlined_call_operand.vmem [shape: bf16[128,768], index: 2, kind: input, shape index: {}]   ;;  %s8489_s0 = inlined_call_operand.vmem [shape: bf16[64,128], index: 0, kind: input, shape index: {}]   ;;  %s8490_s4 = inlined_call_operand.vmem [shape: f32[2,128,384], index: 4, kind: input, shape index: {}]   ;;  %s8491_s1 = inlined_call_operand.vmem [shape: f32[2,8,128], index: 1, kind: input, shape index: {}]   ;;  %s8492_s3 = inlined_call_operand.vmem [shape: f32[1,768], index: 3, kind: input, shape index: {}]   ;;  %s8493_s5 = inlined_call_operand.vmem [shape: f32[2,1,384], index: 5, kind: input, shape index: {}]   ;;  %s8494_s6 = inlined_call_operand.vmem [shape: f32[256,128], index: 6, kind: input, shape index: {}]   ;;  %s8495_s8 = inlined_call_operand.vmem [shape: f32[128,128], index: 8, kind: input, shape index: {}]   ;;  %s8496_s11 = inlined_call_operand.vmem [shape: f32[2,8,128], index: 11, kind: output, shape index: {1}]   ;;  %s8497_s7 = inlined_call_operand.vmem [shape: f32[1,128], index: 7, kind: input, shape index: {}]   ;;  %s8498_s9 = inlined_call_operand.vmem [shape: f32[1,128], index: 9, kind: input, shape index: {}]   ;;  %s8499_s10 = inlined_call_operand.vmem [shape: f32[8,128], index: 10, kind: output, shape index: {0}]  }
   0x1   :  { %v4736_v0 = vld [vmem:[%s8488_s2 + $0x154] ss:$24 sps:$4 sm:$0xff]   ;;  %422 = vmatprep.mubr.bf16.mxu0 %v8500_v1  ;;  %495 = vmatprep.mubr.bf16.mxu1 %v8500_v1  ;;  %v4740_v3 = vld [vmem:[%s8488_s2 + $0x150] ss:$24 sps:$4 sm:$0xff]   ;;  %v4742_v5 = vld [vmem:[%s8488_s2 + $0x124] ss:$24 sps:$4 sm:$0xff]  }
   0x2   :  { %v4738_v2 = vld [vmem:[%s8488_s2 + $0x15c] ss:$24 sps:$4 sm:$0xff]   ;;  %390 = vmatprep.subr.bf16.mxu0 %v4736_v0  ;;  %v4741_v4 = vld [vmem:[%s8488_s2 + $0x158] ss:$24 sps:$4 sm:$0xff]   ;;  %v4744_v6 = vld [vmem:[%s8488_s2 + $0x12c] ss:$24 sps:$4 sm:$0xff]  }
   0x3   :  { %463 = vmatprep.subr.bf16.mxu1 %v4738_v2  ;;  %391 = vmatpush1.bf16.msra.mxu0 %v4740_v3  ;;  %v4746_v7 = vld [vmem:[%s8488_s2 + $0x120] ss:$24 sps:$4 sm:$0xff]   ;;  %v4748_v9 = vld [vmem:[%s8488_s2 + $0xf4] ss:$24 sps:$4 sm:$0xff]   ;;  %v4752_v11 = vld [vmem:[%s8488_s2 + $0xf0] ss:$24 sps:$4 sm:$0xff]  }
   0x4   :  { %464 = vmatpush1.bf16.msra.mxu1 %v4741_v4  ;;  %392 = vmatprep.subr.bf16.mxu0 %v4742_v5  ;;  %v4747_v8 = vld [vmem:[%s8488_s2 + $0x128] ss:$24 sps:$4 sm:$0xff]   ;;  %v4750_v10 = vld [vmem:[%s8488_s2 + $0xfc] ss:$24 sps:$4 sm:$0xff]   ;;  %v4753_v12 = vld [vmem:[%s8488_s2 + $0xf8] ss:$24 sps:$4 sm:$0xff]  }
   0x5   :  { %465 = vmatprep.subr.bf16.mxu1 %v4744_v6  ;;  %v4754_v13 = vld [vmem:[%s8488_s2 + $0xc4] ss:$24 sps:$4 sm:$0xff]   ;;  %v4758_v15 = vld [vmem:[%s8488_s2 + $0xc0] ss:$24 sps:$4 sm:$0xff]   ;;  %v4760_v17 = vld [vmem:[%s8488_s2 + $0x94] ss:$24 sps:$4 sm:$0xff]  }
   0x6   :  { %v4756_v14 = vld [vmem:[%s8488_s2 + $0xcc] ss:$24 sps:$4 sm:$0xff]   ;;  %v4759_v16 = vld [vmem:[%s8488_s2 + $0xc8] ss:$24 sps:$4 sm:$0xff]   ;;  %v4762_v18 = vld [vmem:[%s8488_s2 + $0x9c] ss:$24 sps:$4 sm:$0xff]  }
   0x7   :  { %393 = vmatpush1.bf16.msra.mxu0 %v4746_v7  ;;  %v4764_v19 = vld [vmem:[%s8488_s2 + $0x90] ss:$24 sps:$4 sm:$0xff]   ;;  %v4766_v21 = vld [vmem:[%s8488_s2 + $0x64] ss:$24 sps:$4 sm:$0xff]   ;;  %v4770_v23 = vld [vmem:[%s8488_s2 + $0x60] ss:$24 sps:$4 sm:$0xff]  }
   0x8   :  { %466 = vmatpush1.bf16.msra.mxu1 %v4747_v8  ;;  %394 = vmatprep.subr.bf16.mxu0 %v4748_v9  ;;  %v4765_v20 = vld [vmem:[%s8488_s2 + $0x98] ss:$24 sps:$4 sm:$0xff]   ;;  %v4768_v22 = vld [vmem:[%s8488_s2 + $0x6c] ss:$24 sps:$4 sm:$0xff]   ;;  %v4771_v24 = vld [vmem:[%s8488_s2 + $0x68] ss:$24 sps:$4 sm:$0xff]  }
   0x9   :  { %467 = vmatprep.subr.bf16.mxu1 %v4750_v10  ;;  %v4772_v25 = vld [vmem:[%s8488_s2 + $0x34] ss:$24 sps:$4 sm:$0xff]   ;;  %v4776_v27 = vld [vmem:[%s8488_s2 + $0x30] ss:$24 sps:$4 sm:$0xff]   ;;  %v4778_v29 = vld [vmem:[%s8488_s2 + $0x4] ss:$24 sps:$4 sm:$0xff]  }
   0xa   :  { %v4774_v26 = vld [vmem:[%s8488_s2 + $0x3c] ss:$24 sps:$4 sm:$0xff]   ;;  %v4777_v28 = vld [vmem:[%s8488_s2 + $0x38] ss:$24 sps:$4 sm:$0xff]   ;;  %v4780_v30 = vld [vmem:[%s8488_s2 + $0xc] ss:$24 sps:$4 sm:$0xff]  }
   0xb   :  { %395 = vmatpush1.bf16.msra.mxu0 %v4752_v11  ;;  %v4782_v31 = vld [vmem:[%s8488_s2] ss:$24 sps:$4 sm:$0xff]   ;;  %v4787_v33 = vld [vmem:[%s8488_s2 + $0x164] ss:$24 sps:$4 sm:$0xff]   ;;  %v5331_v34 = vld [vmem:[%s8490_s4 + $0x170] sm:$0xff] }
   0xc   :  { %468 = vmatpush1.bf16.msra.mxu1 %v4753_v12  ;;  %396 = vmatprep.subr.bf16.mxu0 %v4754_v13  ;;  %v4783_v32 = vld [vmem:[%s8488_s2 + $0x8] ss:$24 sps:$4 sm:$0xff]   ;;  %v4790_v38 = vld [vmem:[%s8488_s2 + $0x134] ss:$24 sps:$4 sm:$0xff]   ;;  %v5353_v39 = vld [vmem:[%s8490_s4 + $0x158] sm:$0xff] }
   0xd   :  { %469 = vmatprep.subr.bf16.mxu1 %v4756_v14  ;;  %v5336_v35 = vld [vmem:[%s8489_s0] sm:$0xff]   ;;  %v5345_v37 = vld [vmem:[%s8490_s4 + $0x168] sm:$0xff]  ;;  %v5360_v40 = vld [vmem:[%s8490_s4 + $0x150] sm:$0xff] }
   0xe   :  { %v4785_v36 = vld [vmem:[%s8488_s2 + $0x160] ss:$24 sps:$4 sm:$0xff]   ;;  %v4788_v41 = vld [vmem:[%s8488_s2 + $0x130] ss:$24 sps:$4 sm:$0xff]   ;;  %v4794_v44 = vld [vmem:[%s8488_s2 + $0x104] ss:$24 sps:$4 sm:$0xff]  }
   0xf   :  { %397 = vmatpush1.bf16.msra.mxu0 %v4758_v15  ;;  %v5369_v42 = vld [vmem:[%s8490_s4 + $0x140] sm:$0xff]  ;;  %v5375_v43 = vld [vmem:[%s8490_s4 + $0x138] sm:$0xff]  ;;  %v5384_v45 = vld [vmem:[%s8490_s4 + $0x128] sm:$0xff] }
  0x10   :  { %470 = vmatpush1.bf16.msra.mxu1 %v4759_v16  ;;  %398 = vmatprep.subr.bf16.mxu0 %v4760_v17  ;;  %v5392_v46 = vld [vmem:[%s8490_s4 + $0x120] sm:$0xff]  ;;  %v5397_v47 = vld [vmem:[%s8489_s0 + $0x8] sm:$0xff]   ;;  %v5406_v49 = vld [vmem:[%s8490_s4 + $0x110] sm:$0xff] }
  0x11   :  { %471 = vmatprep.subr.bf16.mxu1 %v4762_v18  ;;  %v4792_v48 = vld [vmem:[%s8488_s2 + $0x100] ss:$24 sps:$4 sm:$0xff]   ;;  %v4797_v50 = vld [vmem:[%s8488_s2 + $0xd4] ss:$24 sps:$4 sm:$0xff]   ;;  %v4795_v54 = vld [vmem:[%s8488_s2 + $0xd0] ss:$24 sps:$4 sm:$0xff]  }
  0x12   :  { %v5416_v51 = vld [vmem:[%s8490_s4 + $0x108] sm:$0xff]  ;;  %v5423_v52 = vld [vmem:[%s8490_s4 + $0xf8] sm:$0xff]  ;;  %v5428_v53 = vld [vmem:[%s8490_s4 + $0xf0] sm:$0xff] }
  0x13   :  { %399 = vmatpush1.bf16.msra.mxu0 %v4764_v19  ;;  %v5438_v55 = vld [vmem:[%s8490_s4 + $0xe0] sm:$0xff]  ;;  %v5447_v57 = vld [vmem:[%s8490_s4 + $0xd8] sm:$0xff]  ;;  %v5454_v58 = vld [vmem:[%s8490_s4 + $0xc8] sm:$0xff] }
  0x14   :  { %472 = vmatpush1.bf16.msra.mxu1 %v4765_v20  ;;  %400 = vmatprep.subr.bf16.mxu0 %v4766_v21  ;;  %v4801_v56 = vld [vmem:[%s8488_s2 + $0xa4] ss:$24 sps:$4 sm:$0xff]   ;;  %v5460_v59 = vld [vmem:[%s8489_s0 + $0x10] sm:$0xff]   ;;  %v4799_v61 = vld [vmem:[%s8488_s2 + $0xa0] ss:$24 sps:$4 sm:$0xff]  }
  0x15   :  { %473 = vmatprep.subr.bf16.mxu1 %v4768_v22  ;;  %v5466_v60 = vld [vmem:[%s8490_s4 + $0xc0] sm:$0xff]  ;;  %v5475_v62 = vld [vmem:[%s8490_s4 + $0xb0] sm:$0xff]  ;;  %v5481_v63 = vld [vmem:[%s8490_s4 + $0xa8] sm:$0xff]  ;;  %v8511_v22 = vmov 0.0  }
  0x16   :  { %v4804_v0 = vld [vmem:[%s8488_s2 + $0x74] ss:$24 sps:$4 sm:$0xff]   ;;  %v5491_v2 = vld [vmem:[%s8490_s4 + $0x98] sm:$0xff]  ;;  %v4802_v4 = vld [vmem:[%s8488_s2 + $0x70] ss:$24 sps:$4 sm:$0xff]  }
  0x17   :  { %401 = vmatpush1.bf16.msra.mxu0 %v4770_v23  ;;  %v5498_v3 = vld [vmem:[%s8490_s4 + $0x90] sm:$0xff]  ;;  %v5507_v5 = vld [vmem:[%s8490_s4 + $0x80] sm:$0xff]  ;;  %v5513_v6 = vld [vmem:[%s8490_s4 + $0x78] sm:$0xff] }
  0x18   :  { %474 = vmatpush1.bf16.msra.mxu1 %v4771_v24  ;;  %402 = vmatprep.subr.bf16.mxu0 %v4772_v25  ;;  %v4808_v7 = vld [vmem:[%s8488_s2 + $0x44] ss:$24 sps:$4 sm:$0xff]   ;;  %v5522_v8 = vld [vmem:[%s8490_s4 + $0x68] sm:$0xff]  ;;  %v4806_v11 = vld [vmem:[%s8488_s2 + $0x40] ss:$24 sps:$4 sm:$0xff]  }
  0x19   :  { %475 = vmatprep.subr.bf16.mxu1 %v4774_v26  ;;  %v5528_v9 = vld [vmem:[%s8489_s0 + $0x18] sm:$0xff]   ;;  %v5535_v10 = vld [vmem:[%s8490_s4 + $0x60] sm:$0xff]  ;;  %v5544_v12 = vld [vmem:[%s8490_s4 + $0x50] sm:$0xff] }
  0x1a   :  { %v5550_v13 = vld [vmem:[%s8490_s4 + $0x48] sm:$0xff]  ;;  %v5560_v15 = vld [vmem:[%s8490_s4 + $0x38] sm:$0xff]  ;;  %v5567_v16 = vld [vmem:[%s8490_s4 + $0x30] sm:$0xff] }
  0x1b   :  { %403 = vmatpush1.bf16.msra.mxu0 %v4776_v27  ;;  %v4811_v14 = vld [vmem:[%s8488_s2 + $0x14] ss:$24 sps:$4 sm:$0xff]   ;;  %v4809_v17 = vld [vmem:[%s8488_s2 + $0x10] ss:$24 sps:$4 sm:$0xff]   ;;  %v5576_v18 = vld [vmem:[%s8490_s4 + $0x20] sm:$0xff] }
  0x1c   :  { %476 = vmatpush1.bf16.msra.mxu1 %v4777_v28  ;;  %404 = vmatprep.subr.bf16.mxu0 %v4778_v29  ;;  %v5582_v19 = vld [vmem:[%s8490_s4 + $0x18] sm:$0xff]  ;;  %v5588_v20 = vld [vmem:[%s8490_s4 + $0x8] sm:$0xff]  ;;  %v5595_v21 = vld [vmem:[%s8490_s4] sm:$0xff] }
  0x1d   :  { %477 = vmatprep.subr.bf16.mxu1 %v4780_v30  ;;  %v5602_v23 = vld [vmem:[%s8491_s1] sm:$0xff]  ;;  %v5609_v24 = vld [vmem:[%s8490_s4 + $0x2f0] sm:$0xff]  ;;  %v5614_v25 = vld [vmem:[%s8490_s4 + $0x178] sm:$0xff] }
  0x1e   :  { %v5620_v26 = vld [vmem:[%s8490_s4 + $0x2e8] sm:$0xff]  ;;  %v5627_v27 = vld [vmem:[%s8490_s4 + $0x2d8] sm:$0xff]  ;;  %v5632_v28 = vld [vmem:[%s8490_s4 + $0x160] sm:$0xff] }
  0x1f   :  { %405 = vmatpush1.bf16.msra.mxu0 %v4782_v31  ;;  %v5639_v29 = vld [vmem:[%s8490_s4 + $0x2d0] sm:$0xff]  ;;  %v5646_v30 = vld [vmem:[%s8490_s4 + $0x2c0] sm:$0xff]  ;;  %v5651_v31 = vld [vmem:[%s8490_s4 + $0x148] sm:$0xff] }
  0x20   :  { %478 = vmatpush1.bf16.msra.mxu1 %v4783_v32  ;;  %536 = vmatprep.subr.bf16.mxu0 %v4787_v33  ;;  %v5658_v32 = vld [vmem:[%s8490_s4 + $0x2b8] sm:$0xff]  ;;  %v5665_v33 = vld [vmem:[%s8490_s4 + $0x2a8] sm:$0xff] }
  0x21   :  { %804 = vmatprep.subr.mxu1 %v5331_v34 }
  0x22   :  { %423 = vmatmul.mubr.bf16.vlgmr.msra.gmra.mxu0 %v5336_v35 }
  0x23   :  { %496 = vmatmul.mubr.bf16.vlgmr.msra.gmra.mxu1 %v5336_v35  ;;  %537 = vmatpush1.bf16.msra.mxu0 %v4785_v36  ;;  %v5677_v36 = vld [vmem:[%s8490_s4 + $0x2a0] sm:$0xff] }
  0x24   :  { %805 = vmatpush1.msra.mxu1 %v5345_v37  ;;  %538 = vmatprep.subr.bf16.mxu0 %v4790_v38  ;;  %v5686_v38 = vld [vmem:[%s8490_s4 + $0x290] sm:$0xff] }
  0x25   :  { %806 = vmatprep.subr.mxu1 %v5353_v39  ;;  %432 = vmatprep.mubr.bf16.mxu0 %v8500_v1 }
  0x26   :  { %807 = vmatpush1.msra.mxu1 %v5360_v40  ;;  %505 = vmatprep.mubr.bf16.mxu1 %v8500_v1 }
  0x27   :  { %808 = vmatprep.subr.mxu1 %v5369_v42  ;;  %539 = vmatpush1.bf16.msra.mxu0 %v4788_v41  ;;  %v5691_v41 = vld [vmem:[%s8490_s4 + $0x118] sm:$0xff] }
  0x28   :  { %809 = vmatpush1.msra.mxu1 %v5375_v43  ;;  %540 = vmatprep.subr.bf16.mxu0 %v4794_v44  ;;  %v5698_v44 = vld [vmem:[%s8490_s4 + $0x288] sm:$0xff] }
  0x29   :  { %810 = vmatprep.subr.mxu1 %v5384_v45  ;;  %8690 = vst [vmem:[#allocation3_spill] sm:$0xff] %v5698_v44 }
  0x2a   :  { %811 = vmatpush1.msra.mxu1 %v5392_v46  ;;  %433 = vmatmul.mubr.bf16.gmra.mxu0 %v5397_v47 }
  0x2b   :  { %506 = vmatmul.mubr.bf16.gmra.mxu1 %v5397_v47  ;;  %812 = vmatprep.subr.mxu1 %v5406_v49 }
  0x2c   :  { %541 = vmatpush1.bf16.msra.mxu0 %v4792_v48  ;;  %813 = vmatpush1.msra.mxu1 %v5416_v51  ;;  %v5705_v48 = vld [vmem:[%s8490_s4 + $0x278] sm:$0xff] }
  0x2d   :  { %542 = vmatprep.subr.bf16.mxu0 %v4797_v50  ;;  %814 = vmatprep.subr.mxu1 %v5423_v52  ;;  %8691 = vst [vmem:[#allocation4_spill] sm:$0xff] %v5705_v48  ;;  %v5710_v50 = vld [vmem:[%s8490_s4 + $0x100] sm:$0xff] }
  0x2e   :  { %442 = vmatprep.mubr.bf16.mxu0 %v8500_v1  ;;  %815 = vmatpush1.msra.mxu1 %v5428_v53 }
  0x2f   :  { %515 = vmatprep.mubr.bf16.mxu1 %v8500_v1  ;;  %816 = vmatprep.subr.mxu1 %v5438_v55 }
  0x30   :  { %543 = vmatpush1.bf16.msra.mxu0 %v4795_v54  ;;  %817 = vmatpush1.msra.mxu1 %v5447_v57  ;;  %v5724_v54 = vld [vmem:[%s8490_s4 + $0x260] sm:$0xff] }
  0x31   :  { %544 = vmatprep.subr.bf16.mxu0 %v4801_v56  ;;  %818 = vmatprep.subr.mxu1 %v5454_v58  ;;  %8693 = vst [vmem:[#allocation6_spill] sm:$0xff] %v5724_v54  ;;  %v5729_v56 = vld [vmem:[%s8490_s4 + $0xe8] sm:$0xff] }
  0x32   :  { %819 = vmatpush1.msra.mxu1 %v5466_v60  ;;  %443 = vmatmul.mubr.bf16.gmra.mxu0 %v5460_v59 }
  0x33   :  { %516 = vmatmul.mubr.bf16.gmra.mxu1 %v5460_v59  ;;  %820 = vmatprep.subr.mxu1 %v5475_v62 }
  0x34   :  { %545 = vmatpush1.bf16.msra.mxu0 %v4799_v61  ;;  %821 = vmatpush1.msra.mxu1 %v5481_v63  ;;  %v5736_v61 = vld [vmem:[%s8490_s4 + $0x258] sm:$0xff] }
  0x35   :  { %822 = vmatprep.subr.mxu1 %v5491_v2  ;;  %546 = vmatprep.subr.bf16.mxu0 %v4804_v0  ;;  %8694 = vst [vmem:[#allocation7_spill] sm:$0xff] %v5736_v61  ;;  %v5743_v0 = vld [vmem:[%s8490_s4 + $0x248] sm:$0xff] }
  0x36   :  { %823 = vmatpush1.msra.mxu1 %v5498_v3  ;;  %452 = vmatprep.mubr.bf16.mxu0 %v8500_v1  ;;  %8695 = vst [vmem:[#allocation8_spill] sm:$0xff] %v5743_v0 }
  0x37   :  { %824 = vmatprep.subr.mxu1 %v5507_v5  ;;  %525 = vmatprep.mubr.bf16.mxu1 %v8500_v1 }
  0x38   :  { %547 = vmatpush1.bf16.msra.mxu0 %v4802_v4  ;;  %825 = vmatpush1.msra.mxu1 %v5513_v6  ;;  %v5750_v4 = vld [vmem:[%s8490_s4 + $0xd0] sm:$0xff] }
  0x39   :  { %826 = vmatprep.subr.mxu1 %v5522_v8  ;;  %548 = vmatprep.subr.bf16.mxu0 %v4808_v7  ;;  %v5755_v7 = vld [vmem:[%s8490_s4 + $0x240] sm:$0xff] }
  0x3a   :  { %827 = vmatpush1.msra.mxu1 %v5535_v10  ;;  %453 = vmatmul.mubr.bf16.gmra.mxu0 %v5528_v9  ;;  %8696 = vst [vmem:[#allocation9_spill] sm:$0xff] %v5755_v7 }
  0x3b   :  { %526 = vmatmul.mubr.bf16.gmra.mxu1 %v5528_v9  ;;  %828 = vmatprep.subr.mxu1 %v5544_v12 }
  0x3c   :  { %549 = vmatpush1.bf16.msra.mxu0 %v4806_v11  ;;  %829 = vmatpush1.msra.mxu1 %v5550_v13  ;;  %v5764_v11 = vld [vmem:[%s8490_s4 + $0x230] sm:$0xff] }
  0x3d   :  { %830 = vmatprep.subr.mxu1 %v5560_v15  ;;  %550 = vmatprep.subr.bf16.mxu0 %v4811_v14  ;;  %8697 = vst [vmem:[#allocation10_spill] sm:$0xff] %v5764_v11  ;;  %v5769_v14 = vld [vmem:[%s8490_s4 + $0xb8] sm:$0xff] }
  0x3e   :  { %831 = vmatpush1.msra.mxu1 %v5567_v16  ;;  %568 = vmatprep.mubr.bf16.mxu0 %v8500_v1 }
  0x3f   :  { %832 = vmatprep.subr.mxu1 %v5576_v18  ;;  %868 = vmatprep.mubr.f32.mxu1 %v8511_v22 }
  0x40   :  { %551 = vmatpush1.bf16.msra.mxu0 %v4809_v17  ;;  %833 = vmatpush1.msra.mxu1 %v5582_v19  ;;  %v5776_v17 = vld [vmem:[%s8490_s4 + $0x228] sm:$0xff] }
  0x41   :  { %834 = vmatprep.subr.mxu1 %v5588_v20  ;;  %4138 = vmatprep.subr.mxu0 %v8511_v22  ;;  %8698 = vst [vmem:[#allocation11_spill] sm:$0xff] %v5776_v17 }
  0x42   :  { %835 = vmatpush1.msra.mxu1 %v5595_v21 }
  0x43   :  { %569 = vmatmul.mubr.bf16.vlgmr.msra.gmra.mxu0 %v5336_v35  ;;  %869 = vmatmul.mubr.f32.vlgmr.msra.gmra.mxu1 %v5602_v23  ;;  %v5672_v35 = vld [vmem:[%s8490_s4 + $0x130] sm:$0xff] }
  0x44   :  { %945 = vmatprep.subr.mxu1 %v5609_v24  ;;  %4139 = vmatpush3.msra.mxu0 %v5614_v25 }
  0x45   :  { %946 = vmatpush1.msra.mxu1 %v5620_v26  ;;  %4140 = vmatprep.subr.mxu0 %v8511_v22 }
  0x46   :  { %947 = vmatprep.subr.mxu1 %v5627_v27  ;;  %4141 = vmatpush3.msra.mxu0 %v5632_v28 }
  0x47   :  { %948 = vmatpush1.msra.mxu1 %v5639_v29  ;;  %4142 = vmatprep.subr.mxu0 %v8511_v22 }
  0x48   :  { %949 = vmatprep.subr.mxu1 %v5646_v30  ;;  %4143 = vmatpush3.msra.mxu0 %v5651_v31 }
  0x49   :  { %950 = vmatpush1.msra.mxu1 %v5658_v32  ;;  %4144 = vmatprep.subr.mxu0 %v8511_v22 }
  0x4a   :  { %951 = vmatprep.subr.mxu1 %v5665_v33  ;;  %578 = vmatprep.mubr.bf16.mxu0 %v8500_v1 }
  0x4b   :  { %4145 = vmatpush3.msra.mxu0 %v5672_v35  ;;  %952 = vmatpush1.msra.mxu1 %v5677_v36 }
  0x4c   :  { %579 = vmatmul.mubr.bf16.gmra.mxu0 %v5397_v47  ;;  %4146 = vmatprep.subr.mxu0 %v8511_v22  ;;  %v5717_v47 = vld [vmem:[%s8490_s4 + $0x270] sm:$0xff] }
  0x4d   :  { %953 = vmatprep.subr.mxu1 %v5686_v38  ;;  %4147 = vmatpush3.msra.mxu0 %v5691_v41  ;;  %8692 = vst [vmem:[#allocation5_spill] sm:$0xff] %v5717_v47 }
  0x4e   :  { %954 = vmatpush1.msra.mxu1 %v5698_v44  ;;  %4148 = vmatprep.subr.mxu0 %v8511_v22  ;;  %v5918_v44 = vld [vmem:[%s8491_s1 + $0x8] sm:$0xff] }
  0x4f   :  { %955 = vmatprep.subr.mxu1 %v5705_v48  ;;  %4149 = vmatpush3.msra.mxu0 %v5710_v50  ;;  %v5899_v48 = vld [vmem:[%s8490_s4 + $0x188] sm:$0xff] }
  0x50   :  { %956 = vmatpush1.msra.mxu1 %v5717_v47  ;;  %4150 = vmatprep.subr.mxu0 %v8511_v22  ;;  %v5847_v47 = vld [vmem:[%s8490_s4 + $0x58] sm:$0xff]  ;;  %8719 = vst [vmem:[#allocation30_spill] sm:$0xff] %v5899_v48 }
  0x51   :  { %957 = vmatprep.subr.mxu1 %v5724_v54  ;;  %4151 = vmatpush3.msra.mxu0 %v5729_v56  ;;  %v8708_v54 = vmov 0   ;;  %8710 = vst [vmem:[#allocation22_spill] sm:$0xff] %v5847_v47 }
  0x52   :  { %958 = vmatpush1.msra.mxu1 %v5736_v61  ;;  %4152 = vmatprep.subr.mxu0 %v8511_v22  ;;  %v5821_v61 = vld [vmem:[%s8490_s4 + $0x1e8] sm:$0xff] }
  0x53   :  { %959 = vmatprep.subr.mxu1 %v5743_v0  ;;  %588 = vmatprep.mubr.bf16.mxu0 %v8500_v1  ;;  %v5783_v1 = vld [vmem:[%s8490_s4 + $0x218] sm:$0xff]  ;;  %v5788_v0 = vld [vmem:[%s8490_s4 + $0xa0] sm:$0xff]  ;;  %8705 = vst [vmem:[#allocation18_spill] sm:$0xff] %v5821_v61 }
  0x54   :  { %4153 = vmatpush3.msra.mxu0 %v5750_v4  ;;  %960 = vmatpush1.msra.mxu1 %v5755_v7  ;;  %8699 = vst [vmem:[#allocation12_spill] sm:$0xff] %v5783_v1  ;;  %8700 = vst [vmem:[#allocation13_spill] sm:$0xff] %v5788_v0  ;;  %v5802_v7 = vld [vmem:[%s8490_s4 + $0x200] sm:$0xff] }
  0x55   :  { %589 = vmatmul.mubr.bf16.gmra.mxu0 %v5460_v59  ;;  %4154 = vmatprep.subr.mxu0 %v8511_v22  ;;  %v5795_v59 = vld [vmem:[%s8490_s4 + $0x210] sm:$0xff]  ;;  %8702 = vst [vmem:[#allocation15_spill] sm:$0xff] %v5802_v7 }
  0x56   :  { %961 = vmatprep.subr.mxu1 %v5764_v11  ;;  %4155 = vmatpush3.msra.mxu0 %v5769_v14  ;;  %8701 = vst [vmem:[#allocation14_spill] sm:$0xff] %v5795_v59  ;;  %v5807_v11 = vld [vmem:[%s8490_s4 + $0x88] sm:$0xff] }
  0x57   :  { %962 = vmatpush1.msra.mxu1 %v5776_v17  ;;  %4156 = vmatprep.subr.mxu0 %v8511_v22  ;;  %8703 = vst [vmem:[#allocation16_spill] sm:$0xff] %v5807_v11  ;;  %v5814_v17 = vld [vmem:[%s8490_s4 + $0x1f8] sm:$0xff] }
  0x58   :  { %963 = vmatprep.subr.mxu1 %v5783_v1  ;;  %4157 = vmatpush3.msra.mxu0 %v5788_v0  ;;  %8704 = vst [vmem:[#allocation17_spill] sm:$0xff] %v5814_v17  ;;  %v5828_v1 = vld [vmem:[%s8490_s4 + $0x70] sm:$0xff] }
  0x59   :  { %964 = vmatpush1.msra.mxu1 %v5795_v59  ;;  %4158 = vmatprep.subr.mxu0 %v8511_v22  ;;  %8706 = vst [vmem:[#allocation19_spill] sm:$0xff] %v5828_v1  ;;  %v5833_v59 = vld [vmem:[%s8490_s4 + $0x1e0] sm:$0xff] }
  0x5a   :  { %965 = vmatprep.subr.mxu1 %v5802_v7  ;;  %4159 = vmatpush3.msra.mxu0 %v5807_v11  ;;  %8707 = vst [vmem:[#allocation20_spill] sm:$0xff] %v5833_v59  ;;  %v5842_v7 = vld [vmem:[%s8490_s4 + $0x1d0] sm:$0xff] }
  0x5b   :  { %966 = vmatpush1.msra.mxu1 %v5814_v17  ;;  %4160 = vmatprep.subr.mxu0 %v8511_v22  ;;  %8709 = vst [vmem:[#allocation21_spill] sm:$0xff] %v5842_v7  ;;  %v5854_v22 = vld [vmem:[%s8490_s4 + $0x1c8] sm:$0xff]  ;;  %v5866_v17 = vld [vmem:[%s8490_s4 + $0x40] sm:$0xff] }
  0x5c   :  { %967 = vmatprep.subr.mxu1 %v5821_v61  ;;  %598 = vmatprep.mubr.bf16.mxu0 %v8708_v54  ;;  %8711 = vst [vmem:[#allocation23_spill] sm:$0xff] %v5854_v22  ;;  %v8712_v54 = vmov 0.0   ;;  %v5861_v61 = vld [vmem:[%s8490_s4 + $0x1b8] sm:$0xff]  ;;  %8714 = vst [vmem:[#allocation25_spill] sm:$0xff] %v5866_v17 }
  0x5d   :  { %4161 = vmatpush3.msra.mxu0 %v5828_v1  ;;  %968 = vmatpush1.msra.mxu1 %v5833_v59  ;;  %8713 = vst [vmem:[#allocation24_spill] sm:$0xff] %v5861_v61  ;;  %v5880_v59 = vld [vmem:[%s8490_s4 + $0x1a0] sm:$0xff] }
  0x5e   :  { %599 = vmatmul.mubr.bf16.gmra.mxu0 %v5528_v9  ;;  %4162 = vmatprep.subr.mxu0 %v8712_v54  ;;  %v5873_v9 = vld [vmem:[%s8490_s4 + $0x1b0] sm:$0xff]  ;;  %8716 = vst [vmem:[#allocation27_spill] sm:$0xff] %v5880_v59 }
  0x5f   :  { %969 = vmatprep.subr.mxu1 %v5842_v7  ;;  %4163 = vmatpush3.msra.mxu0 %v5847_v47  ;;  %8715 = vst [vmem:[#allocation26_spill] sm:$0xff] %v5873_v9  ;;  %v5885_v7 = vld [vmem:[%s8490_s4 + $0x28] sm:$0xff] }
  0x60   :  { %970 = vmatpush1.msra.mxu1 %v5854_v22  ;;  %4164 = vmatprep.subr.mxu0 %v8712_v54  ;;  %8717 = vst [vmem:[#allocation28_spill] sm:$0xff] %v5885_v7  ;;  %v5892_v22 = vld [vmem:[%s8490_s4 + $0x198] sm:$0xff] }
  0x61   :  { %971 = vmatprep.subr.mxu1 %v5861_v61  ;;  %4165 = vmatpush3.msra.mxu0 %v5866_v17  ;;  %8718 = vst [vmem:[#allocation29_spill] sm:$0xff] %v5892_v22  ;;  %v5904_v61 = vld [vmem:[%s8490_s4 + $0x10] sm:$0xff] }
  0x62   :  { %972 = vmatpush1.msra.mxu1 %v5873_v9  ;;  %4166 = vmatprep.subr.mxu0 %v8712_v54  ;;  %8720 = vst [vmem:[#allocation31_spill] sm:$0xff] %v5904_v61  ;;  %v5911_v9 = vld [vmem:[%s8490_s4 + $0x180] sm:$0xff] }
  0x63   :  { %973 = vmatprep.subr.mxu1 %v5880_v59  ;;  %4167 = vmatpush3.msra.mxu0 %v5885_v7  ;;  %8721 = vst [vmem:[#allocation32_spill] sm:$0xff] %v5911_v9  ;;  %v5927_v59 = vld [vmem:[%s8490_s4 + $0x2f8] sm:$0xff] }
  0x64   :  { %974 = vmatpush1.msra.mxu1 %v5892_v22  ;;  %4168 = vmatprep.subr.mxu0 %v8712_v54  ;;  %v5955_v22 = vld [vmem:[%s8490_s4 + $0x2b0] sm:$0xff] }
  0x65   :  { %975 = vmatprep.subr.mxu1 %v5899_v48  ;;  %4169 = vmatpush3.msra.mxu0 %v5904_v61  ;;  %v5946_v48 = vld [vmem:[%s8490_s4 + $0x2c8] sm:$0xff] }
  0x66   :  { %976 = vmatpush1.msra.mxu1 %v5911_v9  ;;  %1009 = vmatprep.mubr.f32.mxu1 %v8712_v54  ;;  %v5937_v9 = vld [vmem:[%s8490_s4 + $0x2e0] sm:$0xff] }
  0x67   :  { %4170 = vmatprep.mubr.msk.f32.mxu0 %vm5166_vm0, %v8712_v54  ;;  %1010 = vmatmul.mubr.f32.vlgmr.msra.gmra.mxu1 %v5918_v44 }
  0x68   :  { %4173 = vmatprep.subr.mxu0 %v8712_v54  ;;  %4171 = vmatmul.mubr.f32.vlgmr.msra.gmra.mxu0 %v5602_v23 }
  0x69   :  { %4174 = vmatpush3.msra.mxu0 %v5927_v59  ;;  %4205 = vmatprep.mubr.msk.f32.mxu0 %vm5166_vm0, %v8712_v54 }
  0x6a   :  { %4175 = vmatprep.subr.mxu0 %v8712_v54  ;;  %1140 = vmatprep.subr.mxu1 %v5331_v34  ;;  %v5964_v34 = vld [vmem:[%s8490_s4 + $0x298] sm:$0xff] }
  0x6b   :  { %4176 = vmatpush3.msra.mxu0 %v5937_v9  ;;  %1141 = vmatpush1.msra.mxu1 %v5345_v37  ;;  %v5973_v37 = vld [vmem:[%s8490_s4 + $0x280] sm:$0xff] }
  0x6c   :  { %4177 = vmatprep.subr.mxu0 %v8712_v54  ;;  %1142 = vmatprep.subr.mxu1 %v5353_v39  ;;  %v5982_v39 = vld [vmem:[%s8490_s4 + $0x268] sm:$0xff] }
  0x6d   :  { %4178 = vmatpush3.msra.mxu0 %v5946_v48  ;;  %1143 = vmatpush1.msra.mxu1 %v5360_v40  ;;  %v5991_v40 = vld [vmem:[%s8490_s4 + $0x250] sm:$0xff] }
  0x6e   :  { %4179 = vmatprep.subr.mxu0 %v8712_v54  ;;  %1144 = vmatprep.subr.mxu1 %v5369_v42  ;;  %v6000_v42 = vld [vmem:[%s8490_s4 + $0x238] sm:$0xff] }
  0x6f   :  { %4180 = vmatpush3.msra.mxu0 %v5955_v22  ;;  %1145 = vmatpush1.msra.mxu1 %v5375_v43  ;;  %v6009_v43 = vld [vmem:[%s8490_s4 + $0x220] sm:$0xff] }
  0x70   :  { %4181 = vmatprep.subr.mxu0 %v8712_v54  ;;  %1146 = vmatprep.subr.mxu1 %v5384_v45  ;;  %v6018_v45 = vld [vmem:[%s8490_s4 + $0x208] sm:$0xff] }
  0x71   :  { %4182 = vmatpush3.msra.mxu0 %v5964_v34  ;;  %1147 = vmatpush1.msra.mxu1 %v5392_v46  ;;  %v6027_v46 = vld [vmem:[%s8490_s4 + $0x1f0] sm:$0xff] }
  0x72   :  { %4183 = vmatprep.subr.mxu0 %v8712_v54  ;;  %1148 = vmatprep.subr.mxu1 %v5406_v49  ;;  %v6036_v49 = vld [vmem:[%s8490_s4 + $0x1d8] sm:$0xff] }
  0x73   :  { %4184 = vmatpush3.msra.mxu0 %v5973_v37  ;;  %1149 = vmatpush1.msra.mxu1 %v5416_v51  ;;  %v6045_v51 = vld [vmem:[%s8490_s4 + $0x1c0] sm:$0xff] }
  0x74   :  { %4185 = vmatprep.subr.mxu0 %v8712_v54  ;;  %1150 = vmatprep.subr.mxu1 %v5423_v52  ;;  %v6054_v52 = vld [vmem:[%s8490_s4 + $0x1a8] sm:$0xff] }
  0x75   :  { %4186 = vmatpush3.msra.mxu0 %v5982_v39  ;;  %1151 = vmatpush1.msra.mxu1 %v5428_v53  ;;  %v6063_v53 = vld [vmem:[%s8490_s4 + $0x190] sm:$0xff] }
  0x76   :  { %4187 = vmatprep.subr.mxu0 %v8712_v54  ;;  %1152 = vmatprep.subr.mxu1 %v5438_v55  ;;  %v96_v55 = vlaneseq }
  0x77   :  { %4188 = vmatpush3.msra.mxu0 %v5991_v40  ;;  %1153 = vmatpush1.msra.mxu1 %v5447_v57 }
  0x78   :  { %4189 = vmatprep.subr.mxu0 %v8712_v54  ;;  %1154 = vmatprep.subr.mxu1 %v5454_v58  ;;  %v6112_v57 = vshrl.u32 %v96_v55, 7 }
  0x79   :  { %4190 = vmatpush3.msra.mxu0 %v6000_v42  ;;  %1155 = vmatpush1.msra.mxu1 %v5466_v60  ;;  %v6118_v60 = vld [vmem:[%s8492_s3] sm:$0x3f] }
  0x7a   :  { %4191 = vmatprep.subr.mxu0 %v8712_v54  ;;  %1156 = vmatprep.subr.mxu1 %v5475_v62  ;;  %v110_v58 = vsub.s32 3, %v6112_v57  ;;  %v6121_v62 = vsub.s32 0, %v6112_v57 }
  0x7b   :  { %4192 = vmatpush3.msra.mxu0 %v6009_v43  ;;  %1157 = vmatpush1.msra.mxu1 %v5481_v63  ;;  %v6124_v63 = vsub.s32 2, %v6112_v57 }
  0x7c   :  { %4193 = vmatprep.subr.mxu0 %v8712_v54  ;;  %1158 = vmatprep.subr.mxu1 %v5491_v2  ;;  %v6127_v2 = vrot.slane %v6118_v60, %v110_v58 }
  0x7d   :  { %4194 = vmatpush3.msra.mxu0 %v6018_v45  ;;  %1159 = vmatpush1.msra.mxu1 %v5498_v3 }
  0x7e   :  { %4195 = vmatprep.subr.mxu0 %v8712_v54  ;;  %1160 = vmatprep.subr.mxu1 %v5507_v5 }
  0x7f   :  { %4196 = vmatpush3.msra.mxu0 %v6027_v46  ;;  %1161 = vmatpush1.msra.mxu1 %v5513_v6  ;;  %v6135_v6 = vrot.slane %v6118_v60, %v6121_v62 }
  0x80   :  { %4197 = vmatprep.subr.mxu0 %v8712_v54  ;;  %1162 = vmatprep.subr.mxu1 %v5522_v8  ;;  %v6138_v8 = vsub.s32 1, %v6112_v57 }
  0x81   :  { %4198 = vmatpush3.msra.mxu0 %v6036_v49  ;;  %1163 = vmatpush1.msra.mxu1 %v5535_v10 }
  0x82   :  { %4199 = vmatprep.subr.mxu0 %v8712_v54  ;;  %1164 = vmatprep.subr.mxu1 %v5544_v12 }
  0x83   :  { %4200 = vmatpush3.msra.mxu0 %v6045_v51  ;;  %1165 = vmatpush1.msra.mxu1 %v5550_v13  ;;  %v6144_v13 = vrot.slane %v6118_v60, %v6124_v63 }
  0x84   :  { %4201 = vmatprep.subr.mxu0 %v8712_v54  ;;  %1166 = vmatprep.subr.mxu1 %v5560_v15 }
  0x85   :  { %4202 = vmatpush3.msra.mxu0 %v6054_v52  ;;  %1167 = vmatpush1.msra.mxu1 %v5567_v16 }
  0x86   :  { %4203 = vmatprep.subr.mxu0 %v8712_v54  ;;  %1168 = vmatprep.subr.mxu1 %v5576_v18 }
  0x87   :  { %4204 = vmatpush3.msra.mxu0 %v6063_v53  ;;  %1169 = vmatpush1.msra.mxu1 %v5582_v19  ;;  %v6151_v19 = vrot.slane %v6118_v60, %v6138_v8 }
  0x88   :  { %4206 = vmatmul.mubr.f32.vlgmr.msra.gmra.mxu0 %v5918_v44  ;;  %4208 = vmatprep.subr.mxu0 %v8712_v54 }
  0x89   :  { %4209 = vmatpush3.msra.mxu0 %v5614_v25  ;;  %1170 = vmatprep.subr.mxu1 %v5588_v20 }
  0x8a   :  { %4210 = vmatprep.subr.mxu0 %v8712_v54  ;;  %1171 = vmatpush1.msra.mxu1 %v5595_v21 }
  0x8b   :  { %4211 = vmatpush3.msra.mxu0 %v5632_v28  ;;  %1204 = vmatprep.mubr.f32.mxu1 %v8712_v54 }
  0x8c   :  { %4212 = vmatprep.subr.mxu0 %v8712_v54  ;;  %4240 = vmatprep.mubr.msk.f32.mxu0 %vm5166_vm0, %v8712_v54 }
  0x8d   :  { %4213 = vmatpush3.msra.mxu0 %v5651_v31  ;;  %1281 = vmatprep.subr.mxu1 %v5609_v24 }
  0x8e   :  { %4214 = vmatprep.subr.mxu0 %v8712_v54 }
  0x8f   :  { %4215 = vmatpush3.msra.mxu0 %v5672_v35 }
  0x90   :  { %4216 = vmatprep.subr.mxu0 %v8712_v54 }
  0x91   :  { %4217 = vmatpush3.msra.mxu0 %v5691_v41 }
  0x92   :  { %4218 = vmatprep.subr.mxu0 %v8712_v54 }
  0x93   :  { %4219 = vmatpush3.msra.mxu0 %v5710_v50 }
  0x94   :  { %4220 = vmatprep.subr.mxu0 %v8712_v54 }
  0x95   :  { %4221 = vmatpush3.msra.mxu0 %v5729_v56 }
  0x96   :  { %4222 = vmatprep.subr.mxu0 %v8712_v54 }
  0x97   :  { %4223 = vmatpush3.msra.mxu0 %v5750_v4 }
  0x98   :  { %4224 = vmatprep.subr.mxu0 %v8712_v54 }
  0x99   :  { %4225 = vmatpush3.msra.mxu0 %v5769_v14 }
  0x9a   :  { %4226 = vmatprep.subr.mxu0 %v8712_v54 }
  0x9b   :  { %4227 = vmatpush3.msra.mxu0 %v5788_v0 }
  0x9c   :  { %4228 = vmatprep.subr.mxu0 %v8712_v54 }
  0x9d   :  { %4229 = vmatpush3.msra.mxu0 %v5807_v11 }
  0x9e   :  { %4230 = vmatprep.subr.mxu0 %v8712_v54 }
  0x9f   :  { %4231 = vmatpush3.msra.mxu0 %v5828_v1 }
  0xa0   :  { %4232 = vmatprep.subr.mxu0 %v8712_v54 }
  0xa1   :  { %4233 = vmatpush3.msra.mxu0 %v5847_v47 }
  0xa2   :  { %4234 = vmatprep.subr.mxu0 %v8712_v54 }
  0xa3   :  { %4235 = vmatpush3.msra.mxu0 %v5866_v17 }
  0xa4   :  { %4236 = vmatprep.subr.mxu0 %v8712_v54 }
  0xa5   :  { %4237 = vmatpush3.msra.mxu0 %v5885_v7 }
  0xa6   :  { %4238 = vmatprep.subr.mxu0 %v8712_v54 }
  0xa7   :  { %4239 = vmatpush3.msra.mxu0 %v5904_v61 }
  0xa8   :  { %4243 = vmatprep.subr.mxu0 %v8712_v54 }
  0xe2   :  { %v6129_v3 = vpop.f32.mrf.mxu0 }
  0xe3   :  { %v6131_v5 = vpop.f32.mrf.mxu1 }
  0xe4   :  { %v6140_v10 = vpop.f32.mrf.mxu0 }
  0xe5   :  { %v499_v12 = vpop.f32.mrf.mxu1 }
  0xe6   :  { %v6147_v15 = vadd.f32 %v499_v12, %v6127_v2  ;;  %v428_v16 = vpop.f32.mrf.mxu0 }
  0xe7   :  { %v501_v18 = vpop.f32.mrf.mxu1  ;;  %v6154_v20 = vadd.f32 %v428_v16, %v6135_v6 }
  0xe8   :  { %8722 = vst [vmem:[#allocation33_spill] sm:$0xff] %v6147_v15  ;;  %v6157_v21 = vadd.f32 %v501_v18, %v6144_v13  ;;  %v430_v24 = vpop.f32.mrf.mxu0 }
  0xe9   :  { %8723 = vst [vmem:[#allocation34_spill] sm:$0xff] %v6154_v20  ;;  %v503_v55 = vpop.f32.mrf.mxu1  ;;  %v6160_v58 = vadd.f32 %v430_v24, %v6151_v19 }
  0xea   :  { %8724 = vst [vmem:[#allocation35_spill] sm:$0xff] %v6157_v21  ;;  %v6163_v12 = vadd.f32 %v503_v55, %v6127_v2  ;;  %v434_v15 = vpop.f32.mrf.mxu0 }
  0xeb   :  { %8725 = vst [vmem:[#allocation36_spill] sm:$0xff] %v6160_v58  ;;  %v507_v61 = vpop.f32.mrf.mxu1  ;;  %v6166_v7 = vadd.f32 %v434_v15, %v6135_v6 }
  0xec   :  { %8726 = vst [vmem:[#allocation37_spill] sm:$0xff] %v6163_v12  ;;  %v6169_v17 = vadd.f32 %v507_v61, %v6144_v13  ;;  %v436_v16 = vpop.f32.mrf.mxu0 }
  0xed   :  { %8727 = vst [vmem:[#allocation38_spill] sm:$0xff] %v6166_v7  ;;  %v509_v20 = vpop.f32.mrf.mxu1  ;;  %v6172_v18 = vadd.f32 %v436_v16, %v6151_v19 }
  0xee   :  { %8728 = vst [vmem:[#allocation39_spill] sm:$0xff] %v6169_v17  ;;  %v6175_v21 = vadd.f32 %v509_v20, %v6127_v2  ;;  %v438_v24 = vpop.f32.mrf.mxu0 }
  0xef   :  { %8729 = vst [vmem:[#allocation40_spill] sm:$0xff] %v6172_v18  ;;  %v511_v58 = vpop.f32.mrf.mxu1  ;;  %v6178_v55 = vadd.f32 %v438_v24, %v6135_v6 }
  0xf0   :  { %8730 = vst [vmem:[#allocation41_spill] sm:$0xff] %v6175_v21  ;;  %v6181_v12 = vadd.f32 %v511_v58, %v6144_v13  ;;  %v440_v15 = vpop.f32.mrf.mxu0 }
  0xf1   :  { %8731 = vst [vmem:[#allocation42_spill] sm:$0xff] %v6178_v55  ;;  %v513_v7 = vpop.f32.mrf.mxu1  ;;  %v6184_v61 = vadd.f32 %v440_v15, %v6151_v19 }
  0xf2   :  { %8732 = vst [vmem:[#allocation43_spill] sm:$0xff] %v6181_v12  ;;  %v6187_v17 = vadd.f32 %v513_v7, %v6127_v2  ;;  %v444_v16 = vpop.f32.mrf.mxu0 }
  0xf3   :  { %8733 = vst [vmem:[#allocation44_spill] sm:$0xff] %v6184_v61  ;;  %v6190_v20 = vadd.f32 %v444_v16, %v6135_v6  ;;  %v517_v21 = vpop.f32.mrf.mxu1 }
  0xf4   :  { %8734 = vst [vmem:[#allocation45_spill] sm:$0xff] %v6187_v17  ;;  %v6193_v18 = vadd.f32 %v517_v21, %v6144_v13  ;;  %v446_v24 = vpop.f32.mrf.mxu0 }
  0xf5   :  { %8735 = vst [vmem:[#allocation46_spill] sm:$0xff] %v6190_v20  ;;  %v6196_v58 = vadd.f32 %v446_v24, %v6151_v19  ;;  %v519_v12 = vpop.f32.mrf.mxu1 }
  0xf6   :  { %8736 = vst [vmem:[#allocation47_spill] sm:$0xff] %v6193_v18  ;;  %v6199_v55 = vadd.f32 %v519_v12, %v6127_v2  ;;  %v448_v15 = vpop.f32.mrf.mxu0 }
  0xf7   :  { %8737 = vst [vmem:[#allocation48_spill] sm:$0xff] %v6196_v58  ;;  %v6202_v7 = vadd.f32 %v448_v15, %v6135_v6  ;;  %v521_v17 = vpop.f32.mrf.mxu1 }
  0xf8   :  { %8738 = vst [vmem:[#allocation49_spill] sm:$0xff] %v6199_v55  ;;  %v6205_v16 = vadd.f32 %v521_v17, %v6144_v13  ;;  %v450_v20 = vpop.f32.mrf.mxu0  ;;  %v114_v17 = vsub.s32 4, %v6112_v57 }
  0xf9   :  { %8739 = vst [vmem:[#allocation50_spill] sm:$0xff] %v6202_v7  ;;  %v6208_v21 = vadd.f32 %v450_v20, %v6151_v19  ;;  %v523_v18 = vpop.f32.mrf.mxu1 }
  0xfa   :  { %8740 = vst [vmem:[#allocation51_spill] sm:$0xff] %v6205_v16  ;;  %v6211_v24 = vadd.f32 %v523_v18, %v6127_v2  ;;  %v454_v58 = vpop.f32.mrf.mxu0  ;;  %v754_v18 = vld [vmem:[%s8493_s5] sm:$0x7] }
  0xfb   :  { %8741 = vst [vmem:[#allocation52_spill] sm:$0xff] %v6208_v21  ;;  %v6214_v12 = vadd.f32 %v454_v58, %v6135_v6  ;;  %v527_v55 = vpop.f32.mrf.mxu1 }
  0xfc   :  { %8742 = vst [vmem:[#allocation53_spill] sm:$0xff] %v6211_v24  ;;  %v6217_v15 = vadd.f32 %v527_v55, %v6144_v13  ;;  %v456_v7 = vpop.f32.mrf.mxu0  ;;  %v6240_v24 = vrot.slane %v754_v18, %v6121_v62 }
  0xfd   :  { %8743 = vst [vmem:[#allocation54_spill] sm:$0xff] %v6214_v12  ;;  %v6221_v16 = vadd.f32 %v456_v7, %v6151_v19  ;;  %v529_v20 = vpop.f32.mrf.mxu1  ;;  %v118_v12 = vsub.s32 5, %v6112_v57 }
  0xfe   :  { %8744 = vst [vmem:[#allocation55_spill] sm:$0xff] %v6217_v15  ;;  %v6227_v21 = vadd.f32 %v529_v20, %v6127_v2  ;;  %v458_v58 = vpop.f32.mrf.mxu0  ;;  %8749 = vst [vmem:[#allocation60_spill] sm:$0xff] %v6240_v24 }
  0xff   :  { %8745 = vst [vmem:[#allocation56_spill] sm:$0xff] %v6221_v16  ;;  %v6231_v55 = vadd.f32 %v458_v58, %v6135_v6  ;;  %v531_v15 = vpop.f32.mrf.mxu1  ;;  %v6237_v16 = vrot.slane %v6118_v60, %v114_v17  ;;  %v6246_v57 = vrot.slane %v6118_v60, %v118_v12 }
 0x100   :  { %8746 = vst [vmem:[#allocation57_spill] sm:$0xff] %v6227_v21  ;;  %v6234_v61 = vadd.f32 %v531_v15, %v6144_v13  ;;  %v460_v7 = vpop.f32.mrf.mxu0  ;;  %v425_v15 = vadd.f32 %v6129_v3, %v6135_v6 }
 0x101   :  { %8747 = vst [vmem:[#allocation58_spill] sm:$0xff] %v6231_v55  ;;  %v6243_v20 = vadd.f32 %v460_v7, %v6151_v19  ;;  %v533_v21 = vpop.f32.mrf.mxu1  ;;  %v6258_v7 = vrot.slane %v754_v18, %v6138_v8 }
 0x102   :  { %8748 = vst [vmem:[#allocation59_spill] sm:$0xff] %v6234_v61 }
 0x103   :  { %8750 = vst [vmem:[#allocation61_spill] sm:$0xff] %v6243_v20  ;;  %v570_v58 = vpop.f32.mrf.mxu0  ;;  %v870_v55 = vpop.f32.mrf.mxu1  ;;  %8753 = vst [vmem:[#allocation64_spill] sm:$0xff] %v6258_v7 }
 0x104   :  { %v6251_v61 = vadd.f32 %v570_v58, %v6237_v16  ;;  %v871_v17 = vadd.f32 %v870_v55, %v6240_v24 }
 0x105   :  { %v572_v47 = vpop.f32.mrf.mxu0  ;;  %v872_v20 = vpop.f32.mrf.mxu1 }
 0x106   :  { %8751 = vst [vmem:[#allocation62_spill] sm:$0xff] %v6251_v61  ;;  %v1086_v1 = vadd.f32 %v871_v17, %v425_v15  ;;  %v6255_v11 = vadd.f32 %v572_v47, %v6246_v57  ;;  %v873_v55 = vadd.f32 %v872_v20, %v6258_v7  ;;  %v427_v47 = vadd.f32 %v6140_v10, %v6151_v19 }
 0x107   :  { %v574_v60 = vpop.f32.mrf.mxu0 }
 0x108   :  { %8752 = vst [vmem:[#allocation63_spill] sm:$0xff] %v6255_v11  ;;  %v3779_v12 = vmul.f32 -1.442695, %v1086_v1  ;;  %v6261_v0 = vadd.f32 %v574_v60, %v6237_v16  ;;  %v1093_v1 = vadd.f32 %v873_v55, %v427_v47 }
 0x109   :  { %v576_v3 = vpop.f32.mrf.mxu0 }
 0x10a   :  { %8754 = vst [vmem:[#allocation65_spill] sm:$0xff] %v6261_v0  ;;  %4812 = vpow2.f32 %v3779_v12  ;;  %v6264_v6 = vadd.f32 %v576_v3, %v6246_v57  ;;  %v3780_v61 = vmul.f32 -1.442695, %v1093_v1 }
 0x10c   :  { %8755 = vst [vmem:[#allocation66_spill] sm:$0xff] %v6264_v6  ;;  %v580_v58 = vpop.f32.mrf.mxu0  ;;  %4814 = vpow2.f32 %v3780_v61 }
 0x10d   :  { %v6270_v15 = vadd.f32 %v580_v58, %v6237_v16 }
 0x10e   :  { %v582_v17 = vpop.f32.mrf.mxu0 }
 0x10f   :  { %8756 = vst [vmem:[#allocation67_spill] sm:$0xff] %v6270_v15  ;;  %v6273_v11 = vadd.f32 %v582_v17, %v6246_v57 }
 0x110   :  { %v584_v60 = vpop.f32.mrf.mxu0 }
 0x111   :  { %8757 = vst [vmem:[#allocation68_spill] sm:$0xff] %v6273_v11  ;;  %v6276_v12 = vadd.f32 %v584_v60, %v6237_v16 }
 0x112   :  { %v586_v3 = vpop.f32.mrf.mxu0 }
 0x113   :  { %8758 = vst [vmem:[#allocation69_spill] sm:$0xff] %v6276_v12  ;;  %v6279_v20 = vadd.f32 %v586_v3, %v6246_v57 }
 0x115   :  { %8759 = vst [vmem:[#allocation70_spill] sm:$0xff] %v6279_v20  ;;  %v590_v6 = vpop.f32.mrf.mxu0 }
 0x116   :  { %v6282_v10 = vadd.f32 %v590_v6, %v6237_v16 }
 0x117   :  { %v4813_v19 = vpop.eup %4812  ;;  %v592_v58 = vpop.f32.mrf.mxu0 }
 0x118   :  { %8760 = vst [vmem:[#allocation71_spill] sm:$0xff] %v6282_v10  ;;  %v1090_v55 = vadd.f32 1.0, %v4813_v19  ;;  %v6285_v47 = vadd.f32 %v592_v58, %v6246_v57  ;;  %v3777_v19 = vld [vmem:[%s8493_s5 + $0x3] sm:$0x7] }
 0x119   :  { %v594_v17 = vpop.f32.mrf.mxu0 }
 0x11a   :  { %8761 = vst [vmem:[#allocation72_spill] sm:$0xff] %v6285_v47  ;;  %v6288_v60 = vadd.f32 %v594_v17, %v6237_v16  ;;  %4816 = vrcp.f32 %v1090_v55  ;;  %v4815_v17 = vpop.eup %4814  ;;  %v6305_v55 = vrot.slane %v3777_v19, %v6121_v62 }
 0x11b   :  { %v596_v1 = vpop.f32.mrf.mxu0 }
 0x11c   :  { %8762 = vst [vmem:[#allocation73_spill] sm:$0xff] %v6288_v60  ;;  %v6291_v3 = vadd.f32 %v596_v1, %v6246_v57  ;;  %8766 = vst [vmem:[#allocation77_spill] sm:$0xff] %v6305_v55  ;;  %v6308_v1 = vrot.slane %v754_v18, %v6124_v63  ;;  %v498_v18 = vadd.f32 %v6131_v5, %v6144_v13 }
 0x11e   :  { %8763 = vst [vmem:[#allocation74_spill] sm:$0xff] %v6291_v3  ;;  %v600_v0 = vpop.f32.mrf.mxu0  ;;  %8767 = vst [vmem:[#allocation78_spill] sm:$0xff] %v6308_v1  ;;  %v6313_v3 = vrot.slane %v3777_v19, %v6138_v8 }
 0x11f   :  { %v6294_v6 = vadd.f32 %v600_v0, %v6237_v16  ;;  %v1097_v0 = vadd.f32 1.0, %v4815_v17 }
 0x120   :  { %v602_v11 = vpop.f32.mrf.mxu0 }
 0x121   :  { %8764 = vst [vmem:[#allocation75_spill] sm:$0xff] %v6294_v6  ;;  %v6297_v61 = vadd.f32 %v602_v11, %v6246_v57  ;;  %v534_v11 = vadd.f32 %v533_v21, %v6127_v2  ;;  %4818 = vrcp.f32 %v1097_v0  ;;  %v8781_v0 = vld [vmem:[#allocation18_spill] sm:$0xff] }
 0x122   :  { %v604_v58 = vpop.f32.mrf.mxu0 }
 0x123   :  { %8765 = vst [vmem:[#allocation76_spill] sm:$0xff] %v6297_v61  ;;  %v605_v21 = vadd.f32 %v604_v58, %v6237_v16  ;;  %v6334_v16 = vrot.slane %v3777_v19, %v6124_v63  ;;  %v8769_v63 = vld [vmem:[#allocation4_spill] sm:$0xff]  ;;  %v8778_v58 = vld [vmem:[#allocation14_spill] sm:$0xff] }
 0x124   :  { %v6302_v15 = vpop.f32.mrf.mxu0  ;;  %v8777_v19 = vld [vmem:[#allocation12_spill] sm:$0xff] }
 0x127   :  { %v1011_v20 = vpop.f32.mrf.mxu1  ;;  %v4817_v12 = vpop.eup %4816 }
 0x128   :  { %v1012_v47 = vadd.f32 %v1011_v20, %v6305_v55  ;;  %v941_v10 = vpop.f32.mrf.mxu0 }
 0x129   :  { %v942_v60 = vadd.f32 %v941_v10, %v6308_v1  ;;  %v1013_v61 = vpop.f32.mrf.mxu1 }
 0x12a   :  { %v1107_v6 = vadd.f32 %v1012_v47, %v534_v11  ;;  %v4172_v62 = vpop.f32.mrf.mxu0  ;;  %v1014_v24 = vadd.f32 %v1013_v61, %v6313_v3  ;;  %v8776_v61 = vld [vmem:[#allocation11_spill] sm:$0xff] }
 0x12b   :  { %v1100_v17 = vmul.f32 %v4817_v12, %v942_v60  ;;  %v8772_v60 = vld [vmem:[#allocation7_spill] sm:$0xff] }
 0x12c   :  { %v3781_v7 = vmul.f32 -1.442695, %v1107_v6  ;;  %v1114_v8 = vadd.f32 %v1014_v24, %v605_v21  ;;  %v8773_v6 = vld [vmem:[#allocation8_spill] sm:$0xff]  ;;  %v8784_v21 = vld [vmem:[#allocation23_spill] sm:$0xff] }
 0x12d   :  { %v1101_v2 = vadd.f32 %v1100_v17, %v498_v18  ;;  %v8782_v18 = vld [vmem:[#allocation20_spill] sm:$0xff] }
 0x12e   :  { %4820 = vpow2.f32 %v3781_v7  ;;  %v3782_v20 = vmul.f32 -1.442695, %v1114_v8  ;;  %v4819_v55 = vpop.eup %4818  ;;  %v8770_v7 = vld [vmem:[#allocation5_spill] sm:$0xff]  ;;  %v8785_v8 = vld [vmem:[#allocation24_spill] sm:$0xff] }
 0x12f   :  { %4822 = vtanh.f32 %v1101_v2  ;;  %v1103_v47 = vsub.f32 1.0, %v4819_v55  ;;  %v1105_v5 = vmul.f32 %v4819_v55, %v5602_v23  ;;  %v8779_v55 = vld [vmem:[#allocation15_spill] sm:$0xff]  ;;  %v8783_v2 = vld [vmem:[#allocation21_spill] sm:$0xff] }
 0x130   :  { %4824 = vpow2.f32 %v3782_v20  ;;  %v8786_v20 = vld [vmem:[#allocation26_spill] sm:$0xff] }
 0x13b   :  { %v4821_v10 = vpop.eup %4820 }
 0x13c   :  { %v4823_v11 = vpop.eup %4822  ;;  %v1111_v62 = vadd.f32 1.0, %v4821_v10 }
 0x13d   :  { %v1104_v1 = vmul.f32 %v4823_v11, %v1103_v47  ;;  %v4825_v23 = vpop.eup %4824  ;;  %v8787_v11 = vld [vmem:[#allocation27_spill] sm:$0xff] }
 0x13e   :  { %4826 = vrcp.f32 %v1111_v62  ;;  %v8788_v62 = vld [vmem:[#allocation29_spill] sm:$0xff] }
 0x13f   :  { %v6321_v13 = vadd.f32 %v1105_v5, %v1104_v1  ;;  %v8780_v1 = vld [vmem:[#allocation17_spill] sm:$0xff] }
 0x141   :  { %1205 = vmatmul.mubr.f32.vlgmr.msra.gmra.mxu1 %v6321_v13  ;;  %4241 = vmatmul.mubr.f32.vlgmr.msra.gmra.mxu0 %v6321_v13 }
 0x142   :  { %1282 = vmatpush1.msra.mxu1 %v5620_v26  ;;  %4244 = vmatpush3.msra.mxu0 %v5927_v59  ;;  %v1118_v26 = vadd.f32 1.0, %v4825_v23 }
 0x143   :  { %1283 = vmatprep.subr.mxu1 %v5627_v27  ;;  %4245 = vmatprep.subr.mxu0 %v8712_v54 }
 0x144   :  { %1284 = vmatpush1.msra.mxu1 %v5639_v29  ;;  %4246 = vmatpush3.msra.mxu0 %v5937_v9  ;;  %4828 = vrcp.f32 %v1118_v26  ;;  %v8789_v26 = vld [vmem:[#allocation30_spill] sm:$0xff] }
 0x145   :  { %1285 = vmatprep.subr.mxu1 %v5646_v30  ;;  %4247 = vmatprep.subr.mxu0 %v8712_v54 }
 0x146   :  { %1286 = vmatpush1.msra.mxu1 %v5658_v32  ;;  %4248 = vmatpush3.msra.mxu0 %v5946_v48  ;;  %v8768_v32 = vld [vmem:[#allocation3_spill] sm:$0xff] }
 0x147   :  { %1287 = vmatprep.subr.mxu1 %v5665_v33  ;;  %4249 = vmatprep.subr.mxu0 %v8712_v54 }
 0x148   :  { %v1082_v27 = vpop.f32.mrf.mxu0  ;;  %1288 = vmatpush1.msra.mxu1 %v5677_v36  ;;  %4250 = vmatpush3.msra.mxu0 %v5955_v22  ;;  %v607_v36 = vadd.f32 %v6302_v15, %v6246_v57  ;;  %v8774_v57 = vld [vmem:[#allocation9_spill] sm:$0xff]  ;;  %v8775_v15 = vld [vmem:[#allocation10_spill] sm:$0xff] }
 0x149   :  { %v1083_v29 = vadd.f32 %v1082_v27, %v6334_v16  ;;  %1289 = vmatprep.subr.mxu1 %v5686_v38  ;;  %4251 = vmatprep.subr.mxu0 %v8712_v54  ;;  %v8771_v38 = vld [vmem:[#allocation6_spill] sm:$0xff]  ;;  %v8790_v27 = vld [vmem:[#allocation32_spill] sm:$0xff] }
 0x14a   :  { %v4207_v30 = vpop.f32.mrf.mxu0  ;;  %1290 = vmatpush1.msra.mxu1 %v8768_v32  ;;  %4252 = vmatpush3.msra.mxu0 %v5964_v34  ;;  %v6418_v32 = vld [vmem:[%s8490_s4 + $0x158] sm:$0xff] }
 0x14b   :  { %v4827_v33 = vpop.eup %4826  ;;  %1291 = vmatprep.subr.mxu1 %v8769_v63  ;;  %4253 = vmatprep.subr.mxu0 %v8712_v54  ;;  %v6411_v30 = vld [vmem:[%s8490_s4 + $0x168] sm:$0xff]  ;;  %v6439_v63 = vld [vmem:[%s8490_s4 + $0x138] sm:$0xff] }
 0x14c   :  { %v1121_v24 = vmul.f32 %v4827_v33, %v1083_v29  ;;  %1292 = vmatpush1.msra.mxu1 %v8770_v7  ;;  %4254 = vmatpush3.msra.mxu0 %v5973_v37  ;;  %v6425_v33 = vld [vmem:[%s8490_s4 + $0x150] sm:$0xff]  ;;  %8792 = vst [vmem:[#allocation4_spill] sm:$0xff] %v6439_v63 }
 0x14d   :  { %1293 = vmatprep.subr.mxu1 %v8771_v38  ;;  %4255 = vmatprep.subr.mxu0 %v8712_v54  ;;  %v6481_v7 = vld [vmem:[%s8490_s4 + $0xf0] sm:$0xff]  ;;  %v6495_v38 = vld [vmem:[%s8490_s4 + $0xd8] sm:$0xff] }
 0x14e   :  { %v1122_v12 = vadd.f32 %v1121_v24, %v607_v36  ;;  %1294 = vmatpush1.msra.mxu1 %v8772_v60  ;;  %4256 = vmatpush3.msra.mxu0 %v5982_v39  ;;  %v6453_v36 = vld [vmem:[%s8490_s4 + $0x120] sm:$0xff]  ;;  %v6467_v24 = vld [vmem:[%s8490_s4 + $0x108] sm:$0xff]  ;;  %8798 = vst [vmem:[#allocation10_spill] sm:$0xff] %v6481_v7  ;;  %8800 = vst [vmem:[#allocation12_spill] sm:$0xff] %v6495_v38 }
 0x14f   :  { %1295 = vmatprep.subr.mxu1 %v8773_v6  ;;  %4257 = vmatprep.subr.mxu0 %v8712_v54  ;;  %8794 = vst [vmem:[#allocation6_spill] sm:$0xff] %v6453_v36  ;;  %8796 = vst [vmem:[#allocation8_spill] sm:$0xff] %v6467_v24  ;;  %v6523_v60 = vld [vmem:[%s8490_s4 + $0xa8] sm:$0xff]  ;;  %v6537_v6 = vld [vmem:[%s8490_s4 + $0x90] sm:$0xff] }
 0x150   :  { %4830 = vtanh.f32 %v1122_v12  ;;  %1296 = vmatpush1.msra.mxu1 %v8774_v57  ;;  %4258 = vmatpush3.msra.mxu0 %v5991_v40  ;;  %v6509_v12 = vld [vmem:[%s8490_s4 + $0xc0] sm:$0xff]  ;;  %8804 = vst [vmem:[#allocation18_spill] sm:$0xff] %v6523_v60  ;;  %8806 = vst [vmem:[#allocation21_spill] sm:$0xff] %v6537_v6  ;;  %v8807_v57 = vld [vmem:[#allocation13_spill] sm:$0xff] }
 0x151   :  { %1297 = vmatprep.subr.mxu1 %v8775_v15  ;;  %4259 = vmatprep.subr.mxu0 %v8712_v54  ;;  %v4829_v17 = vpop.eup %4828  ;;  %8802 = vst [vmem:[#allocation15_spill] sm:$0xff] %v6509_v12  ;;  %v6551_v15 = vld [vmem:[%s8490_s4 + $0x78] sm:$0xff] }
 0x152   :  { %1298 = vmatpush1.msra.mxu1 %v8776_v61  ;;  %4260 = vmatpush3.msra.mxu0 %v6000_v42  ;;  %v1124_v10 = vsub.f32 1.0, %v4829_v17  ;;  %v1126_v23 = vmul.f32 %v4829_v17, %v5918_v44  ;;  %v6404_v44 = vld [vmem:[%s8490_s4 + $0x170] sm:$0xff]  ;;  %8809 = vst [vmem:[#allocation24_spill] sm:$0xff] %v6551_v15  ;;  %v8810_v61 = vld [vmem:[#allocation16_spill] sm:$0xff]  ;;  %v6586_v17 = vld [vmem:[%s8490_s4 + $0x38] sm:$0xff] }
 0x153   :  { %1299 = vmatprep.subr.mxu1 %v8777_v19  ;;  %4261 = vmatprep.subr.mxu0 %v8712_v54  ;;  %v6558_v19 = vld [vmem:[%s8490_s4 + $0x68] sm:$0xff]  ;;  %8817 = vst [vmem:[#allocation32_spill] sm:$0xff] %v6586_v17 }
 0x154   :  { %1300 = vmatpush1.msra.mxu1 %v8778_v58  ;;  %4262 = vmatpush3.msra.mxu0 %v6009_v43  ;;  %8811 = vst [vmem:[#allocation26_spill] sm:$0xff] %v6558_v19  ;;  %v6565_v58 = vld [vmem:[%s8490_s4 + $0x60] sm:$0xff] }
 0x155   :  { %1301 = vmatprep.subr.mxu1 %v8779_v55  ;;  %4263 = vmatprep.subr.mxu0 %v8712_v54  ;;  %8812 = vst [vmem:[#allocation27_spill] sm:$0xff] %v6565_v58  ;;  %v8813_v55 = vld [vmem:[#allocation19_spill] sm:$0xff] }
 0x156   :  { %1302 = vmatpush1.msra.mxu1 %v8780_v1  ;;  %4264 = vmatpush3.msra.mxu0 %v6018_v45  ;;  %v6572_v1 = vld [vmem:[%s8490_s4 + $0x50] sm:$0xff] }
 0x157   :  { %1303 = vmatprep.subr.mxu1 %v8781_v0  ;;  %4265 = vmatprep.subr.mxu0 %v8712_v54  ;;  %8814 = vst [vmem:[#allocation29_spill] sm:$0xff] %v6572_v1  ;;  %v6579_v0 = vld [vmem:[%s8490_s4 + $0x48] sm:$0xff] }
 0x158   :  { %1304 = vmatpush1.msra.mxu1 %v8782_v18  ;;  %4266 = vmatpush3.msra.mxu0 %v6027_v46  ;;  %8815 = vst [vmem:[#allocation30_spill] sm:$0xff] %v6579_v0  ;;  %v8816_v18 = vld [vmem:[#allocation22_spill] sm:$0xff] }
 0x159   :  { %1305 = vmatprep.subr.mxu1 %v8783_v2  ;;  %4267 = vmatprep.subr.mxu0 %v8712_v54  ;;  %v6593_v2 = vld [vmem:[%s8490_s4 + $0x30] sm:$0xff] }
 0x15a   :  { %1306 = vmatpush1.msra.mxu1 %v8784_v21  ;;  %4268 = vmatpush3.msra.mxu0 %v6036_v49  ;;  %8818 = vst [vmem:[#allocation13_spill] sm:$0xff] %v6593_v2  ;;  %v8819_v21 = vld [vmem:[#allocation25_spill] sm:$0xff] }
 0x15b   :  { %1307 = vmatprep.subr.mxu1 %v8785_v8  ;;  %4269 = vmatprep.subr.mxu0 %v8712_v54  ;;  %v6600_v8 = vld [vmem:[%s8490_s4 + $0x20] sm:$0xff] }
 0x15c   :  { %1308 = vmatpush1.msra.mxu1 %v8786_v20  ;;  %4270 = vmatpush3.msra.mxu0 %v6045_v51  ;;  %8820 = vst [vmem:[#allocation16_spill] sm:$0xff] %v6600_v8  ;;  %v6607_v20 = vld [vmem:[%s8490_s4 + $0x18] sm:$0xff] }
 0x15d   :  { %v4831_v47 = vpop.eup %4830  ;;  %1309 = vmatprep.subr.mxu1 %v8787_v11  ;;  %4271 = vmatprep.subr.mxu0 %v8712_v54  ;;  %8821 = vst [vmem:[#allocation19_spill] sm:$0xff] %v6607_v20  ;;  %v6621_v11 = vld [vmem:[%s8490_s4] sm:$0xff] }
 0x15e   :  { %1310 = vmatpush1.msra.mxu1 %v8788_v62  ;;  %4272 = vmatpush3.msra.mxu0 %v6054_v52  ;;  %v1125_v5 = vmul.f32 %v4831_v47, %v1124_v10  ;;  %v8822_v10 = vld [vmem:[#allocation28_spill] sm:$0xff]  ;;  %8824 = vst [vmem:[#allocation25_spill] sm:$0xff] %v6621_v11  ;;  %v8825_v62 = vld [vmem:[#allocation31_spill] sm:$0xff] }
 0x15f   :  { %1311 = vmatprep.subr.mxu1 %v8789_v26  ;;  %4273 = vmatprep.subr.mxu0 %v8712_v54  ;;  %v6614_v47 = vld [vmem:[%s8490_s4 + $0x8] sm:$0xff] }
 0x160   :  { %1312 = vmatpush1.msra.mxu1 %v8790_v27  ;;  %1345 = vmatprep.mubr.f32.mxu1 %v8712_v54  ;;  %v6394_v29 = vadd.f32 %v1126_v23, %v1125_v5  ;;  %8823 = vst [vmem:[#allocation22_spill] sm:$0xff] %v6614_v47  ;;  %v6631_v5 = vld [vmem:[%s8490_s4 + $0x2f0] sm:$0xff]  ;;  %v8827_v27 = vld [vmem:[#allocation60_spill] sm:$0xff] }
 0x161   :  { %4274 = vmatpush3.msra.mxu0 %v6063_v53  ;;  %4275 = vmatprep.mubr.msk.f32.mxu0 %vm5166_vm0, %v8712_v54  ;;  %8826 = vst [vmem:[#allocation28_spill] sm:$0xff] %v6631_v5 }
 0x162   :  { %1346 = vmatmul.mubr.f32.vlgmr.msra.gmra.mxu1 %v6394_v29  ;;  %4276 = vmatmul.mubr.f32.vlgmr.msra.gmra.mxu0 %v6394_v29 }
 0x163   :  { %1476 = vmatprep.subr.mxu1 %v6404_v44  ;;  %4278 = vmatprep.subr.mxu0 %v8712_v54 }
 0x164   :  { %1477 = vmatpush1.msra.mxu1 %v6411_v30  ;;  %4279 = vmatpush3.msra.mxu0 %v5614_v25  ;;  %v6432_v25 = vld [vmem:[%s8490_s4 + $0x140] sm:$0xff] }
 0x165   :  { %1478 = vmatprep.subr.mxu1 %v6418_v32  ;;  %4280 = vmatprep.subr.mxu0 %v8712_v54  ;;  %8791 = vst [vmem:[#allocation3_spill] sm:$0xff] %v6432_v25 }
 0x166   :  { %1479 = vmatpush1.msra.mxu1 %v6425_v33  ;;  %4281 = vmatpush3.msra.mxu0 %v5632_v28  ;;  %v6446_v28 = vld [vmem:[%s8490_s4 + $0x128] sm:$0xff] }
 0x167   :  { %1480 = vmatprep.subr.mxu1 %v6432_v25  ;;  %4282 = vmatprep.subr.mxu0 %v8712_v54  ;;  %8793 = vst [vmem:[#allocation5_spill] sm:$0xff] %v6446_v28 }
 0x168   :  { %1481 = vmatpush1.msra.mxu1 %v6439_v63  ;;  %4283 = vmatpush3.msra.mxu0 %v5651_v31  ;;  %v6460_v31 = vld [vmem:[%s8490_s4 + $0x110] sm:$0xff] }
 0x169   :  { %1482 = vmatprep.subr.mxu1 %v6446_v28  ;;  %4284 = vmatprep.subr.mxu0 %v8712_v54  ;;  %8795 = vst [vmem:[#allocation7_spill] sm:$0xff] %v6460_v31 }
 0x16a   :  { %1483 = vmatpush1.msra.mxu1 %v6453_v36  ;;  %4285 = vmatpush3.msra.mxu0 %v5672_v35  ;;  %v6474_v35 = vld [vmem:[%s8490_s4 + $0xf8] sm:$0xff] }
 0x16b   :  { %1484 = vmatprep.subr.mxu1 %v6460_v31  ;;  %4286 = vmatprep.subr.mxu0 %v8712_v54  ;;  %8797 = vst [vmem:[#allocation9_spill] sm:$0xff] %v6474_v35 }
 0x16c   :  { %1485 = vmatpush1.msra.mxu1 %v6467_v24  ;;  %4287 = vmatpush3.msra.mxu0 %v5691_v41  ;;  %v6488_v41 = vld [vmem:[%s8490_s4 + $0xe0] sm:$0xff] }
 0x16d   :  { %1486 = vmatprep.subr.mxu1 %v6474_v35  ;;  %4288 = vmatprep.subr.mxu0 %v8712_v54  ;;  %8799 = vst [vmem:[#allocation11_spill] sm:$0xff] %v6488_v41 }
 0x16e   :  { %1487 = vmatpush1.msra.mxu1 %v6481_v7  ;;  %4289 = vmatpush3.msra.mxu0 %v5710_v50  ;;  %v6502_v50 = vld [vmem:[%s8490_s4 + $0xc8] sm:$0xff] }
 0x16f   :  { %1488 = vmatprep.subr.mxu1 %v6488_v41  ;;  %4290 = vmatprep.subr.mxu0 %v8712_v54  ;;  %8801 = vst [vmem:[#allocation14_spill] sm:$0xff] %v6502_v50 }
 0x170   :  { %1489 = vmatpush1.msra.mxu1 %v6495_v38  ;;  %4291 = vmatpush3.msra.mxu0 %v5729_v56  ;;  %v6516_v56 = vld [vmem:[%s8490_s4 + $0xb0] sm:$0xff] }
 0x171   :  { %1490 = vmatprep.subr.mxu1 %v6502_v50  ;;  %4292 = vmatprep.subr.mxu0 %v8712_v54  ;;  %8803 = vst [vmem:[#allocation17_spill] sm:$0xff] %v6516_v56 }
 0x172   :  { %1491 = vmatpush1.msra.mxu1 %v6509_v12  ;;  %4293 = vmatpush3.msra.mxu0 %v5750_v4  ;;  %v6530_v4 = vld [vmem:[%s8490_s4 + $0x98] sm:$0xff] }
 0x173   :  { %1492 = vmatprep.subr.mxu1 %v6516_v56  ;;  %4294 = vmatprep.subr.mxu0 %v8712_v54  ;;  %8805 = vst [vmem:[#allocation20_spill] sm:$0xff] %v6530_v4 }
 0x174   :  { %1493 = vmatpush1.msra.mxu1 %v6523_v60  ;;  %4295 = vmatpush3.msra.mxu0 %v5769_v14  ;;  %v6544_v14 = vld [vmem:[%s8490_s4 + $0x80] sm:$0xff] }
 0x175   :  { %1494 = vmatprep.subr.mxu1 %v6530_v4  ;;  %4296 = vmatprep.subr.mxu0 %v8712_v54  ;;  %8808 = vst [vmem:[#allocation23_spill] sm:$0xff] %v6544_v14 }
 0x176   :  { %1495 = vmatpush1.msra.mxu1 %v6537_v6  ;;  %4297 = vmatpush3.msra.mxu0 %v8807_v57 }
 0x177   :  { %1496 = vmatprep.subr.mxu1 %v6544_v14  ;;  %4298 = vmatprep.subr.mxu0 %v8712_v54 }
 0x178   :  { %1497 = vmatpush1.msra.mxu1 %v6551_v15  ;;  %4299 = vmatpush3.msra.mxu0 %v8810_v61 }
 0x179   :  { %1498 = vmatprep.subr.mxu1 %v6558_v19  ;;  %4300 = vmatprep.subr.mxu0 %v8712_v54 }
 0x17a   :  { %1499 = vmatpush1.msra.mxu1 %v6565_v58  ;;  %4301 = vmatpush3.msra.mxu0 %v8813_v55 }
 0x17b   :  { %1500 = vmatprep.subr.mxu1 %v6572_v1  ;;  %4302 = vmatprep.subr.mxu0 %v8712_v54 }
 0x17c   :  { %1501 = vmatpush1.msra.mxu1 %v6579_v0  ;;  %4303 = vmatpush3.msra.mxu0 %v8816_v18  ;;  %v8828_v18 = vld [vmem:[#allocation34_spill] sm:$0xff] }
 0x17d   :  { %1502 = vmatprep.subr.mxu1 %v6586_v17  ;;  %4304 = vmatprep.subr.mxu0 %v8712_v54 }
 0x17e   :  { %1503 = vmatpush1.msra.mxu1 %v6593_v2  ;;  %4305 = vmatpush3.msra.mxu0 %v8819_v21 }
 0x17f   :  { %1504 = vmatprep.subr.mxu1 %v6600_v8  ;;  %4306 = vmatprep.subr.mxu0 %v8712_v54 }
 0x180   :  { %1505 = vmatpush1.msra.mxu1 %v6607_v20  ;;  %4307 = vmatpush3.msra.mxu0 %v8822_v10 }
 0x181   :  { %1506 = vmatprep.subr.mxu1 %v6614_v47  ;;  %4308 = vmatprep.subr.mxu0 %v8712_v54  ;;  %v8830_v47 = vld [vmem:[#allocation36_spill] sm:$0xff] }
 0x182   :  { %1507 = vmatpush1.msra.mxu1 %v6621_v11  ;;  %1540 = vmatprep.mubr.f32.mxu1 %v8712_v54 }
 0x183   :  { %4309 = vmatpush3.msra.mxu0 %v8825_v62  ;;  %4310 = vmatprep.mubr.msk.f32.mxu0 %vm5166_vm0, %v8712_v54  ;;  %v8829_v62 = vld [vmem:[#allocation64_spill] sm:$0xff] }
 0x184   :  { %1617 = vmatprep.subr.mxu1 %v6631_v5  ;;  %4313 = vmatprep.subr.mxu0 %v8712_v54 }
 0x201   :  { %v1206_v23 = vpop.f32.mrf.mxu1  ;;  %v1277_v26 = vpop.f32.mrf.mxu0 }
 0x202   :  { %v1207_v57 = vadd.f32 %v1206_v23, %v8827_v27  ;;  %v8831_v23 = vld [vmem:[#allocation77_spill] sm:$0xff] }
 0x203   :  { %v1208_v61 = vpop.f32.mrf.mxu1  ;;  %v4242_v55 = vpop.f32.mrf.mxu0 }
 0x204   :  { %v1422_v21 = vadd.f32 %v1207_v57, %v8828_v18  ;;  %v1209_v11 = vadd.f32 %v1208_v61, %v8829_v62  ;;  %v8832_v55 = vld [vmem:[#allocation78_spill] sm:$0xff]  ;;  %v8833_v61 = vld [vmem:[#allocation57_spill] sm:$0xff] }
 0x205   :  { %v1278_v19 = vadd.f32 %v1277_v26, %v8832_v55 }
 0x206   :  { %v3783_v10 = vmul.f32 -1.442695, %v1422_v21  ;;  %v1429_v20 = vadd.f32 %v1209_v11, %v8830_v47 }
 0x208   :  { %4832 = vpow2.f32 %v3783_v10  ;;  %v3784_v8 = vmul.f32 -1.442695, %v1429_v20 }
 0x20a   :  { %4834 = vpow2.f32 %v3784_v8 }
 0x215   :  { %v4833_v2 = vpop.eup %4832 }
 0x216   :  { %v1426_v5 = vadd.f32 1.0, %v4833_v2  ;;  %v8834_v2 = vld [vmem:[#allocation35_spill] sm:$0xff] }
 0x217   :  { %v4835_v17 = vpop.eup %4834 }
 0x218   :  { %4836 = vrcp.f32 %v1426_v5  ;;  %v1433_v0 = vadd.f32 1.0, %v4835_v17  ;;  %v8835_v17 = vld [vmem:[#allocation75_spill] sm:$0xff] }
 0x21a   :  { %4838 = vrcp.f32 %v1433_v0 }
 0x222   :  { %v1347_v1 = vpop.f32.mrf.mxu1  ;;  %v1418_v58 = vpop.f32.mrf.mxu0 }
 0x223   :  { %v1348_v27 = vadd.f32 %v1347_v1, %v8831_v23 }
 0x224   :  { %v1349_v57 = vpop.f32.mrf.mxu1  ;;  %v4277_v18 = vpop.f32.mrf.mxu0 }
 0x225   :  { %v4837_v21 = vpop.eup %4836  ;;  %v1443_v10 = vadd.f32 %v1348_v27, %v8833_v61  ;;  %v1350_v8 = vadd.f32 %v1349_v57, %v6313_v3  ;;  %v6653_v27 = vld [vmem:[%s8490_s4 + $0x2e8] sm:$0xff]  ;;  %v6695_v57 = vld [vmem:[%s8490_s4 + $0x2a0] sm:$0xff] }
 0x226   :  { %v1436_v62 = vmul.f32 %v4837_v21, %v1278_v19  ;;  %v1419_v21 = vadd.f32 %v1418_v58, %v6334_v16  ;;  %v6710_v61 = vld [vmem:[%s8490_s4 + $0x288] sm:$0xff] }
 0x227   :  { %v3785_v20 = vmul.f32 -1.442695, %v1443_v10  ;;  %v1450_v11 = vadd.f32 %v1350_v8, %v8835_v17  ;;  %v4839_v1 = vpop.eup %4838  ;;  %v6717_v10 = vld [vmem:[%s8490_s4 + $0x278] sm:$0xff]  ;;  %v8836_v8 = vld [vmem:[#allocation76_spill] sm:$0xff]  ;;  %v6753_v17 = vld [vmem:[%s8490_s4 + $0x240] sm:$0xff] }
 0x228   :  { %v1437_v47 = vadd.f32 %v1436_v62, %v8834_v2  ;;  %v1439_v55 = vsub.f32 1.0, %v4839_v1  ;;  %v1441_v19 = vmul.f32 %v4839_v1, %v6321_v13  ;;  %v6660_v13 = vld [vmem:[%s8490_s4 + $0x2d8] sm:$0xff] }
 0x229   :  { %4840 = vpow2.f32 %v3785_v20  ;;  %v3786_v5 = vmul.f32 -1.442695, %v1450_v11  ;;  %v6724_v20 = vld [vmem:[%s8490_s4 + $0x270] sm:$0xff]  ;;  %v6767_v11 = vld [vmem:[%s8490_s4 + $0x228] sm:$0xff]  ;;  %v6795_v1 = vld [vmem:[%s8490_s4 + $0x1f8] sm:$0xff] }
 0x22a   :  { %4842 = vtanh.f32 %v1437_v47  ;;  %v6739_v47 = vld [vmem:[%s8490_s4 + $0x258] sm:$0xff] }
 0x22b   :  { %4844 = vpow2.f32 %v3786_v5  ;;  %v6781_v5 = vld [vmem:[%s8490_s4 + $0x210] sm:$0xff] }
 0x236   :  { %v4841_v26 = vpop.eup %4840 }
 0x237   :  { %v4843_v18 = vpop.eup %4842  ;;  %v1447_v23 = vadd.f32 1.0, %v4841_v26  ;;  %v6809_v26 = vld [vmem:[%s8490_s4 + $0x1e0] sm:$0xff] }
 0x238   :  { %v1440_v15 = vmul.f32 %v4843_v18, %v1439_v55  ;;  %v4845_v62 = vpop.eup %4844 }
 0x239   :  { %4846 = vrcp.f32 %v1447_v23  ;;  %v6681_v23 = vld [vmem:[%s8490_s4 + $0x2b8] sm:$0xff]  ;;  %v1454_v55 = vadd.f32 1.0, %v4845_v62  ;;  %v6837_v62 = vld [vmem:[%s8490_s4 + $0x1b0] sm:$0xff] }
 0x23a   :  { %v6646_v0 = vadd.f32 %v1441_v19, %v1440_v15  ;;  %v6667_v15 = vld [vmem:[%s8490_s4 + $0x2d0] sm:$0xff]  ;;  %v6823_v19 = vld [vmem:[%s8490_s4 + $0x1c8] sm:$0xff]  ;;  %8838 = vst [vmem:[#allocation34_spill] sm:$0xff] %v6837_v62 }
 0x23b   :  { %4848 = vrcp.f32 %v1454_v55 }
 0x23c   :  { %1541 = vmatmul.mubr.f32.vlgmr.msra.gmra.mxu1 %v6646_v0  ;;  %4311 = vmatmul.mubr.f32.vlgmr.msra.gmra.mxu0 %v6646_v0 }
 0x23d   :  { %1618 = vmatpush1.msra.mxu1 %v6653_v27  ;;  %4314 = vmatpush3.msra.mxu0 %v5927_v59  ;;  %v6674_v59 = vld [vmem:[%s8490_s4 + $0x2c0] sm:$0xff] }
 0x23e   :  { %1619 = vmatprep.subr.mxu1 %v6660_v13  ;;  %4315 = vmatprep.subr.mxu0 %v8712_v54 }
 0x23f   :  { %1620 = vmatpush1.msra.mxu1 %v6667_v15  ;;  %4316 = vmatpush3.msra.mxu0 %v5937_v9  ;;  %v6688_v9 = vld [vmem:[%s8490_s4 + $0x2a8] sm:$0xff] }
 0x240   :  { %1621 = vmatprep.subr.mxu1 %v6674_v59  ;;  %4317 = vmatprep.subr.mxu0 %v8712_v54 }
 0x241   :  { %1622 = vmatpush1.msra.mxu1 %v6681_v23  ;;  %4318 = vmatpush3.msra.mxu0 %v5946_v48  ;;  %v6702_v48 = vld [vmem:[%s8490_s4 + $0x290] sm:$0xff] }
 0x242   :  { %1623 = vmatprep.subr.mxu1 %v6688_v9  ;;  %4319 = vmatprep.subr.mxu0 %v8712_v54 }
 0x243   :  { %1624 = vmatpush1.msra.mxu1 %v6695_v57  ;;  %4320 = vmatpush3.msra.mxu0 %v5955_v22 }
 0x244   :  { %1625 = vmatprep.subr.mxu1 %v6702_v48  ;;  %4321 = vmatprep.subr.mxu0 %v8712_v54 }
 0x245   :  { %1626 = vmatpush1.msra.mxu1 %v6710_v61  ;;  %4322 = vmatpush3.msra.mxu0 %v5964_v34  ;;  %v6731_v34 = vld [vmem:[%s8490_s4 + $0x260] sm:$0xff] }
 0x246   :  { %v4847_v22 = vpop.eup %4846  ;;  %1627 = vmatprep.subr.mxu1 %v6717_v10  ;;  %4323 = vmatprep.subr.mxu0 %v8712_v54 }
 0x247   :  { %v1457_v58 = vmul.f32 %v4847_v22, %v1419_v21  ;;  %1628 = vmatpush1.msra.mxu1 %v6724_v20  ;;  %4324 = vmatpush3.msra.mxu0 %v5973_v37  ;;  %v6746_v37 = vld [vmem:[%s8490_s4 + $0x248] sm:$0xff]  ;;  %v6844_v21 = vld [vmem:[%s8490_s4 + $0x1a0] sm:$0xff]  ;;  %v6851_v22 = vld [vmem:[%s8490_s4 + $0x198] sm:$0xff] }
 0x248   :  { %1629 = vmatprep.subr.mxu1 %v6731_v34  ;;  %4325 = vmatprep.subr.mxu0 %v8712_v54  ;;  %v4849_v18 = vpop.eup %4848  ;;  %8839 = vst [vmem:[#allocation36_spill] sm:$0xff] %v6844_v21  ;;  %8840 = vst [vmem:[#allocation57_spill] sm:$0xff] %v6851_v22 }
 0x249   :  { %v1458_v2 = vadd.f32 %v1457_v58, %v8836_v8  ;;  %1630 = vmatpush1.msra.mxu1 %v6739_v47  ;;  %4326 = vmatpush3.msra.mxu0 %v5982_v39  ;;  %v6760_v39 = vld [vmem:[%s8490_s4 + $0x230] sm:$0xff]  ;;  %v1460_v55 = vsub.f32 1.0, %v4849_v18  ;;  %v1462_v58 = vmul.f32 %v4849_v18, %v6394_v29  ;;  %v6859_v8 = vld [vmem:[%s8490_s4 + $0x188] sm:$0xff]  ;;  %v6883_v29 = vld [vmem:[%s8490_s4 + $0x178] sm:$0xff] }
 0x24a   :  { %1631 = vmatprep.subr.mxu1 %v6746_v37  ;;  %4327 = vmatprep.subr.mxu0 %v8712_v54  ;;  %8841 = vst [vmem:[#allocation35_spill] sm:$0xff] %v6859_v8  ;;  %8843 = vst [vmem:[#allocation76_spill] sm:$0xff] %v6883_v29  ;;  %v6901_v18 = vld [vmem:[%s8490_s4 + $0x148] sm:$0xff] }
 0x24b   :  { %4850 = vtanh.f32 %v1458_v2  ;;  %1632 = vmatpush1.msra.mxu1 %v6753_v17  ;;  %4328 = vmatpush3.msra.mxu0 %v5991_v40  ;;  %v6774_v40 = vld [vmem:[%s8490_s4 + $0x218] sm:$0xff]  ;;  %v6866_v2 = vld [vmem:[%s8490_s4 + $0x180] sm:$0xff]  ;;  %8845 = vst [vmem:[#allocation80_spill] sm:$0xff] %v6901_v18 }
 0x24c   :  { %1633 = vmatprep.subr.mxu1 %v6760_v39  ;;  %4329 = vmatprep.subr.mxu0 %v8712_v54  ;;  %8842 = vst [vmem:[#allocation75_spill] sm:$0xff] %v6866_v2 }
 0x24d   :  { %1634 = vmatpush1.msra.mxu1 %v6767_v11  ;;  %4330 = vmatpush3.msra.mxu0 %v6000_v42  ;;  %v6788_v42 = vld [vmem:[%s8490_s4 + $0x200] sm:$0xff] }
 0x24e   :  { %1635 = vmatprep.subr.mxu1 %v6774_v40  ;;  %4331 = vmatprep.subr.mxu0 %v8712_v54 }
 0x24f   :  { %1636 = vmatpush1.msra.mxu1 %v6781_v5  ;;  %4332 = vmatpush3.msra.mxu0 %v6009_v43  ;;  %v6802_v43 = vld [vmem:[%s8490_s4 + $0x1e8] sm:$0xff] }
 0x250   :  { %1637 = vmatprep.subr.mxu1 %v6788_v42  ;;  %4333 = vmatprep.subr.mxu0 %v8712_v54 }
 0x251   :  { %1638 = vmatpush1.msra.mxu1 %v6795_v1  ;;  %4334 = vmatpush3.msra.mxu0 %v6018_v45  ;;  %v6816_v45 = vld [vmem:[%s8490_s4 + $0x1d0] sm:$0xff] }
 0x252   :  { %1639 = vmatprep.subr.mxu1 %v6802_v43  ;;  %4335 = vmatprep.subr.mxu0 %v8712_v54 }
 0x253   :  { %1640 = vmatpush1.msra.mxu1 %v6809_v26  ;;  %4336 = vmatpush3.msra.mxu0 %v6027_v46  ;;  %v6830_v46 = vld [vmem:[%s8490_s4 + $0x1b8] sm:$0xff] }
 0x254   :  { %1641 = vmatprep.subr.mxu1 %v6816_v45  ;;  %4337 = vmatprep.subr.mxu0 %v8712_v54  ;;  %8837 = vst [vmem:[#allocation31_spill] sm:$0xff] %v6830_v46 }
 0x255   :  { %1642 = vmatpush1.msra.mxu1 %v6823_v19  ;;  %4338 = vmatpush3.msra.mxu0 %v6036_v49 }
 0x256   :  { %1643 = vmatprep.subr.mxu1 %v6830_v46  ;;  %4339 = vmatprep.subr.mxu0 %v8712_v54 }
 0x257   :  { %1644 = vmatpush1.msra.mxu1 %v6837_v62  ;;  %4340 = vmatpush3.msra.mxu0 %v6045_v51 }
 0x258   :  { %v4851_v49 = vpop.eup %4850  ;;  %1645 = vmatprep.subr.mxu1 %v6844_v21  ;;  %4341 = vmatprep.subr.mxu0 %v8712_v54 }
 0x259   :  { %1646 = vmatpush1.msra.mxu1 %v6851_v22  ;;  %4342 = vmatpush3.msra.mxu0 %v6054_v52  ;;  %v1461_v51 = vmul.f32 %v4851_v49, %v1460_v55  ;;  %v6910_v55 = vld [vmem:[%s8490_s4 + $0x130] sm:$0xff]  ;;  %v6919_v49 = vld [vmem:[%s8490_s4 + $0x118] sm:$0xff] }
 0x25a   :  { %1647 = vmatprep.subr.mxu1 %v6859_v8  ;;  %4343 = vmatprep.subr.mxu0 %v8712_v54  ;;  %8846 = vst [vmem:[#allocation81_spill] sm:$0xff] %v6910_v55  ;;  %8847 = vst [vmem:[#allocation82_spill] sm:$0xff] %v6919_v49 }
 0x25b   :  { %1648 = vmatpush1.msra.mxu1 %v6866_v2  ;;  %1681 = vmatprep.mubr.f32.mxu1 %v8712_v54  ;;  %v6870_v52 = vadd.f32 %v1462_v58, %v1461_v51  ;;  %v6928_v51 = vld [vmem:[%s8490_s4 + $0x100] sm:$0xff]  ;;  %v6937_v58 = vld [vmem:[%s8490_s4 + $0xe8] sm:$0xff] }
 0x25c   :  { %4344 = vmatpush3.msra.mxu0 %v6063_v53  ;;  %4345 = vmatprep.mubr.msk.f32.mxu0 %vm5166_vm0, %v8712_v54  ;;  %v6892_v53 = vld [vmem:[%s8490_s4 + $0x160] sm:$0xff]  ;;  %8848 = vst [vmem:[#allocation83_spill] sm:$0xff] %v6928_v51  ;;  %8849 = vst [vmem:[#allocation84_spill] sm:$0xff] %v6937_v58 }
 0x25d   :  { %1682 = vmatmul.mubr.f32.vlgmr.msra.gmra.mxu1 %v6870_v52  ;;  %4346 = vmatmul.mubr.f32.vlgmr.msra.gmra.mxu0 %v6870_v52  ;;  %8844 = vst [vmem:[#allocation79_spill] sm:$0xff] %v6892_v53 }
 0x25e   :  { %1812 = vmatprep.subr.mxu1 %v6404_v44  ;;  %4348 = vmatprep.subr.mxu0 %v8712_v54 }
 0x25f   :  { %1813 = vmatpush1.msra.mxu1 %v6411_v30  ;;  %4349 = vmatpush3.msra.mxu0 %v6883_v29 }
 0x260   :  { %1814 = vmatprep.subr.mxu1 %v6418_v32  ;;  %4350 = vmatprep.subr.mxu0 %v8712_v54 }
 0x261   :  { %1815 = vmatpush1.msra.mxu1 %v6425_v33  ;;  %4351 = vmatpush3.msra.mxu0 %v6892_v53 }
 0x262   :  { %1816 = vmatprep.subr.mxu1 %v6432_v25  ;;  %4352 = vmatprep.subr.mxu0 %v8712_v54 }
 0x263   :  { %1817 = vmatpush1.msra.mxu1 %v6439_v63  ;;  %4353 = vmatpush3.msra.mxu0 %v6901_v18 }
 0x264   :  { %1818 = vmatprep.subr.mxu1 %v6446_v28  ;;  %4354 = vmatprep.subr.mxu0 %v8712_v54 }
 0x265   :  { %1819 = vmatpush1.msra.mxu1 %v6453_v36  ;;  %4355 = vmatpush3.msra.mxu0 %v6910_v55 }
 0x266   :  { %1820 = vmatprep.subr.mxu1 %v6460_v31  ;;  %4356 = vmatprep.subr.mxu0 %v8712_v54 }
 0x267   :  { %1821 = vmatpush1.msra.mxu1 %v6467_v24  ;;  %4357 = vmatpush3.msra.mxu0 %v6919_v49 }
 0x268   :  { %1822 = vmatprep.subr.mxu1 %v6474_v35  ;;  %4358 = vmatprep.subr.mxu0 %v8712_v54 }
 0x269   :  { %1823 = vmatpush1.msra.mxu1 %v6481_v7  ;;  %4359 = vmatpush3.msra.mxu0 %v6928_v51  ;;  %v8873_v7 = vld [vmem:[#allocation64_spill] sm:$0xff] }
 0x26a   :  { %1824 = vmatprep.subr.mxu1 %v6488_v41  ;;  %4360 = vmatprep.subr.mxu0 %v8712_v54  ;;  %v6946_v41 = vld [vmem:[%s8490_s4 + $0xd0] sm:$0xff] }
 0x26b   :  { %1825 = vmatpush1.msra.mxu1 %v6495_v38  ;;  %4361 = vmatpush3.msra.mxu0 %v6937_v58  ;;  %8850 = vst [vmem:[#allocation85_spill] sm:$0xff] %v6946_v41  ;;  %v8872_v58 = vld [vmem:[#allocation38_spill] sm:$0xff] }
 0x26c   :  { %1826 = vmatprep.subr.mxu1 %v6502_v50  ;;  %4362 = vmatprep.subr.mxu0 %v8712_v54  ;;  %v6955_v50 = vld [vmem:[%s8490_s4 + $0xb8] sm:$0xff] }
 0x26d   :  { %1827 = vmatpush1.msra.mxu1 %v6509_v12  ;;  %4363 = vmatpush3.msra.mxu0 %v6946_v41  ;;  %8851 = vst [vmem:[#allocation86_spill] sm:$0xff] %v6955_v50 }
 0x26e   :  { %1828 = vmatprep.subr.mxu1 %v6516_v56  ;;  %4364 = vmatprep.subr.mxu0 %v8712_v54  ;;  %v6964_v56 = vld [vmem:[%s8490_s4 + $0xa0] sm:$0xff] }
 0x26f   :  { %1829 = vmatpush1.msra.mxu1 %v6523_v60  ;;  %4365 = vmatpush3.msra.mxu0 %v6955_v50  ;;  %8852 = vst [vmem:[#allocation87_spill] sm:$0xff] %v6964_v56  ;;  %v8853_v60 = vld [vmem:[#allocation24_spill] sm:$0xff]  ;;  %v8856_v50 = vld [vmem:[#allocation27_spill] sm:$0xff] }
 0x270   :  { %1830 = vmatprep.subr.mxu1 %v6530_v4  ;;  %4366 = vmatprep.subr.mxu0 %v8712_v54  ;;  %v6973_v4 = vld [vmem:[%s8490_s4 + $0x88] sm:$0xff] }
 0x271   :  { %1831 = vmatpush1.msra.mxu1 %v6537_v6  ;;  %4367 = vmatpush3.msra.mxu0 %v6964_v56  ;;  %8854 = vst [vmem:[#allocation88_spill] sm:$0xff] %v6973_v4  ;;  %v8855_v6 = vld [vmem:[#allocation26_spill] sm:$0xff] }
 0x272   :  { %1832 = vmatprep.subr.mxu1 %v6544_v14  ;;  %4368 = vmatprep.subr.mxu0 %v8712_v54  ;;  %v6982_v14 = vld [vmem:[%s8490_s4 + $0x70] sm:$0xff]  ;;  %v8859_v56 = vld [vmem:[#allocation30_spill] sm:$0xff] }
 0x273   :  { %1833 = vmatpush1.msra.mxu1 %v8853_v60  ;;  %4369 = vmatpush3.msra.mxu0 %v6973_v4  ;;  %8857 = vst [vmem:[#allocation89_spill] sm:$0xff] %v6982_v14  ;;  %v8858_v60 = vld [vmem:[#allocation29_spill] sm:$0xff] }
 0x274   :  { %1834 = vmatprep.subr.mxu1 %v8855_v6  ;;  %4370 = vmatprep.subr.mxu0 %v8712_v54  ;;  %v6991_v6 = vld [vmem:[%s8490_s4 + $0x58] sm:$0xff]  ;;  %v8862_v4 = vld [vmem:[#allocation13_spill] sm:$0xff] }
 0x275   :  { %1835 = vmatpush1.msra.mxu1 %v8856_v50  ;;  %4371 = vmatpush3.msra.mxu0 %v6982_v14  ;;  %8860 = vst [vmem:[#allocation90_spill] sm:$0xff] %v6991_v6  ;;  %v8861_v50 = vld [vmem:[#allocation32_spill] sm:$0xff]  ;;  %v8865_v14 = vld [vmem:[#allocation19_spill] sm:$0xff] }
 0x276   :  { %1836 = vmatprep.subr.mxu1 %v8858_v60  ;;  %4372 = vmatprep.subr.mxu0 %v8712_v54  ;;  %v7000_v60 = vld [vmem:[%s8490_s4 + $0x40] sm:$0xff] }
 0x277   :  { %1837 = vmatpush1.msra.mxu1 %v8859_v56  ;;  %4373 = vmatpush3.msra.mxu0 %v6991_v6  ;;  %8863 = vst [vmem:[#allocation91_spill] sm:$0xff] %v7000_v60  ;;  %v8864_v56 = vld [vmem:[#allocation16_spill] sm:$0xff]  ;;  %v8868_v6 = vld [vmem:[#allocation25_spill] sm:$0xff] }
 0x278   :  { %1838 = vmatprep.subr.mxu1 %v8861_v50  ;;  %4374 = vmatprep.subr.mxu0 %v8712_v54  ;;  %v7009_v50 = vld [vmem:[%s8490_s4 + $0x28] sm:$0xff] }
 0x279   :  { %1839 = vmatpush1.msra.mxu1 %v8862_v4  ;;  %4375 = vmatpush3.msra.mxu0 %v7000_v60  ;;  %8866 = vst [vmem:[#allocation92_spill] sm:$0xff] %v7009_v50  ;;  %v8867_v4 = vld [vmem:[#allocation22_spill] sm:$0xff]  ;;  %v8871_v60 = vld [vmem:[#allocation60_spill] sm:$0xff] }
 0x27a   :  { %1840 = vmatprep.subr.mxu1 %v8864_v56  ;;  %4376 = vmatprep.subr.mxu0 %v8712_v54  ;;  %v7019_v56 = vld [vmem:[%s8490_s4 + $0x10] sm:$0xff] }
 0x27b   :  { %1841 = vmatpush1.msra.mxu1 %v8865_v14  ;;  %4377 = vmatpush3.msra.mxu0 %v7009_v50  ;;  %8869 = vst [vmem:[#allocation93_spill] sm:$0xff] %v7019_v56  ;;  %v8870_v14 = vld [vmem:[#allocation28_spill] sm:$0xff] }
 0x27c   :  { %1842 = vmatprep.subr.mxu1 %v8867_v4  ;;  %4378 = vmatprep.subr.mxu0 %v8712_v54 }
 0x27d   :  { %1843 = vmatpush1.msra.mxu1 %v8868_v6  ;;  %1876 = vmatprep.mubr.f32.mxu1 %v8712_v54 }
 0x27e   :  { %4379 = vmatpush3.msra.mxu0 %v7019_v56  ;;  %4380 = vmatprep.mubr.msk.f32.mxu0 %vm5166_vm0, %v8712_v54  ;;  %v8874_v56 = vld [vmem:[#allocation40_spill] sm:$0xff] }
 0x27f   :  { %1953 = vmatprep.subr.mxu1 %v8870_v14  ;;  %4383 = vmatprep.subr.mxu0 %v8712_v54 }
 0x2fc   :  { %v1542_v4 = vpop.f32.mrf.mxu1  ;;  %v1613_v50 = vpop.f32.mrf.mxu0 }
 0x2fd   :  { %v1543_v6 = vadd.f32 %v1542_v4, %v8871_v60  ;;  %v8875_v4 = vld [vmem:[#allocation77_spill] sm:$0xff] }
 0x2fe   :  { %v1544_v41 = vpop.f32.mrf.mxu1  ;;  %v4312_v12 = vpop.f32.mrf.mxu0 }
 0x2ff   :  { %v1758_v38 = vadd.f32 %v1543_v6, %v8872_v58  ;;  %v1545_v35 = vadd.f32 %v1544_v41, %v8873_v7  ;;  %v8876_v12 = vld [vmem:[#allocation78_spill] sm:$0xff]  ;;  %v8877_v41 = vld [vmem:[#allocation53_spill] sm:$0xff] }
 0x300   :  { %v1614_v63 = vadd.f32 %v1613_v50, %v8876_v12 }
 0x301   :  { %v3787_v51 = vmul.f32 -1.442695, %v1758_v38  ;;  %v1765_v49 = vadd.f32 %v1545_v35, %v8874_v56 }
 0x303   :  { %4852 = vpow2.f32 %v3787_v51  ;;  %v3788_v24 = vmul.f32 -1.442695, %v1765_v49 }
 0x305   :  { %4854 = vpow2.f32 %v3788_v24 }
 0x310   :  { %v4853_v31 = vpop.eup %4852 }
 0x311   :  { %v1762_v14 = vadd.f32 1.0, %v4853_v31  ;;  %v8878_v31 = vld [vmem:[#allocation39_spill] sm:$0xff] }
 0x312   :  { %v4855_v55 = vpop.eup %4854 }
 0x313   :  { %4856 = vrcp.f32 %v1762_v14  ;;  %v1769_v36 = vadd.f32 1.0, %v4855_v55  ;;  %v8879_v14 = vld [vmem:[#allocation73_spill] sm:$0xff] }
 0x315   :  { %4858 = vrcp.f32 %v1769_v36 }
 0x31d   :  { %v1683_v28 = vpop.f32.mrf.mxu1  ;;  %v1754_v18 = vpop.f32.mrf.mxu0 }
 0x31e   :  { %v1684_v60 = vadd.f32 %v1683_v28, %v8875_v4 }
 0x31f   :  { %v1685_v6 = vpop.f32.mrf.mxu1  ;;  %v4347_v38 = vpop.f32.mrf.mxu0 }
 0x320   :  { %v4857_v58 = vpop.eup %4856  ;;  %v1779_v51 = vadd.f32 %v1684_v60, %v8877_v41  ;;  %v1686_v24 = vadd.f32 %v1685_v6, %v6313_v3  ;;  %v1755_v6 = vadd.f32 %v1754_v18, %v6334_v16  ;;  %v7091_v18 = vld [vmem:[%s8490_s4 + $0x280] sm:$0xff] }
 0x321   :  { %v1772_v7 = vmul.f32 %v4857_v58, %v1614_v63  ;;  %v7082_v58 = vld [vmem:[%s8490_s4 + $0x298] sm:$0xff] }
 0x322   :  { %v3789_v35 = vmul.f32 -1.442695, %v1779_v51  ;;  %v1786_v55 = vadd.f32 %v1686_v24, %v8879_v14  ;;  %v4859_v28 = vpop.eup %4858  ;;  %v7119_v14 = vld [vmem:[%s8490_s4 + $0x238] sm:$0xff] }
 0x323   :  { %v1773_v56 = vadd.f32 %v1772_v7, %v8878_v31  ;;  %v1775_v12 = vsub.f32 1.0, %v4859_v28  ;;  %v1777_v63 = vmul.f32 %v4859_v28, %v6646_v0  ;;  %v7045_v7 = vld [vmem:[%s8490_s4 + $0x2f8] sm:$0xff]  ;;  %v7063_v0 = vld [vmem:[%s8490_s4 + $0x2c8] sm:$0xff]  ;;  %v7146_v28 = vld [vmem:[%s8490_s4 + $0x1f0] sm:$0xff] }
 0x324   :  { %4860 = vpow2.f32 %v3789_v35  ;;  %v3790_v49 = vmul.f32 -1.442695, %v1786_v55  ;;  %v8880_v35 = vld [vmem:[#allocation74_spill] sm:$0xff]  ;;  %v7101_v31 = vld [vmem:[%s8490_s4 + $0x268] sm:$0xff]  ;;  %v7128_v55 = vld [vmem:[%s8490_s4 + $0x220] sm:$0xff] }
 0x325   :  { %4862 = vtanh.f32 %v1773_v56  ;;  %v7110_v56 = vld [vmem:[%s8490_s4 + $0x250] sm:$0xff] }
 0x326   :  { %4864 = vpow2.f32 %v3790_v49  ;;  %v7137_v49 = vld [vmem:[%s8490_s4 + $0x208] sm:$0xff] }
 0x331   :  { %v4861_v50 = vpop.eup %4860 }
 0x332   :  { %v4863_v38 = vpop.eup %4862  ;;  %v1783_v4 = vadd.f32 1.0, %v4861_v50 }
 0x333   :  { %v1776_v25 = vmul.f32 %v4863_v38, %v1775_v12  ;;  %v4865_v60 = vpop.eup %4864  ;;  %v7072_v12 = vld [vmem:[%s8490_s4 + $0x2b0] sm:$0xff]  ;;  %v7155_v38 = vld [vmem:[%s8490_s4 + $0x1d8] sm:$0xff] }
 0x334   :  { %4866 = vrcp.f32 %v1783_v4  ;;  %v1790_v4 = vadd.f32 1.0, %v4865_v60 }
 0x335   :  { %v7037_v36 = vadd.f32 %v1777_v63, %v1776_v25  ;;  %v7054_v25 = vld [vmem:[%s8490_s4 + $0x2e0] sm:$0xff] }
 0x336   :  { %4868 = vrcp.f32 %v1790_v4  ;;  %v7164_v63 = vld [vmem:[%s8490_s4 + $0x1c0] sm:$0xff] }
 0x337   :  { %1877 = vmatmul.mubr.f32.vlgmr.msra.gmra.mxu1 %v7037_v36  ;;  %4381 = vmatmul.mubr.f32.vlgmr.msra.gmra.mxu0 %v7037_v36  ;;  %8881 = vst [vmem:[#allocation38_spill] sm:$0xff] %v7164_v63 }
 0x338   :  { %1954 = vmatpush1.msra.mxu1 %v6653_v27  ;;  %4384 = vmatpush3.msra.mxu0 %v7045_v7 }
 0x339   :  { %1955 = vmatprep.subr.mxu1 %v6660_v13  ;;  %4385 = vmatprep.subr.mxu0 %v8712_v54 }
 0x33a   :  { %1956 = vmatpush1.msra.mxu1 %v6667_v15  ;;  %4386 = vmatpush3.msra.mxu0 %v7054_v25 }
 0x33b   :  { %1957 = vmatprep.subr.mxu1 %v6674_v59  ;;  %4387 = vmatprep.subr.mxu0 %v8712_v54 }
 0x33c   :  { %1958 = vmatpush1.msra.mxu1 %v6681_v23  ;;  %4388 = vmatpush3.msra.mxu0 %v7063_v0 }
 0x33d   :  { %1959 = vmatprep.subr.mxu1 %v6688_v9  ;;  %4389 = vmatprep.subr.mxu0 %v8712_v54 }
 0x33e   :  { %1960 = vmatpush1.msra.mxu1 %v6695_v57  ;;  %4390 = vmatpush3.msra.mxu0 %v7072_v12 }
 0x33f   :  { %1961 = vmatprep.subr.mxu1 %v6702_v48  ;;  %4391 = vmatprep.subr.mxu0 %v8712_v54 }
 0x340   :  { %1962 = vmatpush1.msra.mxu1 %v6710_v61  ;;  %4392 = vmatpush3.msra.mxu0 %v7082_v58 }
 0x341   :  { %v4867_v41 = vpop.eup %4866  ;;  %1963 = vmatprep.subr.mxu1 %v6717_v10  ;;  %4393 = vmatprep.subr.mxu0 %v8712_v54 }
 0x342   :  { %v1793_v51 = vmul.f32 %v4867_v41, %v1755_v6  ;;  %1964 = vmatpush1.msra.mxu1 %v6724_v20  ;;  %4394 = vmatpush3.msra.mxu0 %v7091_v18  ;;  %v7173_v6 = vld [vmem:[%s8490_s4 + $0x1a8] sm:$0xff] }
 0x343   :  { %1965 = vmatprep.subr.mxu1 %v6731_v34  ;;  %4395 = vmatprep.subr.mxu0 %v8712_v54  ;;  %v4869_v50 = vpop.eup %4868  ;;  %8882 = vst [vmem:[#allocation40_spill] sm:$0xff] %v7173_v6 }
 0x344   :  { %v1794_v24 = vadd.f32 %v1793_v51, %v8880_v35  ;;  %1966 = vmatpush1.msra.mxu1 %v6739_v47  ;;  %4396 = vmatpush3.msra.mxu0 %v7101_v31  ;;  %v1796_v60 = vsub.f32 1.0, %v4869_v50  ;;  %v1798_v51 = vmul.f32 %v4869_v50, %v6870_v52  ;;  %v8885_v52 = vld [vmem:[#allocation3_spill] sm:$0xff]  ;;  %v8886_v50 = vld [vmem:[#allocation4_spill] sm:$0xff] }
 0x345   :  { %1967 = vmatprep.subr.mxu1 %v6746_v37  ;;  %4397 = vmatprep.subr.mxu0 %v8712_v54 }
 0x346   :  { %4870 = vtanh.f32 %v1794_v24  ;;  %1968 = vmatpush1.msra.mxu1 %v6753_v17  ;;  %4398 = vmatpush3.msra.mxu0 %v7110_v56  ;;  %v7186_v24 = vld [vmem:[%s8490_s4 + $0x190] sm:$0xff] }
 0x347   :  { %1969 = vmatprep.subr.mxu1 %v6760_v39  ;;  %4399 = vmatprep.subr.mxu0 %v8712_v54  ;;  %8884 = vst [vmem:[#allocation39_spill] sm:$0xff] %v7186_v24 }
 0x348   :  { %1970 = vmatpush1.msra.mxu1 %v6767_v11  ;;  %4400 = vmatpush3.msra.mxu0 %v7119_v14 }
 0x349   :  { %1971 = vmatprep.subr.mxu1 %v6774_v40  ;;  %4401 = vmatprep.subr.mxu0 %v8712_v54 }
 0x34a   :  { %1972 = vmatpush1.msra.mxu1 %v6781_v5  ;;  %4402 = vmatpush3.msra.mxu0 %v7128_v55 }
 0x34b   :  { %1973 = vmatprep.subr.mxu1 %v6788_v42  ;;  %4403 = vmatprep.subr.mxu0 %v8712_v54 }
 0x34c   :  { %1974 = vmatpush1.msra.mxu1 %v6795_v1  ;;  %4404 = vmatpush3.msra.mxu0 %v7137_v49 }
 0x34d   :  { %1975 = vmatprep.subr.mxu1 %v6802_v43  ;;  %4405 = vmatprep.subr.mxu0 %v8712_v54 }
 0x34e   :  { %1976 = vmatpush1.msra.mxu1 %v6809_v26  ;;  %4406 = vmatpush3.msra.mxu0 %v7146_v28 }
 0x34f   :  { %1977 = vmatprep.subr.mxu1 %v6816_v45  ;;  %4407 = vmatprep.subr.mxu0 %v8712_v54 }
 0x350   :  { %1978 = vmatpush1.msra.mxu1 %v6823_v19  ;;  %4408 = vmatpush3.msra.mxu0 %v7155_v38 }
 0x351   :  { %1979 = vmatprep.subr.mxu1 %v6830_v46  ;;  %4409 = vmatprep.subr.mxu0 %v8712_v54 }
 0x352   :  { %1980 = vmatpush1.msra.mxu1 %v6837_v62  ;;  %4410 = vmatpush3.msra.mxu0 %v7164_v63 }
 0x353   :  { %v4871_v4 = vpop.eup %4870  ;;  %1981 = vmatprep.subr.mxu1 %v6844_v21  ;;  %4411 = vmatprep.subr.mxu0 %v8712_v54 }
 0x354   :  { %1982 = vmatpush1.msra.mxu1 %v6851_v22  ;;  %4412 = vmatpush3.msra.mxu0 %v7173_v6  ;;  %v1797_v41 = vmul.f32 %v4871_v4, %v1796_v60  ;;  %v8888_v60 = vld [vmem:[#allocation5_spill] sm:$0xff]  ;;  %v8891_v4 = vld [vmem:[#allocation7_spill] sm:$0xff] }
 0x355   :  { %1983 = vmatprep.subr.mxu1 %v6859_v8  ;;  %4413 = vmatprep.subr.mxu0 %v8712_v54 }
 0x356   :  { %1984 = vmatpush1.msra.mxu1 %v6866_v2  ;;  %2017 = vmatprep.mubr.f32.mxu1 %v8712_v54  ;;  %v7181_v35 = vadd.f32 %v1798_v51, %v1797_v41  ;;  %v8893_v41 = vld [vmem:[#allocation82_spill] sm:$0xff]  ;;  %v8894_v51 = vld [vmem:[#allocation9_spill] sm:$0xff] }
 0x357   :  { %4414 = vmatpush3.msra.mxu0 %v7186_v24  ;;  %4415 = vmatprep.mubr.msk.f32.mxu0 %vm5166_vm0, %v8712_v54 }
 0x358   :  { %8883 = vst [vmem:[#allocation53_spill] sm:$0xff] %v7181_v35  ;;  %2018 = vmatmul.mubr.f32.vlgmr.msra.gmra.mxu1 %v7181_v35  ;;  %4416 = vmatmul.mubr.f32.vlgmr.msra.gmra.mxu0 %v7181_v35 }
 0x359   :  { %2142 = vmatprep.subr.mxu1 %v6404_v44  ;;  %4418 = vmatprep.subr.mxu0 %v8712_v54  ;;  %v8887_v44 = vld [vmem:[#allocation80_spill] sm:$0xff] }
 0x35a   :  { %2143 = vmatpush1.msra.mxu1 %v6411_v30  ;;  %4419 = vmatpush3.msra.mxu0 %v6883_v29  ;;  %v8889_v30 = vld [vmem:[#allocation6_spill] sm:$0xff]  ;;  %v8930_v29 = vld [vmem:[#allocation64_spill] sm:$0xff] }
 0x35b   :  { %2144 = vmatprep.subr.mxu1 %v6418_v32  ;;  %4420 = vmatprep.subr.mxu0 %v8712_v54  ;;  %v8890_v32 = vld [vmem:[#allocation81_spill] sm:$0xff] }
 0x35c   :  { %2145 = vmatpush1.msra.mxu1 %v6425_v33  ;;  %4421 = vmatpush3.msra.mxu0 %v6892_v53  ;;  %v8892_v33 = vld [vmem:[#allocation8_spill] sm:$0xff] }
 0x35d   :  { %2146 = vmatprep.subr.mxu1 %v8885_v52  ;;  %4422 = vmatprep.subr.mxu0 %v8712_v54  ;;  %v8895_v52 = vld [vmem:[#allocation10_spill] sm:$0xff] }
 0x35e   :  { %2147 = vmatpush1.msra.mxu1 %v8886_v50  ;;  %4423 = vmatpush3.msra.mxu0 %v8887_v44  ;;  %v8896_v50 = vld [vmem:[#allocation83_spill] sm:$0xff]  ;;  %v8929_v44 = vld [vmem:[#allocation42_spill] sm:$0xff] }
 0x35f   :  { %2148 = vmatprep.subr.mxu1 %v8888_v60  ;;  %4424 = vmatprep.subr.mxu0 %v8712_v54  ;;  %v8897_v60 = vld [vmem:[#allocation11_spill] sm:$0xff] }
 0x360   :  { %2149 = vmatpush1.msra.mxu1 %v8889_v30  ;;  %4425 = vmatpush3.msra.mxu0 %v8890_v32  ;;  %v8898_v30 = vld [vmem:[#allocation12_spill] sm:$0xff]  ;;  %v8900_v32 = vld [vmem:[#allocation14_spill] sm:$0xff] }
 0x361   :  { %2150 = vmatprep.subr.mxu1 %v8891_v4  ;;  %4426 = vmatprep.subr.mxu0 %v8712_v54  ;;  %v8899_v4 = vld [vmem:[#allocation84_spill] sm:$0xff] }
 0x362   :  { %2151 = vmatpush1.msra.mxu1 %v8892_v33  ;;  %4427 = vmatpush3.msra.mxu0 %v8893_v41  ;;  %v8901_v33 = vld [vmem:[#allocation15_spill] sm:$0xff]  ;;  %v8903_v41 = vld [vmem:[#allocation17_spill] sm:$0xff] }
 0x363   :  { %2152 = vmatprep.subr.mxu1 %v8894_v51  ;;  %4428 = vmatprep.subr.mxu0 %v8712_v54  ;;  %v8902_v51 = vld [vmem:[#allocation85_spill] sm:$0xff] }
 0x364   :  { %2153 = vmatpush1.msra.mxu1 %v8895_v52  ;;  %4429 = vmatpush3.msra.mxu0 %v8896_v50  ;;  %v8904_v52 = vld [vmem:[#allocation18_spill] sm:$0xff]  ;;  %v8906_v50 = vld [vmem:[#allocation20_spill] sm:$0xff] }
 0x365   :  { %2154 = vmatprep.subr.mxu1 %v8897_v60  ;;  %4430 = vmatprep.subr.mxu0 %v8712_v54  ;;  %v8905_v60 = vld [vmem:[#allocation86_spill] sm:$0xff] }
 0x366   :  { %2155 = vmatpush1.msra.mxu1 %v8898_v30  ;;  %4431 = vmatpush3.msra.mxu0 %v8899_v4  ;;  %v8907_v30 = vld [vmem:[#allocation21_spill] sm:$0xff]  ;;  %v8909_v4 = vld [vmem:[#allocation23_spill] sm:$0xff] }
 0x367   :  { %2156 = vmatprep.subr.mxu1 %v8900_v32  ;;  %4432 = vmatprep.subr.mxu0 %v8712_v54  ;;  %v8908_v32 = vld [vmem:[#allocation87_spill] sm:$0xff] }
 0x368   :  { %2157 = vmatpush1.msra.mxu1 %v8901_v33  ;;  %4433 = vmatpush3.msra.mxu0 %v8902_v51  ;;  %v8910_v33 = vld [vmem:[#allocation24_spill] sm:$0xff]  ;;  %v8912_v51 = vld [vmem:[#allocation26_spill] sm:$0xff] }
 0x369   :  { %2158 = vmatprep.subr.mxu1 %v8903_v41  ;;  %4434 = vmatprep.subr.mxu0 %v8712_v54  ;;  %v8911_v41 = vld [vmem:[#allocation88_spill] sm:$0xff] }
 0x36a   :  { %2159 = vmatpush1.msra.mxu1 %v8904_v52  ;;  %4435 = vmatpush3.msra.mxu0 %v8905_v60  ;;  %v8913_v52 = vld [vmem:[#allocation27_spill] sm:$0xff]  ;;  %v8915_v60 = vld [vmem:[#allocation29_spill] sm:$0xff] }
 0x36b   :  { %2160 = vmatprep.subr.mxu1 %v8906_v50  ;;  %4436 = vmatprep.subr.mxu0 %v8712_v54  ;;  %v8914_v50 = vld [vmem:[#allocation89_spill] sm:$0xff] }
 0x36c   :  { %2161 = vmatpush1.msra.mxu1 %v8907_v30  ;;  %4437 = vmatpush3.msra.mxu0 %v8908_v32  ;;  %v8916_v30 = vld [vmem:[#allocation30_spill] sm:$0xff]  ;;  %v8918_v32 = vld [vmem:[#allocation32_spill] sm:$0xff] }
 0x36d   :  { %2162 = vmatprep.subr.mxu1 %v8909_v4  ;;  %4438 = vmatprep.subr.mxu0 %v8712_v54  ;;  %v8917_v4 = vld [vmem:[#allocation90_spill] sm:$0xff] }
 0x36e   :  { %2163 = vmatpush1.msra.mxu1 %v8910_v33  ;;  %4439 = vmatpush3.msra.mxu0 %v8911_v41  ;;  %v8919_v33 = vld [vmem:[#allocation13_spill] sm:$0xff]  ;;  %v8921_v41 = vld [vmem:[#allocation16_spill] sm:$0xff] }
 0x36f   :  { %2164 = vmatprep.subr.mxu1 %v8912_v51  ;;  %4440 = vmatprep.subr.mxu0 %v8712_v54  ;;  %v8920_v51 = vld [vmem:[#allocation91_spill] sm:$0xff] }
 0x370   :  { %2165 = vmatpush1.msra.mxu1 %v8913_v52  ;;  %4441 = vmatpush3.msra.mxu0 %v8914_v50  ;;  %v8922_v52 = vld [vmem:[#allocation19_spill] sm:$0xff]  ;;  %v8924_v50 = vld [vmem:[#allocation22_spill] sm:$0xff] }
 0x371   :  { %2166 = vmatprep.subr.mxu1 %v8915_v60  ;;  %4442 = vmatprep.subr.mxu0 %v8712_v54  ;;  %v8923_v60 = vld [vmem:[#allocation92_spill] sm:$0xff] }
 0x372   :  { %2167 = vmatpush1.msra.mxu1 %v8916_v30  ;;  %4443 = vmatpush3.msra.mxu0 %v8917_v4  ;;  %v8925_v30 = vld [vmem:[#allocation25_spill] sm:$0xff] }
 0x373   :  { %2168 = vmatprep.subr.mxu1 %v8918_v32  ;;  %4444 = vmatprep.subr.mxu0 %v8712_v54  ;;  %v8926_v32 = vld [vmem:[#allocation93_spill] sm:$0xff] }
 0x374   :  { %2169 = vmatpush1.msra.mxu1 %v8919_v33  ;;  %4445 = vmatpush3.msra.mxu0 %v8920_v51 }
 0x375   :  { %2170 = vmatprep.subr.mxu1 %v8921_v41  ;;  %4446 = vmatprep.subr.mxu0 %v8712_v54  ;;  %v8927_v41 = vld [vmem:[#allocation28_spill] sm:$0xff] }
 0x376   :  { %2171 = vmatpush1.msra.mxu1 %v8922_v52  ;;  %4447 = vmatpush3.msra.mxu0 %v8923_v60  ;;  %v8928_v60 = vld [vmem:[#allocation60_spill] sm:$0xff] }
 0x377   :  { %2172 = vmatprep.subr.mxu1 %v8924_v50  ;;  %4448 = vmatprep.subr.mxu0 %v8712_v54 }
 0x378   :  { %2173 = vmatpush1.msra.mxu1 %v8925_v30  ;;  %2206 = vmatprep.mubr.f32.mxu1 %v8712_v54 }
 0x379   :  { %4449 = vmatpush3.msra.mxu0 %v8926_v32  ;;  %4450 = vmatprep.mubr.msk.f32.mxu0 %vm5166_vm0, %v8712_v54  ;;  %v8931_v32 = vld [vmem:[#allocation44_spill] sm:$0xff] }
 0x37a   :  { %2283 = vmatprep.subr.mxu1 %v8927_v41  ;;  %4453 = vmatprep.subr.mxu0 %v8712_v54 }
 0x3f7   :  { %v1878_v33 = vpop.f32.mrf.mxu1  ;;  %v1949_v52 = vpop.f32.mrf.mxu0 }
 0x3f8   :  { %v1879_v51 = vadd.f32 %v1878_v33, %v8928_v60  ;;  %v8932_v33 = vld [vmem:[#allocation77_spill] sm:$0xff] }
 0x3f9   :  { %v1880_v50 = vpop.f32.mrf.mxu1  ;;  %v4382_v4 = vpop.f32.mrf.mxu0 }
 0x3fa   :  { %v2094_v53 = vadd.f32 %v1879_v51, %v8929_v44  ;;  %v1881_v24 = vadd.f32 %v1880_v50, %v8930_v29  ;;  %v8933_v4 = vld [vmem:[#allocation78_spill] sm:$0xff]  ;;  %v8934_v50 = vld [vmem:[#allocation49_spill] sm:$0xff] }
 0x3fb   :  { %v1950_v62 = vadd.f32 %v1949_v52, %v8933_v4 }
 0x3fc   :  { %v3791_v30 = vmul.f32 -1.442695, %v2094_v53  ;;  %v2101_v2 = vadd.f32 %v1881_v24, %v8931_v32 }
 0x3fe   :  { %4872 = vpow2.f32 %v3791_v30  ;;  %v3792_v8 = vmul.f32 -1.442695, %v2101_v2 }
 0x400   :  { %4874 = vpow2.f32 %v3792_v8 }
 0x40b   :  { %v4873_v35 = vpop.eup %4872 }
 0x40c   :  { %v2098_v41 = vadd.f32 1.0, %v4873_v35  ;;  %v8935_v35 = vld [vmem:[#allocation43_spill] sm:$0xff] }
 0x40d   :  { %v4875_v6 = vpop.eup %4874 }
 0x40e   :  { %4876 = vrcp.f32 %v2098_v41  ;;  %v2105_v22 = vadd.f32 1.0, %v4875_v6  ;;  %v8936_v6 = vld [vmem:[#allocation71_spill] sm:$0xff] }
 0x410   :  { %4878 = vrcp.f32 %v2105_v22 }
 0x418   :  { %v2019_v21 = vpop.f32.mrf.mxu1  ;;  %v2090_v63 = vpop.f32.mrf.mxu0 }
 0x419   :  { %v2020_v60 = vadd.f32 %v2019_v21, %v8932_v33 }
 0x41a   :  { %v2021_v44 = vpop.f32.mrf.mxu1  ;;  %v4417_v53 = vpop.f32.mrf.mxu0 }
 0x41b   :  { %v4877_v51 = vpop.eup %4876  ;;  %v2115_v30 = vadd.f32 %v2020_v60, %v8934_v50  ;;  %v2022_v8 = vadd.f32 %v2021_v44, %v6313_v3  ;;  %v7380_v60 = vld [vmem:[%s8490_s4 + $0x140] sm:$0xff]  ;;  %v7394_v44 = vld [vmem:[%s8490_s4 + $0x128] sm:$0xff]  ;;  %v8955_v50 = vld [vmem:[#allocation81_spill] sm:$0xff] }
 0x41c   :  { %v2108_v29 = vmul.f32 %v4877_v51, %v1950_v62  ;;  %8950 = vst [vmem:[#allocation73_spill] sm:$0xff] %v7380_v60  ;;  %8953 = vst [vmem:[#allocation3_spill] sm:$0xff] %v7394_v44  ;;  %v7401_v51 = vld [vmem:[%s8490_s4 + $0x120] sm:$0xff] }
 0x41d   :  { %v3793_v2 = vmul.f32 -1.442695, %v2115_v30  ;;  %v2122_v32 = vadd.f32 %v2022_v8, %v8936_v6  ;;  %v4879_v21 = vpop.eup %4878  ;;  %8954 = vst [vmem:[#allocation4_spill] sm:$0xff] %v7401_v51  ;;  %v7408_v30 = vld [vmem:[%s8490_s4 + $0x110] sm:$0xff]  ;;  %v8958_v8 = vld [vmem:[#allocation82_spill] sm:$0xff]  ;;  %v8961_v6 = vld [vmem:[#allocation83_spill] sm:$0xff] }
 0x41e   :  { %v2109_v24 = vadd.f32 %v2108_v29, %v8935_v35  ;;  %v2111_v4 = vsub.f32 1.0, %v4879_v21  ;;  %v2113_v62 = vmul.f32 %v4879_v21, %v7037_v36  ;;  %v7373_v36 = vld [vmem:[%s8490_s4 + $0x150] sm:$0xff]  ;;  %8956 = vst [vmem:[#allocation5_spill] sm:$0xff] %v7408_v30  ;;  %v7422_v35 = vld [vmem:[%s8490_s4 + $0xf8] sm:$0xff]  ;;  %v8964_v21 = vld [vmem:[#allocation84_spill] sm:$0xff] }
 0x41f   :  { %4880 = vpow2.f32 %v3793_v2  ;;  %v3794_v41 = vmul.f32 -1.442695, %v2122_v32  ;;  %v7415_v2 = vld [vmem:[%s8490_s4 + $0x108] sm:$0xff]  ;;  %8959 = vst [vmem:[#allocation7_spill] sm:$0xff] %v7422_v35  ;;  %v7436_v32 = vld [vmem:[%s8490_s4 + $0xe0] sm:$0xff] }
 0x420   :  { %4882 = vtanh.f32 %v2109_v24  ;;  %8957 = vst [vmem:[#allocation6_spill] sm:$0xff] %v7415_v2  ;;  %v7429_v24 = vld [vmem:[%s8490_s4 + $0xf0] sm:$0xff]  ;;  %8962 = vst [vmem:[#allocation9_spill] sm:$0xff] %v7436_v32 }
 0x421   :  { %4884 = vpow2.f32 %v3794_v41  ;;  %8960 = vst [vmem:[#allocation8_spill] sm:$0xff] %v7429_v24  ;;  %v7443_v41 = vld [vmem:[%s8490_s4 + $0xd8] sm:$0xff] }
 0x422   :  { %8963 = vst [vmem:[#allocation10_spill] sm:$0xff] %v7443_v41 }
 0x42c   :  { %v4881_v52 = vpop.eup %4880 }
 0x42d   :  { %v4883_v53 = vpop.eup %4882  ;;  %v2119_v33 = vadd.f32 1.0, %v4881_v52  ;;  %v7450_v52 = vld [vmem:[%s8490_s4 + $0xc8] sm:$0xff] }
 0x42e   :  { %v2112_v46 = vmul.f32 %v4883_v53, %v2111_v4  ;;  %v4885_v29 = vpop.eup %4884  ;;  %v8952_v4 = vld [vmem:[#allocation80_spill] sm:$0xff]  ;;  %8965 = vst [vmem:[#allocation11_spill] sm:$0xff] %v7450_v52  ;;  %v7457_v53 = vld [vmem:[%s8490_s4 + $0xc0] sm:$0xff] }
 0x42f   :  { %4886 = vrcp.f32 %v2119_v33  ;;  %v7387_v33 = vld [vmem:[%s8490_s4 + $0x138] sm:$0xff]  ;;  %8966 = vst [vmem:[#allocation12_spill] sm:$0xff] %v7457_v53 }
 0x430   :  { %v7273_v22 = vadd.f32 %v2113_v62, %v2112_v46  ;;  %v7366_v46 = vld [vmem:[%s8490_s4 + $0x158] sm:$0xff]  ;;  %8951 = vst [vmem:[#allocation74_spill] sm:$0xff] %v7387_v33  ;;  %v8967_v62 = vld [vmem:[#allocation85_spill] sm:$0xff] }
 0x432   :  { %2207 = vmatmul.mubr.f32.vlgmr.msra.gmra.mxu1 %v7273_v22  ;;  %4451 = vmatmul.mubr.f32.vlgmr.msra.gmra.mxu0 %v7273_v22 }
 0x433   :  { %2284 = vmatpush1.msra.mxu1 %v6653_v27  ;;  %4454 = vmatpush3.msra.mxu0 %v7045_v7  ;;  %v2126_v27 = vadd.f32 1.0, %v4885_v29  ;;  %v7464_v29 = vld [vmem:[%s8490_s4 + $0xb0] sm:$0xff] }
 0x434   :  { %2285 = vmatprep.subr.mxu1 %v6660_v13  ;;  %4455 = vmatprep.subr.mxu0 %v8712_v54  ;;  %v2091_v13 = vadd.f32 %v2090_v63, %v6334_v16  ;;  %v8949_v63 = vld [vmem:[#allocation79_spill] sm:$0xff]  ;;  %8968 = vst [vmem:[#allocation14_spill] sm:$0xff] %v7464_v29 }
 0x435   :  { %2286 = vmatpush1.msra.mxu1 %v6667_v15  ;;  %4456 = vmatpush3.msra.mxu0 %v7054_v25  ;;  %4888 = vrcp.f32 %v2126_v27  ;;  %v7471_v27 = vld [vmem:[%s8490_s4 + $0xa8] sm:$0xff] }
 0x436   :  { %2287 = vmatprep.subr.mxu1 %v6674_v59  ;;  %4457 = vmatprep.subr.mxu0 %v8712_v54  ;;  %8969 = vst [vmem:[#allocation15_spill] sm:$0xff] %v7471_v27 }
 0x437   :  { %2288 = vmatpush1.msra.mxu1 %v6681_v23  ;;  %4458 = vmatpush3.msra.mxu0 %v7063_v0  ;;  %v8937_v23 = vld [vmem:[#allocation72_spill] sm:$0xff] }
 0x438   :  { %2289 = vmatprep.subr.mxu1 %v6688_v9  ;;  %4459 = vmatprep.subr.mxu0 %v8712_v54 }
 0x439   :  { %2290 = vmatpush1.msra.mxu1 %v6695_v57  ;;  %4460 = vmatpush3.msra.mxu0 %v7072_v12 }
 0x43a   :  { %2291 = vmatprep.subr.mxu1 %v6702_v48  ;;  %4461 = vmatprep.subr.mxu0 %v8712_v54  ;;  %v8938_v48 = vld [vmem:[#allocation31_spill] sm:$0xff] }
 0x43b   :  { %2292 = vmatpush1.msra.mxu1 %v6710_v61  ;;  %4462 = vmatpush3.msra.mxu0 %v7082_v58  ;;  %v8939_v61 = vld [vmem:[#allocation34_spill] sm:$0xff] }
 0x43c   :  { %v4887_v15 = vpop.eup %4886  ;;  %2293 = vmatprep.subr.mxu1 %v6717_v10  ;;  %4463 = vmatprep.subr.mxu0 %v8712_v54  ;;  %v8940_v10 = vld [vmem:[#allocation38_spill] sm:$0xff] }
 0x43d   :  { %v2129_v59 = vmul.f32 %v4887_v15, %v2091_v13  ;;  %2294 = vmatpush1.msra.mxu1 %v6724_v20  ;;  %4464 = vmatpush3.msra.mxu0 %v7091_v18  ;;  %v8970_v13 = vld [vmem:[#allocation86_spill] sm:$0xff] }
 0x43e   :  { %2295 = vmatprep.subr.mxu1 %v6731_v34  ;;  %4465 = vmatprep.subr.mxu0 %v8712_v54  ;;  %v7478_v15 = vld [vmem:[%s8490_s4 + $0x98] sm:$0xff] }
 0x43f   :  { %v2130_v9 = vadd.f32 %v2129_v59, %v8937_v23  ;;  %2296 = vmatpush1.msra.mxu1 %v6739_v47  ;;  %4466 = vmatpush3.msra.mxu0 %v7101_v31  ;;  %v8941_v47 = vld [vmem:[#allocation36_spill] sm:$0xff]  ;;  %8971 = vst [vmem:[#allocation17_spill] sm:$0xff] %v7478_v15  ;;  %v7485_v59 = vld [vmem:[%s8490_s4 + $0x90] sm:$0xff]  ;;  %v8973_v23 = vld [vmem:[#allocation87_spill] sm:$0xff] }
 0x440   :  { %2297 = vmatprep.subr.mxu1 %v6746_v37  ;;  %4467 = vmatprep.subr.mxu0 %v8712_v54  ;;  %v8942_v37 = vld [vmem:[#allocation57_spill] sm:$0xff]  ;;  %8972 = vst [vmem:[#allocation18_spill] sm:$0xff] %v7485_v59 }
 0x441   :  { %4890 = vtanh.f32 %v2130_v9  ;;  %2298 = vmatpush1.msra.mxu1 %v6753_v17  ;;  %4468 = vmatpush3.msra.mxu0 %v7110_v56  ;;  %v8943_v17 = vld [vmem:[#allocation40_spill] sm:$0xff]  ;;  %v7492_v9 = vld [vmem:[%s8490_s4 + $0x80] sm:$0xff] }
 0x442   :  { %2299 = vmatprep.subr.mxu1 %v6760_v39  ;;  %4469 = vmatprep.subr.mxu0 %v8712_v54  ;;  %v4889_v57 = vpop.eup %4888  ;;  %8974 = vst [vmem:[#allocation20_spill] sm:$0xff] %v7492_v9 }
 0x443   :  { %2300 = vmatpush1.msra.mxu1 %v6767_v11  ;;  %4470 = vmatpush3.msra.mxu0 %v7119_v14  ;;  %v2132_v20 = vsub.f32 1.0, %v4889_v57  ;;  %v8944_v11 = vld [vmem:[#allocation53_spill] sm:$0xff] }
 0x444   :  { %2301 = vmatprep.subr.mxu1 %v6774_v40  ;;  %4471 = vmatprep.subr.mxu0 %v8712_v54  ;;  %v2134_v40 = vmul.f32 %v4889_v57, %v8944_v11  ;;  %v7499_v57 = vld [vmem:[%s8490_s4 + $0x78] sm:$0xff] }
 0x445   :  { %2302 = vmatpush1.msra.mxu1 %v6781_v5  ;;  %4472 = vmatpush3.msra.mxu0 %v7128_v55  ;;  %v8945_v5 = vld [vmem:[#allocation35_spill] sm:$0xff]  ;;  %8975 = vst [vmem:[#allocation21_spill] sm:$0xff] %v7499_v57  ;;  %v7534_v11 = vld [vmem:[%s8490_s4 + $0x38] sm:$0xff] }
 0x446   :  { %2303 = vmatprep.subr.mxu1 %v6788_v42  ;;  %4473 = vmatprep.subr.mxu0 %v8712_v54  ;;  %v8946_v42 = vld [vmem:[#allocation75_spill] sm:$0xff]  ;;  %8983 = vst [vmem:[#allocation29_spill] sm:$0xff] %v7534_v11 }
 0x447   :  { %2304 = vmatpush1.msra.mxu1 %v6795_v1  ;;  %4474 = vmatpush3.msra.mxu0 %v7137_v49 }
 0x448   :  { %2305 = vmatprep.subr.mxu1 %v6802_v43  ;;  %4475 = vmatprep.subr.mxu0 %v8712_v54  ;;  %v8947_v43 = vld [vmem:[#allocation39_spill] sm:$0xff] }
 0x449   :  { %2306 = vmatpush1.msra.mxu1 %v6809_v26  ;;  %4476 = vmatpush3.msra.mxu0 %v7146_v28  ;;  %v7352_v26 = vld [vmem:[%s8490_s4 + $0x170] sm:$0xff] }
 0x44a   :  { %2307 = vmatprep.subr.mxu1 %v6816_v45  ;;  %4477 = vmatprep.subr.mxu0 %v8712_v54  ;;  %v7359_v45 = vld [vmem:[%s8490_s4 + $0x168] sm:$0xff] }
 0x44b   :  { %2308 = vmatpush1.msra.mxu1 %v6823_v19  ;;  %4478 = vmatpush3.msra.mxu0 %v7155_v38  ;;  %v8948_v19 = vld [vmem:[#allocation76_spill] sm:$0xff] }
 0x44c   :  { %2309 = vmatprep.subr.mxu1 %v8938_v48  ;;  %4479 = vmatprep.subr.mxu0 %v8712_v54  ;;  %v8976_v48 = vld [vmem:[#allocation88_spill] sm:$0xff] }
 0x44d   :  { %2310 = vmatpush1.msra.mxu1 %v8939_v61  ;;  %4480 = vmatpush3.msra.mxu0 %v8940_v10  ;;  %v7506_v61 = vld [vmem:[%s8490_s4 + $0x68] sm:$0xff] }
 0x44e   :  { %v4891_v34 = vpop.eup %4890  ;;  %2311 = vmatprep.subr.mxu1 %v8941_v47  ;;  %4481 = vmatprep.subr.mxu0 %v8712_v54  ;;  %8977 = vst [vmem:[#allocation23_spill] sm:$0xff] %v7506_v61  ;;  %v7520_v47 = vld [vmem:[%s8490_s4 + $0x50] sm:$0xff] }
 0x44f   :  { %2312 = vmatpush1.msra.mxu1 %v8942_v37  ;;  %4482 = vmatpush3.msra.mxu0 %v8943_v17  ;;  %v2133_v39 = vmul.f32 %v4891_v34, %v2132_v20  ;;  %v7513_v20 = vld [vmem:[%s8490_s4 + $0x60] sm:$0xff]  ;;  %v8979_v34 = vld [vmem:[#allocation89_spill] sm:$0xff]  ;;  %8980 = vst [vmem:[#allocation26_spill] sm:$0xff] %v7520_v47  ;;  %v7527_v37 = vld [vmem:[%s8490_s4 + $0x48] sm:$0xff] }
 0x450   :  { %2313 = vmatprep.subr.mxu1 %v8945_v5  ;;  %4483 = vmatprep.subr.mxu0 %v8712_v54  ;;  %8978 = vst [vmem:[#allocation24_spill] sm:$0xff] %v7513_v20  ;;  %8981 = vst [vmem:[#allocation27_spill] sm:$0xff] %v7527_v37  ;;  %v8985_v5 = vld [vmem:[#allocation91_spill] sm:$0xff] }
 0x451   :  { %2314 = vmatpush1.msra.mxu1 %v8946_v42  ;;  %2347 = vmatprep.mubr.f32.mxu1 %v8712_v54  ;;  %v7342_v1 = vadd.f32 %v2134_v40, %v2133_v39  ;;  %v8982_v39 = vld [vmem:[#allocation90_spill] sm:$0xff]  ;;  %v7541_v40 = vld [vmem:[%s8490_s4 + $0x30] sm:$0xff]  ;;  %v7548_v42 = vld [vmem:[%s8490_s4 + $0x20] sm:$0xff] }
 0x452   :  { %4484 = vmatpush3.msra.mxu0 %v8947_v43  ;;  %4485 = vmatprep.mubr.msk.f32.mxu0 %vm5166_vm0, %v8712_v54  ;;  %8984 = vst [vmem:[#allocation30_spill] sm:$0xff] %v7541_v40  ;;  %8986 = vst [vmem:[#allocation32_spill] sm:$0xff] %v7548_v42 }
 0x453   :  { %2348 = vmatmul.mubr.f32.vlgmr.msra.gmra.mxu1 %v7342_v1  ;;  %4486 = vmatmul.mubr.f32.vlgmr.msra.gmra.mxu0 %v7342_v1 }
 0x454   :  { %2472 = vmatprep.subr.mxu1 %v7352_v26  ;;  %4488 = vmatprep.subr.mxu0 %v8712_v54 }
 0x455   :  { %2473 = vmatpush1.msra.mxu1 %v7359_v45  ;;  %4489 = vmatpush3.msra.mxu0 %v8948_v19  ;;  %v7555_v19 = vld [vmem:[%s8490_s4 + $0x18] sm:$0xff] }
 0x456   :  { %2474 = vmatprep.subr.mxu1 %v7366_v46  ;;  %4490 = vmatprep.subr.mxu0 %v8712_v54  ;;  %8987 = vst [vmem:[#allocation13_spill] sm:$0xff] %v7555_v19 }
 0x457   :  { %2475 = vmatpush1.msra.mxu1 %v7373_v36  ;;  %4491 = vmatpush3.msra.mxu0 %v8949_v63  ;;  %v8988_v63 = vld [vmem:[#allocation92_spill] sm:$0xff] }
 0x458   :  { %2476 = vmatprep.subr.mxu1 %v7380_v60  ;;  %4492 = vmatprep.subr.mxu0 %v8712_v54 }
 0x459   :  { %2477 = vmatpush1.msra.mxu1 %v7387_v33  ;;  %4493 = vmatpush3.msra.mxu0 %v8952_v4  ;;  %v7562_v4 = vld [vmem:[%s8490_s4 + $0x8] sm:$0xff] }
 0x45a   :  { %2478 = vmatprep.subr.mxu1 %v7394_v44  ;;  %4494 = vmatprep.subr.mxu0 %v8712_v54  ;;  %8989 = vst [vmem:[#allocation16_spill] sm:$0xff] %v7562_v4 }
 0x45b   :  { %2479 = vmatpush1.msra.mxu1 %v7401_v51  ;;  %4495 = vmatpush3.msra.mxu0 %v8955_v50  ;;  %v7569_v50 = vld [vmem:[%s8490_s4] sm:$0xff] }
 0x45c   :  { %2480 = vmatprep.subr.mxu1 %v7408_v30  ;;  %4496 = vmatprep.subr.mxu0 %v8712_v54  ;;  %8990 = vst [vmem:[#allocation19_spill] sm:$0xff] %v7569_v50 }
 0x45d   :  { %2481 = vmatpush1.msra.mxu1 %v7415_v2  ;;  %4497 = vmatpush3.msra.mxu0 %v8958_v8  ;;  %v8991_v8 = vld [vmem:[#allocation93_spill] sm:$0xff] }
 0x45e   :  { %2482 = vmatprep.subr.mxu1 %v7422_v35  ;;  %4498 = vmatprep.subr.mxu0 %v8712_v54 }
 0x45f   :  { %2483 = vmatpush1.msra.mxu1 %v7429_v24  ;;  %4499 = vmatpush3.msra.mxu0 %v8961_v6  ;;  %v7579_v6 = vld [vmem:[%s8490_s4 + $0x2f0] sm:$0xff] }
 0x460   :  { %2484 = vmatprep.subr.mxu1 %v7436_v32  ;;  %4500 = vmatprep.subr.mxu0 %v8712_v54  ;;  %8992 = vst [vmem:[#allocation22_spill] sm:$0xff] %v7579_v6 }
 0x461   :  { %2485 = vmatpush1.msra.mxu1 %v7443_v41  ;;  %4501 = vmatpush3.msra.mxu0 %v8964_v21 }
 0x462   :  { %2486 = vmatprep.subr.mxu1 %v7450_v52  ;;  %4502 = vmatprep.subr.mxu0 %v8712_v54 }
 0x463   :  { %2487 = vmatpush1.msra.mxu1 %v7457_v53  ;;  %4503 = vmatpush3.msra.mxu0 %v8967_v62 }
 0x464   :  { %2488 = vmatprep.subr.mxu1 %v7464_v29  ;;  %4504 = vmatprep.subr.mxu0 %v8712_v54 }
 0x465   :  { %2489 = vmatpush1.msra.mxu1 %v7471_v27  ;;  %4505 = vmatpush3.msra.mxu0 %v8970_v13  ;;  %v8993_v13 = vld [vmem:[#allocation60_spill] sm:$0xff] }
 0x466   :  { %2490 = vmatprep.subr.mxu1 %v7478_v15  ;;  %4506 = vmatprep.subr.mxu0 %v8712_v54 }
 0x467   :  { %2491 = vmatpush1.msra.mxu1 %v7485_v59  ;;  %4507 = vmatpush3.msra.mxu0 %v8973_v23 }
 0x468   :  { %2492 = vmatprep.subr.mxu1 %v7492_v9  ;;  %4508 = vmatprep.subr.mxu0 %v8712_v54 }
 0x469   :  { %2493 = vmatpush1.msra.mxu1 %v7499_v57  ;;  %4509 = vmatpush3.msra.mxu0 %v8976_v48 }
 0x46a   :  { %2494 = vmatprep.subr.mxu1 %v7506_v61  ;;  %4510 = vmatprep.subr.mxu0 %v8712_v54 }
 0x46b   :  { %2495 = vmatpush1.msra.mxu1 %v7513_v20  ;;  %4511 = vmatpush3.msra.mxu0 %v8979_v34 }
 0x46c   :  { %2496 = vmatprep.subr.mxu1 %v7520_v47  ;;  %4512 = vmatprep.subr.mxu0 %v8712_v54 }
 0x46d   :  { %2497 = vmatpush1.msra.mxu1 %v7527_v37  ;;  %4513 = vmatpush3.msra.mxu0 %v8982_v39  ;;  %v8994_v39 = vld [vmem:[#allocation46_spill] sm:$0xff] }
 0x46e   :  { %2498 = vmatprep.subr.mxu1 %v7534_v11  ;;  %4514 = vmatprep.subr.mxu0 %v8712_v54 }
 0x46f   :  { %2499 = vmatpush1.msra.mxu1 %v7541_v40  ;;  %4515 = vmatpush3.msra.mxu0 %v8985_v5 }
 0x470   :  { %2500 = vmatprep.subr.mxu1 %v7548_v42  ;;  %4516 = vmatprep.subr.mxu0 %v8712_v54 }
 0x471   :  { %2501 = vmatpush1.msra.mxu1 %v7555_v19  ;;  %4517 = vmatpush3.msra.mxu0 %v8988_v63 }
 0x472   :  { %2502 = vmatprep.subr.mxu1 %v7562_v4  ;;  %4518 = vmatprep.subr.mxu0 %v8712_v54  ;;  %v8996_v4 = vld [vmem:[#allocation48_spill] sm:$0xff] }
 0x473   :  { %2503 = vmatpush1.msra.mxu1 %v7569_v50  ;;  %2536 = vmatprep.mubr.f32.mxu1 %v8712_v54 }
 0x474   :  { %4519 = vmatpush3.msra.mxu0 %v8991_v8  ;;  %4520 = vmatprep.mubr.msk.f32.mxu0 %vm5166_vm0, %v8712_v54  ;;  %v8995_v8 = vld [vmem:[#allocation64_spill] sm:$0xff] }
 0x475   :  { %2613 = vmatprep.subr.mxu1 %v7579_v6  ;;  %4523 = vmatprep.subr.mxu0 %v8712_v54 }
 0x4f2   :  { %v2208_v21 = vpop.f32.mrf.mxu1  ;;  %v2279_v62 = vpop.f32.mrf.mxu0 }
 0x4f3   :  { %v2209_v23 = vadd.f32 %v2208_v21, %v8993_v13  ;;  %v8997_v21 = vld [vmem:[#allocation77_spill] sm:$0xff] }
 0x4f4   :  { %v2210_v48 = vpop.f32.mrf.mxu1  ;;  %v4452_v34 = vpop.f32.mrf.mxu0 }
 0x4f5   :  { %v2424_v5 = vadd.f32 %v2209_v23, %v8994_v39  ;;  %v2211_v50 = vadd.f32 %v2210_v48, %v8995_v8  ;;  %v8998_v34 = vld [vmem:[#allocation78_spill] sm:$0xff]  ;;  %v8999_v48 = vld [vmem:[#allocation45_spill] sm:$0xff] }
 0x4f6   :  { %v2280_v61 = vadd.f32 %v2279_v62, %v8998_v34 }
 0x4f7   :  { %v3795_v63 = vmul.f32 -1.442695, %v2424_v5  ;;  %v2431_v19 = vadd.f32 %v2211_v50, %v8996_v4 }
 0x4f9   :  { %4892 = vpow2.f32 %v3795_v63  ;;  %v3796_v42 = vmul.f32 -1.442695, %v2431_v19 }
 0x4fb   :  { %4894 = vpow2.f32 %v3796_v42 }
 0x506   :  { %v4893_v40 = vpop.eup %4892 }
 0x507   :  { %v2428_v6 = vadd.f32 1.0, %v4893_v40  ;;  %v9000_v40 = vld [vmem:[#allocation47_spill] sm:$0xff] }
 0x508   :  { %v4895_v11 = vpop.eup %4894 }
 0x509   :  { %4896 = vrcp.f32 %v2428_v6  ;;  %v2435_v37 = vadd.f32 1.0, %v4895_v11  ;;  %v9001_v11 = vld [vmem:[#allocation69_spill] sm:$0xff] }
 0x50b   :  { %4898 = vrcp.f32 %v2435_v37 }
 0x513   :  { %v2349_v47 = vpop.f32.mrf.mxu1  ;;  %v2420_v20 = vpop.f32.mrf.mxu0 }
 0x514   :  { %v2350_v13 = vadd.f32 %v2349_v47, %v8997_v21 }
 0x515   :  { %v2351_v23 = vpop.f32.mrf.mxu1  ;;  %v4487_v39 = vpop.f32.mrf.mxu0 }
 0x516   :  { %v4897_v5 = vpop.eup %4896  ;;  %v2445_v63 = vadd.f32 %v2350_v13, %v8999_v48  ;;  %v2352_v42 = vadd.f32 %v2351_v23, %v6313_v3  ;;  %v7601_v13 = vld [vmem:[%s8490_s4 + $0x2e8] sm:$0xff]  ;;  %v7643_v23 = vld [vmem:[%s8490_s4 + $0x2a0] sm:$0xff] }
 0x517   :  { %v2438_v8 = vmul.f32 %v4897_v5, %v2280_v61  ;;  %v2421_v5 = vadd.f32 %v2420_v20, %v6334_v16  ;;  %v7658_v48 = vld [vmem:[%s8490_s4 + $0x288] sm:$0xff] }
 0x518   :  { %v3797_v19 = vmul.f32 -1.442695, %v2445_v63  ;;  %v2452_v50 = vadd.f32 %v2352_v42, %v9001_v11  ;;  %v4899_v47 = vpop.eup %4898  ;;  %v7665_v63 = vld [vmem:[%s8490_s4 + $0x278] sm:$0xff]  ;;  %v7701_v11 = vld [vmem:[%s8490_s4 + $0x240] sm:$0xff] }
 0x519   :  { %v2439_v4 = vadd.f32 %v2438_v8, %v9000_v40  ;;  %v2441_v34 = vsub.f32 1.0, %v4899_v47  ;;  %v2443_v61 = vmul.f32 %v4899_v47, %v7273_v22  ;;  %v7608_v22 = vld [vmem:[%s8490_s4 + $0x2d8] sm:$0xff] }
 0x51a   :  { %4900 = vpow2.f32 %v3797_v19  ;;  %v3798_v6 = vmul.f32 -1.442695, %v2452_v50  ;;  %v7672_v19 = vld [vmem:[%s8490_s4 + $0x270] sm:$0xff]  ;;  %v9002_v42 = vld [vmem:[#allocation70_spill] sm:$0xff]  ;;  %v7715_v50 = vld [vmem:[%s8490_s4 + $0x228] sm:$0xff] }
 0x51b   :  { %4902 = vtanh.f32 %v2439_v4  ;;  %v7687_v4 = vld [vmem:[%s8490_s4 + $0x258] sm:$0xff] }
 0x51c   :  { %4904 = vpow2.f32 %v3798_v6  ;;  %v7729_v6 = vld [vmem:[%s8490_s4 + $0x210] sm:$0xff]  ;;  %v7743_v47 = vld [vmem:[%s8490_s4 + $0x1f8] sm:$0xff] }
 0x527   :  { %v4901_v62 = vpop.eup %4900 }
 0x528   :  { %v4903_v39 = vpop.eup %4902  ;;  %v2449_v21 = vadd.f32 1.0, %v4901_v62  ;;  %v7757_v62 = vld [vmem:[%s8490_s4 + $0x1e0] sm:$0xff] }
 0x529   :  { %v2442_v57 = vmul.f32 %v4903_v39, %v2441_v34  ;;  %v4905_v8 = vpop.eup %4904 }
 0x52a   :  { %4906 = vrcp.f32 %v2449_v21  ;;  %v7629_v21 = vld [vmem:[%s8490_s4 + $0x2b8] sm:$0xff]  ;;  %v2456_v34 = vadd.f32 1.0, %v4905_v8  ;;  %v7785_v8 = vld [vmem:[%s8490_s4 + $0x1b0] sm:$0xff] }
 0x52b   :  { %v7594_v37 = vadd.f32 %v2443_v61, %v2442_v57  ;;  %v7615_v57 = vld [vmem:[%s8490_s4 + $0x2d0] sm:$0xff]  ;;  %v7771_v61 = vld [vmem:[%s8490_s4 + $0x1c8] sm:$0xff]  ;;  %9004 = vst [vmem:[#allocation28_spill] sm:$0xff] %v7785_v8 }
 0x52c   :  { %4908 = vrcp.f32 %v2456_v34 }
 0x52d   :  { %2537 = vmatmul.mubr.f32.vlgmr.msra.gmra.mxu1 %v7594_v37  ;;  %4521 = vmatmul.mubr.f32.vlgmr.msra.gmra.mxu0 %v7594_v37 }
 0x52e   :  { %2614 = vmatpush1.msra.mxu1 %v7601_v13  ;;  %4524 = vmatpush3.msra.mxu0 %v7045_v7  ;;  %v7622_v7 = vld [vmem:[%s8490_s4 + $0x2c0] sm:$0xff] }
 0x52f   :  { %2615 = vmatprep.subr.mxu1 %v7608_v22  ;;  %4525 = vmatprep.subr.mxu0 %v8712_v54 }
 0x530   :  { %2616 = vmatpush1.msra.mxu1 %v7615_v57  ;;  %4526 = vmatpush3.msra.mxu0 %v7054_v25  ;;  %v7636_v25 = vld [vmem:[%s8490_s4 + $0x2a8] sm:$0xff] }
 0x531   :  { %2617 = vmatprep.subr.mxu1 %v7622_v7  ;;  %4527 = vmatprep.subr.mxu0 %v8712_v54 }
 0x532   :  { %2618 = vmatpush1.msra.mxu1 %v7629_v21  ;;  %4528 = vmatpush3.msra.mxu0 %v7063_v0  ;;  %v7650_v0 = vld [vmem:[%s8490_s4 + $0x290] sm:$0xff] }
 0x533   :  { %2619 = vmatprep.subr.mxu1 %v7636_v25  ;;  %4529 = vmatprep.subr.mxu0 %v8712_v54 }
 0x534   :  { %2620 = vmatpush1.msra.mxu1 %v7643_v23  ;;  %4530 = vmatpush3.msra.mxu0 %v7072_v12 }
 0x535   :  { %2621 = vmatprep.subr.mxu1 %v7650_v0  ;;  %4531 = vmatprep.subr.mxu0 %v8712_v54 }
 0x536   :  { %2622 = vmatpush1.msra.mxu1 %v7658_v48  ;;  %4532 = vmatpush3.msra.mxu0 %v7082_v58  ;;  %v7679_v58 = vld [vmem:[%s8490_s4 + $0x260] sm:$0xff] }
 0x537   :  { %v4907_v12 = vpop.eup %4906  ;;  %2623 = vmatprep.subr.mxu1 %v7665_v63  ;;  %4533 = vmatprep.subr.mxu0 %v8712_v54 }
 0x538   :  { %v2459_v20 = vmul.f32 %v4907_v12, %v2421_v5  ;;  %2624 = vmatpush1.msra.mxu1 %v7672_v19  ;;  %4534 = vmatpush3.msra.mxu0 %v7091_v18  ;;  %v7694_v18 = vld [vmem:[%s8490_s4 + $0x248] sm:$0xff]  ;;  %v7792_v5 = vld [vmem:[%s8490_s4 + $0x1a0] sm:$0xff]  ;;  %v7799_v12 = vld [vmem:[%s8490_s4 + $0x198] sm:$0xff] }
 0x539   :  { %2625 = vmatprep.subr.mxu1 %v7679_v58  ;;  %4535 = vmatprep.subr.mxu0 %v8712_v54  ;;  %v4909_v39 = vpop.eup %4908  ;;  %9005 = vst [vmem:[#allocation42_spill] sm:$0xff] %v7792_v5  ;;  %9006 = vst [vmem:[#allocation44_spill] sm:$0xff] %v7799_v12 }
 0x53a   :  { %v2460_v40 = vadd.f32 %v2459_v20, %v9002_v42  ;;  %2626 = vmatpush1.msra.mxu1 %v7687_v4  ;;  %4536 = vmatpush3.msra.mxu0 %v7101_v31  ;;  %v7708_v31 = vld [vmem:[%s8490_s4 + $0x230] sm:$0xff]  ;;  %v2462_v34 = vsub.f32 1.0, %v4909_v39  ;;  %v2464_v20 = vmul.f32 %v4909_v39, %v7342_v1  ;;  %v7807_v42 = vld [vmem:[%s8490_s4 + $0x188] sm:$0xff]  ;;  %v7831_v1 = vld [vmem:[%s8490_s4 + $0x178] sm:$0xff] }
 0x53b   :  { %2627 = vmatprep.subr.mxu1 %v7694_v18  ;;  %4537 = vmatprep.subr.mxu0 %v8712_v54  ;;  %9007 = vst [vmem:[#allocation49_spill] sm:$0xff] %v7807_v42  ;;  %v7849_v39 = vld [vmem:[%s8490_s4 + $0x148] sm:$0xff] }
 0x53c   :  { %4910 = vtanh.f32 %v2460_v40  ;;  %2628 = vmatpush1.msra.mxu1 %v7701_v11  ;;  %4538 = vmatpush3.msra.mxu0 %v7110_v56  ;;  %v7722_v56 = vld [vmem:[%s8490_s4 + $0x218] sm:$0xff]  ;;  %v7814_v40 = vld [vmem:[%s8490_s4 + $0x180] sm:$0xff]  ;;  %9009 = vst [vmem:[#allocation71_spill] sm:$0xff] %v7849_v39 }
 0x53d   :  { %2629 = vmatprep.subr.mxu1 %v7708_v31  ;;  %4539 = vmatprep.subr.mxu0 %v8712_v54  ;;  %9008 = vst [vmem:[#allocation43_spill] sm:$0xff] %v7814_v40 }
 0x53e   :  { %2630 = vmatpush1.msra.mxu1 %v7715_v50  ;;  %4540 = vmatpush3.msra.mxu0 %v7119_v14  ;;  %v7736_v14 = vld [vmem:[%s8490_s4 + $0x200] sm:$0xff] }
 0x53f   :  { %2631 = vmatprep.subr.mxu1 %v7722_v56  ;;  %4541 = vmatprep.subr.mxu0 %v8712_v54 }
 0x540   :  { %2632 = vmatpush1.msra.mxu1 %v7729_v6  ;;  %4542 = vmatpush3.msra.mxu0 %v7128_v55  ;;  %v7750_v55 = vld [vmem:[%s8490_s4 + $0x1e8] sm:$0xff] }
 0x541   :  { %2633 = vmatprep.subr.mxu1 %v7736_v14  ;;  %4543 = vmatprep.subr.mxu0 %v8712_v54 }
 0x542   :  { %2634 = vmatpush1.msra.mxu1 %v7743_v47  ;;  %4544 = vmatpush3.msra.mxu0 %v7137_v49  ;;  %v7764_v49 = vld [vmem:[%s8490_s4 + $0x1d0] sm:$0xff] }
 0x543   :  { %2635 = vmatprep.subr.mxu1 %v7750_v55  ;;  %4545 = vmatprep.subr.mxu0 %v8712_v54 }
 0x544   :  { %2636 = vmatpush1.msra.mxu1 %v7757_v62  ;;  %4546 = vmatpush3.msra.mxu0 %v7146_v28  ;;  %v7778_v28 = vld [vmem:[%s8490_s4 + $0x1b8] sm:$0xff] }
 0x545   :  { %2637 = vmatprep.subr.mxu1 %v7764_v49  ;;  %4547 = vmatprep.subr.mxu0 %v8712_v54  ;;  %9003 = vst [vmem:[#allocation25_spill] sm:$0xff] %v7778_v28 }
 0x546   :  { %2638 = vmatpush1.msra.mxu1 %v7771_v61  ;;  %4548 = vmatpush3.msra.mxu0 %v7155_v38 }
 0x547   :  { %2639 = vmatprep.subr.mxu1 %v7778_v28  ;;  %4549 = vmatprep.subr.mxu0 %v8712_v54 }
 0x548   :  { %2640 = vmatpush1.msra.mxu1 %v7785_v8  ;;  %4550 = vmatpush3.msra.mxu0 %v8940_v10 }
 0x549   :  { %v4911_v38 = vpop.eup %4910  ;;  %2641 = vmatprep.subr.mxu1 %v7792_v5  ;;  %4551 = vmatprep.subr.mxu0 %v8712_v54 }
 0x54a   :  { %2642 = vmatpush1.msra.mxu1 %v7799_v12  ;;  %4552 = vmatpush3.msra.mxu0 %v8943_v17  ;;  %v2463_v10 = vmul.f32 %v4911_v38, %v2462_v34  ;;  %v7858_v34 = vld [vmem:[%s8490_s4 + $0x130] sm:$0xff]  ;;  %v7867_v38 = vld [vmem:[%s8490_s4 + $0x118] sm:$0xff] }
 0x54b   :  { %2643 = vmatprep.subr.mxu1 %v7807_v42  ;;  %4553 = vmatprep.subr.mxu0 %v8712_v54  ;;  %9010 = vst [vmem:[#allocation72_spill] sm:$0xff] %v7858_v34  ;;  %9011 = vst [vmem:[#allocation31_spill] sm:$0xff] %v7867_v38 }
 0x54c   :  { %2644 = vmatpush1.msra.mxu1 %v7814_v40  ;;  %2677 = vmatprep.mubr.f32.mxu1 %v8712_v54  ;;  %v7818_v17 = vadd.f32 %v2464_v20, %v2463_v10  ;;  %v7876_v10 = vld [vmem:[%s8490_s4 + $0x100] sm:$0xff]  ;;  %v7885_v20 = vld [vmem:[%s8490_s4 + $0xe8] sm:$0xff] }
 0x54d   :  { %4554 = vmatpush3.msra.mxu0 %v8947_v43  ;;  %4555 = vmatprep.mubr.msk.f32.mxu0 %vm5166_vm0, %v8712_v54  ;;  %v7840_v43 = vld [vmem:[%s8490_s4 + $0x160] sm:$0xff]  ;;  %9012 = vst [vmem:[#allocation34_spill] sm:$0xff] %v7876_v10  ;;  %9013 = vst [vmem:[#allocation38_spill] sm:$0xff] %v7885_v20 }
 0x54e   :  { %2678 = vmatmul.mubr.f32.vlgmr.msra.gmra.mxu1 %v7818_v17  ;;  %4556 = vmatmul.mubr.f32.vlgmr.msra.gmra.mxu0 %v7818_v17 }
 0x54f   :  { %2802 = vmatprep.subr.mxu1 %v7352_v26  ;;  %4558 = vmatprep.subr.mxu0 %v8712_v54 }
 0x550   :  { %2803 = vmatpush1.msra.mxu1 %v7359_v45  ;;  %4559 = vmatpush3.msra.mxu0 %v7831_v1 }
 0x551   :  { %2804 = vmatprep.subr.mxu1 %v7366_v46  ;;  %4560 = vmatprep.subr.mxu0 %v8712_v54 }
 0x552   :  { %2805 = vmatpush1.msra.mxu1 %v7373_v36  ;;  %4561 = vmatpush3.msra.mxu0 %v7840_v43 }
 0x553   :  { %2806 = vmatprep.subr.mxu1 %v7380_v60  ;;  %4562 = vmatprep.subr.mxu0 %v8712_v54 }
 0x554   :  { %2807 = vmatpush1.msra.mxu1 %v7387_v33  ;;  %4563 = vmatpush3.msra.mxu0 %v7849_v39 }
 0x555   :  { %2808 = vmatprep.subr.mxu1 %v7394_v44  ;;  %4564 = vmatprep.subr.mxu0 %v8712_v54 }
 0x556   :  { %2809 = vmatpush1.msra.mxu1 %v7401_v51  ;;  %4565 = vmatpush3.msra.mxu0 %v7858_v34 }
 0x557   :  { %2810 = vmatprep.subr.mxu1 %v7408_v30  ;;  %4566 = vmatprep.subr.mxu0 %v8712_v54 }
 0x558   :  { %2811 = vmatpush1.msra.mxu1 %v7415_v2  ;;  %4567 = vmatpush3.msra.mxu0 %v7867_v38 }
 0x559   :  { %2812 = vmatprep.subr.mxu1 %v7422_v35  ;;  %4568 = vmatprep.subr.mxu0 %v8712_v54 }
 0x55a   :  { %2813 = vmatpush1.msra.mxu1 %v7429_v24  ;;  %4569 = vmatpush3.msra.mxu0 %v7876_v10  ;;  %v9037_v24 = vld [vmem:[#allocation64_spill] sm:$0xff] }
 0x55b   :  { %2814 = vmatprep.subr.mxu1 %v7436_v32  ;;  %4570 = vmatprep.subr.mxu0 %v8712_v54  ;;  %v7894_v32 = vld [vmem:[%s8490_s4 + $0xd0] sm:$0xff] }
 0x55c   :  { %2815 = vmatpush1.msra.mxu1 %v7443_v41  ;;  %4571 = vmatpush3.msra.mxu0 %v7885_v20  ;;  %9014 = vst [vmem:[#allocation36_spill] sm:$0xff] %v7894_v32  ;;  %v9036_v20 = vld [vmem:[#allocation50_spill] sm:$0xff] }
 0x55d   :  { %2816 = vmatprep.subr.mxu1 %v7450_v52  ;;  %4572 = vmatprep.subr.mxu0 %v8712_v54  ;;  %v7903_v52 = vld [vmem:[%s8490_s4 + $0xb8] sm:$0xff] }
 0x55e   :  { %2817 = vmatpush1.msra.mxu1 %v7457_v53  ;;  %4573 = vmatpush3.msra.mxu0 %v7894_v32  ;;  %9015 = vst [vmem:[#allocation57_spill] sm:$0xff] %v7903_v52 }
 0x55f   :  { %2818 = vmatprep.subr.mxu1 %v7464_v29  ;;  %4574 = vmatprep.subr.mxu0 %v8712_v54  ;;  %v7912_v29 = vld [vmem:[%s8490_s4 + $0xa0] sm:$0xff] }
 0x560   :  { %2819 = vmatpush1.msra.mxu1 %v7471_v27  ;;  %4575 = vmatpush3.msra.mxu0 %v7903_v52  ;;  %9016 = vst [vmem:[#allocation40_spill] sm:$0xff] %v7912_v29  ;;  %v9017_v27 = vld [vmem:[#allocation21_spill] sm:$0xff]  ;;  %v9020_v52 = vld [vmem:[#allocation24_spill] sm:$0xff] }
 0x561   :  { %2820 = vmatprep.subr.mxu1 %v7478_v15  ;;  %4576 = vmatprep.subr.mxu0 %v8712_v54  ;;  %v7921_v15 = vld [vmem:[%s8490_s4 + $0x88] sm:$0xff] }
 0x562   :  { %2821 = vmatpush1.msra.mxu1 %v7485_v59  ;;  %4577 = vmatpush3.msra.mxu0 %v7912_v29  ;;  %9018 = vst [vmem:[#allocation53_spill] sm:$0xff] %v7921_v15  ;;  %v9019_v59 = vld [vmem:[#allocation23_spill] sm:$0xff] }
 0x563   :  { %2822 = vmatprep.subr.mxu1 %v7492_v9  ;;  %4578 = vmatprep.subr.mxu0 %v8712_v54  ;;  %v7930_v9 = vld [vmem:[%s8490_s4 + $0x70] sm:$0xff]  ;;  %v9023_v29 = vld [vmem:[#allocation27_spill] sm:$0xff] }
 0x564   :  { %2823 = vmatpush1.msra.mxu1 %v9017_v27  ;;  %4579 = vmatpush3.msra.mxu0 %v7921_v15  ;;  %9021 = vst [vmem:[#allocation35_spill] sm:$0xff] %v7930_v9  ;;  %v9022_v27 = vld [vmem:[#allocation26_spill] sm:$0xff] }
 0x565   :  { %2824 = vmatprep.subr.mxu1 %v9019_v59  ;;  %4580 = vmatprep.subr.mxu0 %v8712_v54  ;;  %v7939_v59 = vld [vmem:[%s8490_s4 + $0x58] sm:$0xff] }
 0x566   :  { %2825 = vmatpush1.msra.mxu1 %v9020_v52  ;;  %4581 = vmatpush3.msra.mxu0 %v7930_v9  ;;  %9024 = vst [vmem:[#allocation75_spill] sm:$0xff] %v7939_v59  ;;  %v9025_v52 = vld [vmem:[#allocation29_spill] sm:$0xff]  ;;  %v9026_v15 = vld [vmem:[#allocation30_spill] sm:$0xff] }
 0x567   :  { %2826 = vmatprep.subr.mxu1 %v9022_v27  ;;  %4582 = vmatprep.subr.mxu0 %v8712_v54  ;;  %v7948_v27 = vld [vmem:[%s8490_s4 + $0x40] sm:$0xff]  ;;  %v9029_v9 = vld [vmem:[#allocation13_spill] sm:$0xff] }
 0x568   :  { %2827 = vmatpush1.msra.mxu1 %v9023_v29  ;;  %4583 = vmatpush3.msra.mxu0 %v7939_v59  ;;  %9027 = vst [vmem:[#allocation39_spill] sm:$0xff] %v7948_v27  ;;  %v9028_v29 = vld [vmem:[#allocation32_spill] sm:$0xff]  ;;  %v9032_v59 = vld [vmem:[#allocation19_spill] sm:$0xff] }
 0x569   :  { %2828 = vmatprep.subr.mxu1 %v9025_v52  ;;  %4584 = vmatprep.subr.mxu0 %v8712_v54  ;;  %v7957_v52 = vld [vmem:[%s8490_s4 + $0x28] sm:$0xff] }
 0x56a   :  { %2829 = vmatpush1.msra.mxu1 %v9026_v15  ;;  %4585 = vmatpush3.msra.mxu0 %v7948_v27  ;;  %9030 = vst [vmem:[#allocation76_spill] sm:$0xff] %v7957_v52  ;;  %v9031_v15 = vld [vmem:[#allocation16_spill] sm:$0xff] }
 0x56b   :  { %2830 = vmatprep.subr.mxu1 %v9028_v29  ;;  %4586 = vmatprep.subr.mxu0 %v8712_v54  ;;  %v7967_v29 = vld [vmem:[%s8490_s4 + $0x10] sm:$0xff]  ;;  %v9035_v27 = vld [vmem:[#allocation60_spill] sm:$0xff] }
 0x56c   :  { %2831 = vmatpush1.msra.mxu1 %v9029_v9  ;;  %4587 = vmatpush3.msra.mxu0 %v7957_v52  ;;  %9033 = vst [vmem:[#allocation79_spill] sm:$0xff] %v7967_v29  ;;  %v9034_v9 = vld [vmem:[#allocation22_spill] sm:$0xff] }
 0x56d   :  { %2832 = vmatprep.subr.mxu1 %v9031_v15  ;;  %4588 = vmatprep.subr.mxu0 %v8712_v54 }
 0x56e   :  { %2833 = vmatpush1.msra.mxu1 %v9032_v59  ;;  %2866 = vmatprep.mubr.f32.mxu1 %v8712_v54 }
 0x56f   :  { %4589 = vmatpush3.msra.mxu0 %v7967_v29  ;;  %4590 = vmatprep.mubr.msk.f32.mxu0 %vm5166_vm0, %v8712_v54  ;;  %v9038_v29 = vld [vmem:[#allocation52_spill] sm:$0xff] }
 0x570   :  { %2943 = vmatprep.subr.mxu1 %v9034_v9  ;;  %4593 = vmatprep.subr.mxu0 %v8712_v54 }
 0x5ed   :  { %v2538_v15 = vpop.f32.mrf.mxu1  ;;  %v2609_v52 = vpop.f32.mrf.mxu0 }
 0x5ee   :  { %v2539_v59 = vadd.f32 %v2538_v15, %v9035_v27  ;;  %v9039_v15 = vld [vmem:[#allocation77_spill] sm:$0xff] }
 0x5ef   :  { %v2540_v32 = vpop.f32.mrf.mxu1  ;;  %v4522_v53 = vpop.f32.mrf.mxu0 }
 0x5f0   :  { %v2754_v41 = vadd.f32 %v2539_v59, %v9036_v20  ;;  %v2541_v35 = vadd.f32 %v2540_v32, %v9037_v24  ;;  %v9040_v53 = vld [vmem:[#allocation78_spill] sm:$0xff]  ;;  %v9041_v32 = vld [vmem:[#allocation41_spill] sm:$0xff] }
 0x5f1   :  { %v2610_v33 = vadd.f32 %v2609_v52, %v9040_v53 }
 0x5f2   :  { %v3799_v10 = vmul.f32 -1.442695, %v2754_v41  ;;  %v2761_v38 = vadd.f32 %v2541_v35, %v9038_v29 }
 0x5f4   :  { %4912 = vpow2.f32 %v3799_v10  ;;  %v3800_v2 = vmul.f32 -1.442695, %v2761_v38 }
 0x5f6   :  { %4914 = vpow2.f32 %v3800_v2 }
 0x601   :  { %v4913_v30 = vpop.eup %4912 }
 0x602   :  { %v2758_v9 = vadd.f32 1.0, %v4913_v30  ;;  %v9042_v30 = vld [vmem:[#allocation51_spill] sm:$0xff] }
 0x603   :  { %v4915_v34 = vpop.eup %4914 }
 0x604   :  { %4916 = vrcp.f32 %v2758_v9  ;;  %v2765_v51 = vadd.f32 1.0, %v4915_v34  ;;  %v9043_v9 = vld [vmem:[#allocation67_spill] sm:$0xff] }
 0x606   :  { %4918 = vrcp.f32 %v2765_v51 }
 0x60e   :  { %v2679_v44 = vpop.f32.mrf.mxu1  ;;  %v2750_v39 = vpop.f32.mrf.mxu0 }
 0x60f   :  { %v2680_v27 = vadd.f32 %v2679_v44, %v9039_v15 }
 0x610   :  { %v2681_v59 = vpop.f32.mrf.mxu1  ;;  %v4557_v41 = vpop.f32.mrf.mxu0 }
 0x611   :  { %v4917_v20 = vpop.eup %4916  ;;  %v2775_v10 = vadd.f32 %v2680_v27, %v9041_v32  ;;  %v2682_v2 = vadd.f32 %v2681_v59, %v6313_v3  ;;  %v2751_v59 = vadd.f32 %v2750_v39, %v6334_v16  ;;  %v8039_v39 = vld [vmem:[%s8490_s4 + $0x280] sm:$0xff] }
 0x612   :  { %v2768_v24 = vmul.f32 %v4917_v20, %v2610_v33  ;;  %v8030_v20 = vld [vmem:[%s8490_s4 + $0x298] sm:$0xff] }
 0x613   :  { %v3801_v35 = vmul.f32 -1.442695, %v2775_v10  ;;  %v2782_v34 = vadd.f32 %v2682_v2, %v9043_v9  ;;  %v4919_v44 = vpop.eup %4918  ;;  %v8067_v9 = vld [vmem:[%s8490_s4 + $0x238] sm:$0xff] }
 0x614   :  { %v2769_v29 = vadd.f32 %v2768_v24, %v9042_v30  ;;  %v2771_v53 = vsub.f32 1.0, %v4919_v44  ;;  %v2773_v33 = vmul.f32 %v4919_v44, %v7594_v37  ;;  %v7993_v24 = vld [vmem:[%s8490_s4 + $0x2f8] sm:$0xff]  ;;  %v8011_v37 = vld [vmem:[%s8490_s4 + $0x2c8] sm:$0xff]  ;;  %v8094_v44 = vld [vmem:[%s8490_s4 + $0x1f0] sm:$0xff] }
 0x615   :  { %4920 = vpow2.f32 %v3801_v35  ;;  %v3802_v38 = vmul.f32 -1.442695, %v2782_v34  ;;  %v9044_v35 = vld [vmem:[#allocation68_spill] sm:$0xff]  ;;  %v8076_v34 = vld [vmem:[%s8490_s4 + $0x220] sm:$0xff] }
 0x616   :  { %4922 = vtanh.f32 %v2769_v29  ;;  %v8049_v30 = vld [vmem:[%s8490_s4 + $0x268] sm:$0xff]  ;;  %v8058_v29 = vld [vmem:[%s8490_s4 + $0x250] sm:$0xff] }
 0x617   :  { %4924 = vpow2.f32 %v3802_v38  ;;  %v8085_v38 = vld [vmem:[%s8490_s4 + $0x208] sm:$0xff] }
 0x622   :  { %v4921_v52 = vpop.eup %4920 }
 0x623   :  { %v4923_v41 = vpop.eup %4922  ;;  %v2779_v15 = vadd.f32 1.0, %v4921_v52 }
 0x624   :  { %v2772_v60 = vmul.f32 %v4923_v41, %v2771_v53  ;;  %v4925_v27 = vpop.eup %4924  ;;  %v8020_v53 = vld [vmem:[%s8490_s4 + $0x2b0] sm:$0xff]  ;;  %v8103_v41 = vld [vmem:[%s8490_s4 + $0x1d8] sm:$0xff] }
 0x625   :  { %4926 = vrcp.f32 %v2779_v15  ;;  %v2786_v15 = vadd.f32 1.0, %v4925_v27 }
 0x626   :  { %v7985_v51 = vadd.f32 %v2773_v33, %v2772_v60  ;;  %v8002_v60 = vld [vmem:[%s8490_s4 + $0x2e0] sm:$0xff] }
 0x627   :  { %4928 = vrcp.f32 %v2786_v15  ;;  %v8112_v33 = vld [vmem:[%s8490_s4 + $0x1c0] sm:$0xff] }
 0x628   :  { %2867 = vmatmul.mubr.f32.vlgmr.msra.gmra.mxu1 %v7985_v51  ;;  %4591 = vmatmul.mubr.f32.vlgmr.msra.gmra.mxu0 %v7985_v51  ;;  %9045 = vst [vmem:[#allocation80_spill] sm:$0xff] %v8112_v33 }
 0x629   :  { %2944 = vmatpush1.msra.mxu1 %v7601_v13  ;;  %4594 = vmatpush3.msra.mxu0 %v7993_v24 }
 0x62a   :  { %2945 = vmatprep.subr.mxu1 %v7608_v22  ;;  %4595 = vmatprep.subr.mxu0 %v8712_v54 }
 0x62b   :  { %2946 = vmatpush1.msra.mxu1 %v7615_v57  ;;  %4596 = vmatpush3.msra.mxu0 %v8002_v60 }
 0x62c   :  { %2947 = vmatprep.subr.mxu1 %v7622_v7  ;;  %4597 = vmatprep.subr.mxu0 %v8712_v54 }
 0x62d   :  { %2948 = vmatpush1.msra.mxu1 %v7629_v21  ;;  %4598 = vmatpush3.msra.mxu0 %v8011_v37 }
 0x62e   :  { %2949 = vmatprep.subr.mxu1 %v7636_v25  ;;  %4599 = vmatprep.subr.mxu0 %v8712_v54 }
 0x62f   :  { %2950 = vmatpush1.msra.mxu1 %v7643_v23  ;;  %4600 = vmatpush3.msra.mxu0 %v8020_v53 }
 0x630   :  { %2951 = vmatprep.subr.mxu1 %v7650_v0  ;;  %4601 = vmatprep.subr.mxu0 %v8712_v54 }
 0x631   :  { %2952 = vmatpush1.msra.mxu1 %v7658_v48  ;;  %4602 = vmatpush3.msra.mxu0 %v8030_v20 }
 0x632   :  { %v4927_v32 = vpop.eup %4926  ;;  %2953 = vmatprep.subr.mxu1 %v7665_v63  ;;  %4603 = vmatprep.subr.mxu0 %v8712_v54 }
 0x633   :  { %v2789_v10 = vmul.f32 %v4927_v32, %v2751_v59  ;;  %2954 = vmatpush1.msra.mxu1 %v7672_v19  ;;  %4604 = vmatpush3.msra.mxu0 %v8039_v39  ;;  %v8121_v59 = vld [vmem:[%s8490_s4 + $0x1a8] sm:$0xff] }
 0x634   :  { %2955 = vmatprep.subr.mxu1 %v7679_v58  ;;  %4605 = vmatprep.subr.mxu0 %v8712_v54  ;;  %v4929_v52 = vpop.eup %4928  ;;  %9046 = vst [vmem:[#allocation81_spill] sm:$0xff] %v8121_v59 }
 0x635   :  { %v2790_v2 = vadd.f32 %v2789_v10, %v9044_v35  ;;  %2956 = vmatpush1.msra.mxu1 %v7687_v4  ;;  %4606 = vmatpush3.msra.mxu0 %v8049_v30  ;;  %v2792_v27 = vsub.f32 1.0, %v4929_v52  ;;  %v2794_v10 = vmul.f32 %v4929_v52, %v7818_v17  ;;  %v9049_v17 = vld [vmem:[#allocation73_spill] sm:$0xff]  ;;  %v9050_v52 = vld [vmem:[#allocation74_spill] sm:$0xff] }
 0x636   :  { %2957 = vmatprep.subr.mxu1 %v7694_v18  ;;  %4607 = vmatprep.subr.mxu0 %v8712_v54 }
 0x637   :  { %4930 = vtanh.f32 %v2790_v2  ;;  %2958 = vmatpush1.msra.mxu1 %v7701_v11  ;;  %4608 = vmatpush3.msra.mxu0 %v8058_v29  ;;  %v8134_v2 = vld [vmem:[%s8490_s4 + $0x190] sm:$0xff] }
 0x638   :  { %2959 = vmatprep.subr.mxu1 %v7708_v31  ;;  %4609 = vmatprep.subr.mxu0 %v8712_v54  ;;  %9048 = vst [vmem:[#allocation83_spill] sm:$0xff] %v8134_v2 }
 0x639   :  { %2960 = vmatpush1.msra.mxu1 %v7715_v50  ;;  %4610 = vmatpush3.msra.mxu0 %v8067_v9 }
 0x63a   :  { %2961 = vmatprep.subr.mxu1 %v7722_v56  ;;  %4611 = vmatprep.subr.mxu0 %v8712_v54 }
 0x63b   :  { %2962 = vmatpush1.msra.mxu1 %v7729_v6  ;;  %4612 = vmatpush3.msra.mxu0 %v8076_v34 }
 0x63c   :  { %2963 = vmatprep.subr.mxu1 %v7736_v14  ;;  %4613 = vmatprep.subr.mxu0 %v8712_v54 }
 0x63d   :  { %2964 = vmatpush1.msra.mxu1 %v7743_v47  ;;  %4614 = vmatpush3.msra.mxu0 %v8085_v38 }
 0x63e   :  { %2965 = vmatprep.subr.mxu1 %v7750_v55  ;;  %4615 = vmatprep.subr.mxu0 %v8712_v54 }
 0x63f   :  { %2966 = vmatpush1.msra.mxu1 %v7757_v62  ;;  %4616 = vmatpush3.msra.mxu0 %v8094_v44 }
 0x640   :  { %2967 = vmatprep.subr.mxu1 %v7764_v49  ;;  %4617 = vmatprep.subr.mxu0 %v8712_v54 }
 0x641   :  { %2968 = vmatpush1.msra.mxu1 %v7771_v61  ;;  %4618 = vmatpush3.msra.mxu0 %v8103_v41 }
 0x642   :  { %2969 = vmatprep.subr.mxu1 %v7778_v28  ;;  %4619 = vmatprep.subr.mxu0 %v8712_v54 }
 0x643   :  { %2970 = vmatpush1.msra.mxu1 %v7785_v8  ;;  %4620 = vmatpush3.msra.mxu0 %v8112_v33 }
 0x644   :  { %v4931_v15 = vpop.eup %4930  ;;  %2971 = vmatprep.subr.mxu1 %v7792_v5  ;;  %4621 = vmatprep.subr.mxu0 %v8712_v54 }
 0x645   :  { %2972 = vmatpush1.msra.mxu1 %v7799_v12  ;;  %4622 = vmatpush3.msra.mxu0 %v8121_v59  ;;  %v2793_v32 = vmul.f32 %v4931_v15, %v2792_v27  ;;  %v9052_v27 = vld [vmem:[#allocation3_spill] sm:$0xff] }
 0x646   :  { %2973 = vmatprep.subr.mxu1 %v7807_v42  ;;  %4623 = vmatprep.subr.mxu0 %v8712_v54  ;;  %v9058_v15 = vld [vmem:[#allocation7_spill] sm:$0xff] }
 0x647   :  { %2974 = vmatpush1.msra.mxu1 %v7814_v40  ;;  %3007 = vmatprep.mubr.f32.mxu1 %v8712_v54  ;;  %v8129_v35 = vadd.f32 %v2794_v10, %v2793_v32  ;;  %v9059_v32 = vld [vmem:[#allocation8_spill] sm:$0xff]  ;;  %v9060_v10 = vld [vmem:[#allocation34_spill] sm:$0xff] }
 0x648   :  { %4624 = vmatpush3.msra.mxu0 %v8134_v2  ;;  %4625 = vmatprep.mubr.msk.f32.mxu0 %vm5166_vm0, %v8712_v54 }
 0x649   :  { %9047 = vst [vmem:[#allocation82_spill] sm:$0xff] %v8129_v35  ;;  %3008 = vmatmul.mubr.f32.vlgmr.msra.gmra.mxu1 %v8129_v35  ;;  %4626 = vmatmul.mubr.f32.vlgmr.msra.gmra.mxu0 %v8129_v35 }
 0x64a   :  { %3132 = vmatprep.subr.mxu1 %v7352_v26  ;;  %4628 = vmatprep.subr.mxu0 %v8712_v54  ;;  %v9051_v26 = vld [vmem:[#allocation71_spill] sm:$0xff] }
 0x64b   :  { %3133 = vmatpush1.msra.mxu1 %v7359_v45  ;;  %4629 = vmatpush3.msra.mxu0 %v7831_v1  ;;  %v9053_v45 = vld [vmem:[#allocation4_spill] sm:$0xff]  ;;  %v9055_v1 = vld [vmem:[#allocation5_spill] sm:$0xff] }
 0x64c   :  { %3134 = vmatprep.subr.mxu1 %v7366_v46  ;;  %4630 = vmatprep.subr.mxu0 %v8712_v54  ;;  %v9054_v46 = vld [vmem:[#allocation72_spill] sm:$0xff] }
 0x64d   :  { %3135 = vmatpush1.msra.mxu1 %v7373_v36  ;;  %4631 = vmatpush3.msra.mxu0 %v7840_v43  ;;  %v9056_v36 = vld [vmem:[#allocation6_spill] sm:$0xff]  ;;  %v9057_v43 = vld [vmem:[#allocation31_spill] sm:$0xff] }
 0x64e   :  { %3136 = vmatprep.subr.mxu1 %v9049_v17  ;;  %4632 = vmatprep.subr.mxu0 %v8712_v54  ;;  %v9061_v17 = vld [vmem:[#allocation9_spill] sm:$0xff] }
 0x64f   :  { %3137 = vmatpush1.msra.mxu1 %v9050_v52  ;;  %4633 = vmatpush3.msra.mxu0 %v9051_v26  ;;  %v9062_v52 = vld [vmem:[#allocation10_spill] sm:$0xff] }
 0x650   :  { %3138 = vmatprep.subr.mxu1 %v9052_v27  ;;  %4634 = vmatprep.subr.mxu0 %v8712_v54  ;;  %v9063_v26 = vld [vmem:[#allocation38_spill] sm:$0xff]  ;;  %v9064_v27 = vld [vmem:[#allocation11_spill] sm:$0xff] }
 0x651   :  { %3139 = vmatpush1.msra.mxu1 %v9053_v45  ;;  %4635 = vmatpush3.msra.mxu0 %v9054_v46  ;;  %v9065_v45 = vld [vmem:[#allocation12_spill] sm:$0xff] }
 0x652   :  { %3140 = vmatprep.subr.mxu1 %v9055_v1  ;;  %4636 = vmatprep.subr.mxu0 %v8712_v54  ;;  %v9066_v46 = vld [vmem:[#allocation36_spill] sm:$0xff]  ;;  %v9067_v1 = vld [vmem:[#allocation14_spill] sm:$0xff] }
 0x653   :  { %3141 = vmatpush1.msra.mxu1 %v9056_v36  ;;  %4637 = vmatpush3.msra.mxu0 %v9057_v43  ;;  %v9068_v36 = vld [vmem:[#allocation15_spill] sm:$0xff]  ;;  %v9069_v43 = vld [vmem:[#allocation57_spill] sm:$0xff] }
 0x654   :  { %3142 = vmatprep.subr.mxu1 %v9058_v15  ;;  %4638 = vmatprep.subr.mxu0 %v8712_v54  ;;  %v9070_v15 = vld [vmem:[#allocation17_spill] sm:$0xff] }
 0x655   :  { %3143 = vmatpush1.msra.mxu1 %v9059_v32  ;;  %4639 = vmatpush3.msra.mxu0 %v9060_v10  ;;  %v9071_v32 = vld [vmem:[#allocation18_spill] sm:$0xff]  ;;  %v9072_v10 = vld [vmem:[#allocation40_spill] sm:$0xff] }
 0x656   :  { %3144 = vmatprep.subr.mxu1 %v9061_v17  ;;  %4640 = vmatprep.subr.mxu0 %v8712_v54  ;;  %v9073_v17 = vld [vmem:[#allocation20_spill] sm:$0xff] }
 0x657   :  { %3145 = vmatpush1.msra.mxu1 %v9062_v52  ;;  %4641 = vmatpush3.msra.mxu0 %v9063_v26  ;;  %v9074_v52 = vld [vmem:[#allocation21_spill] sm:$0xff] }
 0x658   :  { %3146 = vmatprep.subr.mxu1 %v9064_v27  ;;  %4642 = vmatprep.subr.mxu0 %v8712_v54  ;;  %v9075_v26 = vld [vmem:[#allocation53_spill] sm:$0xff]  ;;  %v9076_v27 = vld [vmem:[#allocation23_spill] sm:$0xff] }
 0x659   :  { %3147 = vmatpush1.msra.mxu1 %v9065_v45  ;;  %4643 = vmatpush3.msra.mxu0 %v9066_v46  ;;  %v9077_v45 = vld [vmem:[#allocation24_spill] sm:$0xff]  ;;  %v9078_v46 = vld [vmem:[#allocation35_spill] sm:$0xff] }
 0x65a   :  { %3148 = vmatprep.subr.mxu1 %v9067_v1  ;;  %4644 = vmatprep.subr.mxu0 %v8712_v54  ;;  %v9079_v1 = vld [vmem:[#allocation26_spill] sm:$0xff] }
 0x65b   :  { %3149 = vmatpush1.msra.mxu1 %v9068_v36  ;;  %4645 = vmatpush3.msra.mxu0 %v9069_v43  ;;  %v9080_v36 = vld [vmem:[#allocation27_spill] sm:$0xff] }
 0x65c   :  { %3150 = vmatprep.subr.mxu1 %v9070_v15  ;;  %4646 = vmatprep.subr.mxu0 %v8712_v54  ;;  %v9081_v43 = vld [vmem:[#allocation75_spill] sm:$0xff]  ;;  %v9082_v15 = vld [vmem:[#allocation29_spill] sm:$0xff] }
 0x65d   :  { %3151 = vmatpush1.msra.mxu1 %v9071_v32  ;;  %4647 = vmatpush3.msra.mxu0 %v9072_v10  ;;  %v9083_v32 = vld [vmem:[#allocation30_spill] sm:$0xff]  ;;  %v9084_v10 = vld [vmem:[#allocation39_spill] sm:$0xff] }
 0x65e   :  { %3152 = vmatprep.subr.mxu1 %v9073_v17  ;;  %4648 = vmatprep.subr.mxu0 %v8712_v54  ;;  %v9085_v17 = vld [vmem:[#allocation32_spill] sm:$0xff] }
 0x65f   :  { %3153 = vmatpush1.msra.mxu1 %v9074_v52  ;;  %4649 = vmatpush3.msra.mxu0 %v9075_v26  ;;  %v9086_v52 = vld [vmem:[#allocation13_spill] sm:$0xff]  ;;  %v9087_v26 = vld [vmem:[#allocation76_spill] sm:$0xff] }
 0x660   :  { %3154 = vmatprep.subr.mxu1 %v9076_v27  ;;  %4650 = vmatprep.subr.mxu0 %v8712_v54  ;;  %v9088_v27 = vld [vmem:[#allocation16_spill] sm:$0xff] }
 0x661   :  { %3155 = vmatpush1.msra.mxu1 %v9077_v45  ;;  %4651 = vmatpush3.msra.mxu0 %v9078_v46  ;;  %v9089_v45 = vld [vmem:[#allocation19_spill] sm:$0xff] }
 0x662   :  { %3156 = vmatprep.subr.mxu1 %v9079_v1  ;;  %4652 = vmatprep.subr.mxu0 %v8712_v54  ;;  %v9090_v46 = vld [vmem:[#allocation79_spill] sm:$0xff]  ;;  %v9091_v1 = vld [vmem:[#allocation22_spill] sm:$0xff] }
 0x663   :  { %3157 = vmatpush1.msra.mxu1 %v9080_v36  ;;  %4653 = vmatpush3.msra.mxu0 %v9081_v43 }
 0x664   :  { %3158 = vmatprep.subr.mxu1 %v9082_v15  ;;  %4654 = vmatprep.subr.mxu0 %v8712_v54  ;;  %v9092_v15 = vld [vmem:[#allocation60_spill] sm:$0xff] }
 0x665   :  { %3159 = vmatpush1.msra.mxu1 %v9083_v32  ;;  %4655 = vmatpush3.msra.mxu0 %v9084_v10 }
 0x666   :  { %3160 = vmatprep.subr.mxu1 %v9085_v17  ;;  %4656 = vmatprep.subr.mxu0 %v8712_v54 }
 0x667   :  { %3161 = vmatpush1.msra.mxu1 %v9086_v52  ;;  %4657 = vmatpush3.msra.mxu0 %v9087_v26  ;;  %v9093_v52 = vld [vmem:[#allocation54_spill] sm:$0xff] }
 0x668   :  { %3162 = vmatprep.subr.mxu1 %v9088_v27  ;;  %4658 = vmatprep.subr.mxu0 %v8712_v54 }
 0x669   :  { %3163 = vmatpush1.msra.mxu1 %v9089_v45  ;;  %3196 = vmatprep.mubr.f32.mxu1 %v8712_v54  ;;  %v9094_v45 = vld [vmem:[#allocation64_spill] sm:$0xff] }
 0x66a   :  { %4659 = vmatpush3.msra.mxu0 %v9090_v46  ;;  %4660 = vmatprep.mubr.msk.f32.mxu0 %vm5166_vm0, %v8712_v54  ;;  %v9095_v46 = vld [vmem:[#allocation56_spill] sm:$0xff] }
 0x66b   :  { %3273 = vmatprep.subr.mxu1 %v9091_v1  ;;  %4663 = vmatprep.subr.mxu0 %v8712_v54 }
 0x6e8   :  { %v2868_v36 = vpop.f32.mrf.mxu1  ;;  %v2939_v43 = vpop.f32.mrf.mxu0 }
 0x6e9   :  { %v2869_v32 = vadd.f32 %v2868_v36, %v9092_v15  ;;  %v9096_v36 = vld [vmem:[#allocation77_spill] sm:$0xff] }
 0x6ea   :  { %v2870_v10 = vpop.f32.mrf.mxu1  ;;  %v4592_v17 = vpop.f32.mrf.mxu0 }
 0x6eb   :  { %v3084_v26 = vadd.f32 %v2869_v32, %v9093_v52  ;;  %v2871_v2 = vadd.f32 %v2870_v10, %v9094_v45  ;;  %v9097_v17 = vld [vmem:[#allocation78_spill] sm:$0xff]  ;;  %v9098_v10 = vld [vmem:[#allocation37_spill] sm:$0xff] }
 0x6ec   :  { %v2940_v8 = vadd.f32 %v2939_v43, %v9097_v17 }
 0x6ed   :  { %v3803_v27 = vmul.f32 -1.442695, %v3084_v26  ;;  %v3091_v40 = vadd.f32 %v2871_v2, %v9095_v46 }
 0x6ef   :  { %4932 = vpow2.f32 %v3803_v27  ;;  %v3804_v42 = vmul.f32 -1.442695, %v3091_v40 }
 0x6f1   :  { %4934 = vpow2.f32 %v3804_v42 }
 0x6fc   :  { %v4933_v35 = vpop.eup %4932 }
 0x6fd   :  { %v3088_v1 = vadd.f32 1.0, %v4933_v35  ;;  %v9099_v35 = vld [vmem:[#allocation55_spill] sm:$0xff] }
 0x6fe   :  { %v4935_v59 = vpop.eup %4934 }
 0x6ff   :  { %4936 = vrcp.f32 %v3088_v1  ;;  %v3095_v12 = vadd.f32 1.0, %v4935_v59  ;;  %v9100_v59 = vld [vmem:[#allocation65_spill] sm:$0xff] }
 0x701   :  { %4938 = vrcp.f32 %v3095_v12 }
 0x709   :  { %v3009_v5 = vpop.f32.mrf.mxu1  ;;  %v3080_v33 = vpop.f32.mrf.mxu0 }
 0x70a   :  { %v3010_v15 = vadd.f32 %v3009_v5, %v9096_v36 }
 0x70b   :  { %v3011_v32 = vpop.f32.mrf.mxu1  ;;  %v4627_v52 = vpop.f32.mrf.mxu0 }
 0x70c   :  { %v4937_v26 = vpop.eup %4936  ;;  %v3105_v27 = vadd.f32 %v3010_v15, %v9098_v10  ;;  %v3012_v42 = vadd.f32 %v3011_v32, %v6313_v3  ;;  %v3481_v15 = vld [vmem:[%s8494_s6 + $0xb0] sm:$0xff]  ;;  %v3479_v32 = vld [vmem:[%s8494_s6 + $0xa0] sm:$0xff]  ;;  %v3478_v10 = vld [vmem:[%s8494_s6 + $0x98] sm:$0xff] }
 0x70d   :  { %v3098_v45 = vmul.f32 %v4937_v26, %v2940_v8  ;;  %v3463_v26 = vld [vmem:[%s8494_s6 + $0x20] sm:$0xff] }
 0x70e   :  { %v3805_v40 = vmul.f32 -1.442695, %v3105_v27  ;;  %v3112_v46 = vadd.f32 %v3012_v42, %v9100_v59  ;;  %v4939_v5 = vpop.eup %4938  ;;  %v3462_v27 = vld [vmem:[%s8494_s6 + $0x18] sm:$0xff]  ;;  %v3461_v42 = vld [vmem:[%s8494_s6 + $0x10] sm:$0xff]  ;;  %v3475_v59 = vld [vmem:[%s8494_s6 + $0x80] sm:$0xff] }
 0x70f   :  { %v3099_v2 = vadd.f32 %v3098_v45, %v9099_v35  ;;  %v3101_v17 = vsub.f32 1.0, %v4939_v5  ;;  %v3103_v8 = vmul.f32 %v4939_v5, %v7985_v51  ;;  %v3465_v45 = vld [vmem:[%s8494_s6 + $0x30] sm:$0xff]  ;;  %v3476_v35 = vld [vmem:[%s8494_s6 + $0x88] sm:$0xff] }
 0x710   :  { %4940 = vpow2.f32 %v3805_v40  ;;  %v3806_v1 = vmul.f32 -1.442695, %v3112_v46  ;;  %v3477_v40 = vld [vmem:[%s8494_s6 + $0x90] sm:$0xff]  ;;  %v3459_v46 = vld [vmem:[%s8494_s6] sm:$0xff] }
 0x711   :  { %4942 = vtanh.f32 %v3099_v2  ;;  %v3460_v2 = vld [vmem:[%s8494_s6 + $0x8] sm:$0xff]  ;;  %v3582_v5 = vld [vmem:[%s8495_s8 + $0x70] sm:$0xff] }
 0x712   :  { %4944 = vpow2.f32 %v3806_v1  ;;  %v3583_v1 = vld [vmem:[%s8495_s8 + $0x78] sm:$0xff] }
 0x71d   :  { %v4941_v43 = vpop.eup %4940 }
 0x71e   :  { %v4943_v52 = vpop.eup %4942  ;;  %v3109_v36 = vadd.f32 1.0, %v4941_v43  ;;  %v3581_v43 = vld [vmem:[%s8495_s8 + $0x68] sm:$0xff] }
 0x71f   :  { %v3102_v28 = vmul.f32 %v4943_v52, %v3101_v17  ;;  %v4945_v51 = vpop.eup %4944  ;;  %v3464_v17 = vld [vmem:[%s8494_s6 + $0x28] sm:$0xff]  ;;  %v3580_v52 = vld [vmem:[%s8495_s8 + $0x60] sm:$0xff] }
 0x720   :  { %4946 = vrcp.f32 %v3109_v36  ;;  %v3480_v36 = vld [vmem:[%s8494_s6 + $0xa8] sm:$0xff] }
 0x721   :  { %v8221_v12 = vadd.f32 %v3103_v8, %v3102_v28  ;;  %v3473_v28 = vld [vmem:[%s8494_s6 + $0x70] sm:$0xff]  ;;  %v3579_v8 = vld [vmem:[%s8495_s8 + $0x58] sm:$0xff] }
 0x723   :  { %3197 = vmatmul.mubr.f32.vlgmr.msra.gmra.mxu1 %v8221_v12  ;;  %4661 = vmatmul.mubr.f32.vlgmr.msra.gmra.mxu0 %v8221_v12 }
 0x724   :  { %3274 = vmatpush1.msra.mxu1 %v7601_v13  ;;  %4664 = vmatpush3.msra.mxu0 %v7993_v24  ;;  %v3116_v13 = vadd.f32 1.0, %v4945_v51  ;;  %v3488_v24 = vld [vmem:[%s8494_s6 + $0xe8] sm:$0xff]  ;;  %v3578_v51 = vld [vmem:[%s8495_s8 + $0x50] sm:$0xff] }
 0x725   :  { %3275 = vmatprep.subr.mxu1 %v7608_v22  ;;  %4665 = vmatprep.subr.mxu0 %v8712_v54  ;;  %v3081_v22 = vadd.f32 %v3080_v33, %v6334_v16  ;;  %v3466_v33 = vld [vmem:[%s8494_s6 + $0x38] sm:$0xff] }
 0x726   :  { %3276 = vmatpush1.msra.mxu1 %v7615_v57  ;;  %4666 = vmatpush3.msra.mxu0 %v8002_v60  ;;  %4948 = vrcp.f32 %v3116_v13  ;;  %v3472_v60 = vld [vmem:[%s8494_s6 + $0x68] sm:$0xff] }
 0x727   :  { %3277 = vmatprep.subr.mxu1 %v7622_v7  ;;  %4667 = vmatprep.subr.mxu0 %v8712_v54  ;;  %v3577_v13 = vld [vmem:[%s8495_s8 + $0x48] sm:$0xff] }
 0x728   :  { %3278 = vmatpush1.msra.mxu1 %v7629_v21  ;;  %4668 = vmatpush3.msra.mxu0 %v8011_v37  ;;  %v9101_v21 = vld [vmem:[#allocation66_spill] sm:$0xff]  ;;  %v3487_v37 = vld [vmem:[%s8494_s6 + $0xe0] sm:$0xff] }
 0x729   :  { %3279 = vmatprep.subr.mxu1 %v7636_v25  ;;  %4669 = vmatprep.subr.mxu0 %v8712_v54 }
 0x72a   :  { %3280 = vmatpush1.msra.mxu1 %v7643_v23  ;;  %4670 = vmatpush3.msra.mxu0 %v8020_v53  ;;  %v3471_v53 = vld [vmem:[%s8494_s6 + $0x60] sm:$0xff] }
 0x72b   :  { %3281 = vmatprep.subr.mxu1 %v7650_v0  ;;  %4671 = vmatprep.subr.mxu0 %v8712_v54  ;;  %v9102_v0 = vld [vmem:[#allocation25_spill] sm:$0xff] }
 0x72c   :  { %3282 = vmatpush1.msra.mxu1 %v7658_v48  ;;  %4672 = vmatpush3.msra.mxu0 %v8030_v20  ;;  %v9103_v48 = vld [vmem:[#allocation28_spill] sm:$0xff]  ;;  %v3486_v20 = vld [vmem:[%s8494_s6 + $0xd8] sm:$0xff] }
 0x72d   :  { %v4947_v57 = vpop.eup %4946  ;;  %3283 = vmatprep.subr.mxu1 %v7665_v63  ;;  %4673 = vmatprep.subr.mxu0 %v8712_v54  ;;  %v9104_v63 = vld [vmem:[#allocation80_spill] sm:$0xff] }
 0x72e   :  { %v3119_v7 = vmul.f32 %v4947_v57, %v3081_v22  ;;  %3284 = vmatpush1.msra.mxu1 %v7672_v19  ;;  %4674 = vmatpush3.msra.mxu0 %v8039_v39  ;;  %v3470_v39 = vld [vmem:[%s8494_s6 + $0x58] sm:$0xff]  ;;  %v3576_v22 = vld [vmem:[%s8495_s8 + $0x40] sm:$0xff] }
 0x72f   :  { %3285 = vmatprep.subr.mxu1 %v7679_v58  ;;  %4675 = vmatprep.subr.mxu0 %v8712_v54  ;;  %v3575_v57 = vld [vmem:[%s8495_s8 + $0x38] sm:$0xff] }
 0x730   :  { %v3120_v25 = vadd.f32 %v3119_v7, %v9101_v21  ;;  %3286 = vmatpush1.msra.mxu1 %v7687_v4  ;;  %4676 = vmatpush3.msra.mxu0 %v8049_v30  ;;  %v9105_v4 = vld [vmem:[#allocation42_spill] sm:$0xff]  ;;  %v3485_v30 = vld [vmem:[%s8494_s6 + $0xd0] sm:$0xff]  ;;  %v3573_v21 = vld [vmem:[%s8495_s8 + $0x28] sm:$0xff] }
 0x731   :  { %3287 = vmatprep.subr.mxu1 %v7694_v18  ;;  %4677 = vmatprep.subr.mxu0 %v8712_v54  ;;  %v9106_v18 = vld [vmem:[#allocation44_spill] sm:$0xff]  ;;  %v3574_v7 = vld [vmem:[%s8495_s8 + $0x30] sm:$0xff] }
 0x732   :  { %4950 = vtanh.f32 %v3120_v25  ;;  %3288 = vmatpush1.msra.mxu1 %v7701_v11  ;;  %4678 = vmatpush3.msra.mxu0 %v8058_v29  ;;  %v9107_v11 = vld [vmem:[#allocation81_spill] sm:$0xff]  ;;  %v3572_v25 = vld [vmem:[%s8495_s8 + $0x20] sm:$0xff] }
 0x733   :  { %3289 = vmatprep.subr.mxu1 %v7708_v31  ;;  %4679 = vmatprep.subr.mxu0 %v8712_v54  ;;  %v4949_v23 = vpop.eup %4948  ;;  %v3469_v29 = vld [vmem:[%s8494_s6 + $0x50] sm:$0xff] }
 0x734   :  { %3290 = vmatpush1.msra.mxu1 %v7715_v50  ;;  %4680 = vmatpush3.msra.mxu0 %v8067_v9  ;;  %v3122_v19 = vsub.f32 1.0, %v4949_v23  ;;  %v9108_v50 = vld [vmem:[#allocation82_spill] sm:$0xff]  ;;  %v3484_v9 = vld [vmem:[%s8494_s6 + $0xc8] sm:$0xff] }
 0x735   :  { %3291 = vmatprep.subr.mxu1 %v7722_v56  ;;  %4681 = vmatprep.subr.mxu0 %v8712_v54  ;;  %v3124_v56 = vmul.f32 %v4949_v23, %v9108_v50 }
 0x736   :  { %3292 = vmatpush1.msra.mxu1 %v7729_v6  ;;  %4682 = vmatpush3.msra.mxu0 %v8076_v34  ;;  %v9109_v6 = vld [vmem:[#allocation49_spill] sm:$0xff]  ;;  %v3468_v34 = vld [vmem:[%s8494_s6 + $0x48] sm:$0xff] }
 0x737   :  { %3293 = vmatprep.subr.mxu1 %v7736_v14  ;;  %4683 = vmatprep.subr.mxu0 %v8712_v54  ;;  %v9110_v14 = vld [vmem:[#allocation43_spill] sm:$0xff] }
 0x738   :  { %3294 = vmatpush1.msra.mxu1 %v7743_v47  ;;  %4684 = vmatpush3.msra.mxu0 %v8085_v38  ;;  %v3483_v38 = vld [vmem:[%s8494_s6 + $0xc0] sm:$0xff] }
 0x739   :  { %3295 = vmatprep.subr.mxu1 %v7750_v55  ;;  %4685 = vmatprep.subr.mxu0 %v8712_v54  ;;  %v9111_v55 = vld [vmem:[#allocation83_spill] sm:$0xff] }
 0x73a   :  { %3296 = vmatpush1.msra.mxu1 %v7757_v62  ;;  %4686 = vmatpush3.msra.mxu0 %v8094_v44  ;;  %v3490_v62 = vld [vmem:[%s8494_s6 + $0xf8] sm:$0xff]  ;;  %v3467_v44 = vld [vmem:[%s8494_s6 + $0x40] sm:$0xff] }
 0x73b   :  { %3297 = vmatprep.subr.mxu1 %v7764_v49  ;;  %4687 = vmatprep.subr.mxu0 %v8712_v54  ;;  %v3474_v49 = vld [vmem:[%s8494_s6 + $0x78] sm:$0xff] }
 0x73c   :  { %3298 = vmatpush1.msra.mxu1 %v7771_v61  ;;  %4688 = vmatpush3.msra.mxu0 %v8103_v41  ;;  %v3489_v61 = vld [vmem:[%s8494_s6 + $0xf0] sm:$0xff]  ;;  %v3482_v41 = vld [vmem:[%s8494_s6 + $0xb8] sm:$0xff] }
 0x73d   :  { %3299 = vmatprep.subr.mxu1 %v9102_v0  ;;  %4689 = vmatprep.subr.mxu0 %v8712_v54 }
 0x73e   :  { %3300 = vmatpush1.msra.mxu1 %v9103_v48  ;;  %4690 = vmatpush3.msra.mxu0 %v9104_v63  ;;  %v9112_v48 = vld [vmem:[#allocation60_spill] sm:$0xff] }
 0x73f   :  { %v4951_v58 = vpop.eup %4950  ;;  %3301 = vmatprep.subr.mxu1 %v9105_v4  ;;  %4691 = vmatprep.subr.mxu0 %v8712_v54  ;;  %v9113_v4 = vld [vmem:[#allocation58_spill] sm:$0xff] }
 0x740   :  { %3302 = vmatpush1.msra.mxu1 %v9106_v18  ;;  %4692 = vmatpush3.msra.mxu0 %v9107_v11  ;;  %v3123_v31 = vmul.f32 %v4951_v58, %v3122_v19 }
 0x741   :  { %3303 = vmatprep.subr.mxu1 %v9109_v6  ;;  %4693 = vmatprep.subr.mxu0 %v8712_v54 }
 0x742   :  { %3304 = vmatpush1.msra.mxu1 %v9110_v14  ;;  %3337 = vmatprep.mubr.f32.mxu1 %v8712_v54  ;;  %v8290_v47 = vadd.f32 %v3124_v56, %v3123_v31  ;;  %v9114_v31 = vld [vmem:[#allocation64_spill] sm:$0xff]  ;;  %v9115_v56 = vld [vmem:[#allocation61_spill] sm:$0xff] }
 0x743   :  { %4694 = vmatpush3.msra.mxu0 %v9111_v55  ;;  %4695 = vmatprep.mubr.msk.f32.mxu0 %vm5166_vm0, %v8712_v54 }
 0x744   :  { %3338 = vmatmul.mubr.f32.vlgmr.msra.gmra.mxu1 %v8290_v47  ;;  %4696 = vmatmul.mubr.f32.vlgmr.msra.gmra.mxu0 %v8290_v47 }
 0x745   :  { %4698 = vmatprep.subr.mxu0 %v8712_v54  ;;  %4730 = vmatprep.mubr.msk.f32.mxu0 %vm5166_vm0, %v8712_v54 }
 0x746   :  { %4086 = vmatprep.subr.mxu1 %v3490_v62  ;;  %4699 = vmatpush3.msra.mxu0 %v3583_v1 }
 0x747   :  { %4087 = vmatpush3.msra.mxu1 %v3474_v49  ;;  %4700 = vmatprep.subr.mxu0 %v8712_v54 }
 0x748   :  { %4088 = vmatprep.subr.mxu1 %v3489_v61  ;;  %4701 = vmatpush3.msra.mxu0 %v3582_v5 }
 0x749   :  { %4089 = vmatpush3.msra.mxu1 %v3473_v28  ;;  %4702 = vmatprep.subr.mxu0 %v8712_v54 }
 0x74a   :  { %4090 = vmatprep.subr.mxu1 %v3488_v24  ;;  %4703 = vmatpush3.msra.mxu0 %v3581_v43  ;;  %v9121_v43 = vld [vmem:[#allocation63_spill] sm:$0xff] }
 0x74b   :  { %4091 = vmatpush3.msra.mxu1 %v3472_v60  ;;  %4704 = vmatprep.subr.mxu0 %v8712_v54  ;;  %v9116_v60 = vld [vmem:[#allocation77_spill] sm:$0xff] }
 0x74c   :  { %4092 = vmatprep.subr.mxu1 %v3487_v37  ;;  %4705 = vmatpush3.msra.mxu0 %v3580_v52 }
 0x74d   :  { %4093 = vmatpush3.msra.mxu1 %v3471_v53  ;;  %4706 = vmatprep.subr.mxu0 %v8712_v54  ;;  %v9117_v53 = vld [vmem:[#allocation78_spill] sm:$0xff] }
 0x74e   :  { %4094 = vmatprep.subr.mxu1 %v3486_v20  ;;  %4707 = vmatpush3.msra.mxu0 %v3579_v8 }
 0x74f   :  { %4095 = vmatpush3.msra.mxu1 %v3470_v39  ;;  %4708 = vmatprep.subr.mxu0 %v8712_v54 }
 0x750   :  { %4096 = vmatprep.subr.mxu1 %v3485_v30  ;;  %4709 = vmatpush3.msra.mxu0 %v3578_v51 }
 0x751   :  { %4097 = vmatpush3.msra.mxu1 %v3469_v29  ;;  %4710 = vmatprep.subr.mxu0 %v8712_v54 }
 0x752   :  { %4098 = vmatprep.subr.mxu1 %v3484_v9  ;;  %4711 = vmatpush3.msra.mxu0 %v3577_v13  ;;  %v9118_v9 = vld [vmem:[#allocation33_spill] sm:$0xff] }
 0x753   :  { %4099 = vmatpush3.msra.mxu1 %v3468_v34  ;;  %4712 = vmatprep.subr.mxu0 %v8712_v54 }
 0x754   :  { %4100 = vmatprep.subr.mxu1 %v3483_v38  ;;  %4713 = vmatpush3.msra.mxu0 %v3576_v22 }
 0x755   :  { %4101 = vmatpush3.msra.mxu1 %v3467_v44  ;;  %4714 = vmatprep.subr.mxu0 %v8712_v54 }
 0x756   :  { %4102 = vmatprep.subr.mxu1 %v3482_v41  ;;  %4715 = vmatpush3.msra.mxu0 %v3575_v57 }
 0x757   :  { %4103 = vmatpush3.msra.mxu1 %v3466_v33  ;;  %4716 = vmatprep.subr.mxu0 %v8712_v54  ;;  %v9119_v33 = vld [vmem:[#allocation59_spill] sm:$0xff] }
 0x758   :  { %4104 = vmatprep.subr.mxu1 %v3481_v15  ;;  %4717 = vmatpush3.msra.mxu0 %v3574_v7  ;;  %v3570_v7 = vld [vmem:[%s8495_s8 + $0x10] sm:$0xff] }
 0x759   :  { %4105 = vmatpush3.msra.mxu1 %v3465_v45  ;;  %4718 = vmatprep.subr.mxu0 %v8712_v54  ;;  %v9120_v45 = vld [vmem:[#allocation62_spill] sm:$0xff] }
 0x75a   :  { %4106 = vmatprep.subr.mxu1 %v3480_v36  ;;  %4719 = vmatpush3.msra.mxu0 %v3573_v21  ;;  %v3568_v21 = vld [vmem:[%s8495_s8] sm:$0xff] }
 0x75b   :  { %4107 = vmatpush3.msra.mxu1 %v3464_v17  ;;  %4720 = vmatprep.subr.mxu0 %v8712_v54 }
 0x75c   :  { %4108 = vmatprep.subr.mxu1 %v3479_v32  ;;  %4721 = vmatpush3.msra.mxu0 %v3572_v25 }
 0x75d   :  { %4109 = vmatpush3.msra.mxu1 %v3463_v26  ;;  %4722 = vmatprep.subr.mxu0 %v8712_v54 }
 0x75e   :  { %4110 = vmatprep.subr.mxu1 %v3478_v10 }
 0x75f   :  { %4111 = vmatpush3.msra.mxu1 %v3462_v27 }
 0x760   :  { %4112 = vmatprep.subr.mxu1 %v3477_v40 }
 0x761   :  { %4113 = vmatpush3.msra.mxu1 %v3461_v42 }
 0x762   :  { %4114 = vmatprep.subr.mxu1 %v3476_v35 }
 0x763   :  { %4115 = vmatpush3.msra.mxu1 %v3460_v2 }
 0x764   :  { %4116 = vmatprep.subr.mxu1 %v3475_v59 }
 0x765   :  { %4117 = vmatpush3.msra.mxu1 %v3459_v46 }
 0x7e3   :  { %v3198_v23 = vpop.f32.mrf.mxu1  ;;  %v3269_v0 = vpop.f32.mrf.mxu0 }
 0x7e4   :  { %v3199_v63 = vadd.f32 %v3198_v23, %v9112_v48  ;;  %v3270_v20 = vadd.f32 %v3269_v0, %v9117_v53  ;;  %v3812_v23 = vld [vmem:[%s8497_s7] ss:$0 sm:$0xff] }
 0x7e5   :  { %v3200_v19 = vpop.f32.mrf.mxu1  ;;  %v4662_v58 = vpop.f32.mrf.mxu0 }
 0x7e6   :  { %v3414_v18 = vadd.f32 %v3199_v63, %v9113_v4  ;;  %v3201_v50 = vadd.f32 %v3200_v19, %v9114_v31  ;;  %v3813_v19 = vld [vmem:[%s8498_s9] ss:$0 sm:$0xff] }
 0x7e8   :  { %v3807_v11 = vmul.f32 -1.442695, %v3414_v18  ;;  %v3421_v6 = vadd.f32 %v3201_v50, %v9115_v56 }
 0x7ea   :  { %4952 = vpow2.f32 %v3807_v11  ;;  %v3808_v14 = vmul.f32 -1.442695, %v3421_v6 }
 0x7ec   :  { %4954 = vpow2.f32 %v3808_v14 }
 0x7f7   :  { %v4953_v55 = vpop.eup %4952 }
 0x7f8   :  { %v3418_v62 = vadd.f32 1.0, %v4953_v55 }
 0x7f9   :  { %v4955_v49 = vpop.eup %4954 }
 0x7fa   :  { %4956 = vrcp.f32 %v3418_v62  ;;  %v3425_v61 = vadd.f32 1.0, %v4955_v49 }
 0x7fc   :  { %4958 = vrcp.f32 %v3425_v61 }
 0x804   :  { %v3339_v28 = vpop.f32.mrf.mxu1  ;;  %v3410_v24 = vpop.f32.mrf.mxu0 }
 0x805   :  { %v3340_v37 = vadd.f32 %v3339_v28, %v9116_v60  ;;  %v3411_v46 = vadd.f32 %v3410_v24, %v6334_v16  ;;  %v3571_v16 = vld [vmem:[%s8495_s8 + $0x18] sm:$0xff] }
 0x806   :  { %v3341_v39 = vpop.f32.mrf.mxu1  ;;  %v4697_v30 = vpop.f32.mrf.mxu0  ;;  %4723 = vmatpush3.msra.mxu0 %v3571_v16 }
 0x807   :  { %v4957_v29 = vpop.eup %4956  ;;  %v3435_v34 = vadd.f32 %v3340_v37, %v9118_v9  ;;  %v3342_v41 = vadd.f32 %v3341_v39, %v6313_v3  ;;  %4724 = vmatprep.subr.mxu0 %v8712_v54 }
 0x808   :  { %v3428_v38 = vmul.f32 %v4957_v29, %v3270_v20  ;;  %4725 = vmatpush3.msra.mxu0 %v3570_v7 }
 0x809   :  { %v3809_v44 = vmul.f32 -1.442695, %v3435_v34  ;;  %v3442_v36 = vadd.f32 %v3342_v41, %v9120_v45  ;;  %v4959_v32 = vpop.eup %4958  ;;  %4726 = vmatprep.subr.mxu0 %v8712_v54 }
 0x80a   :  { %v3429_v15 = vadd.f32 %v3428_v38, %v9119_v33  ;;  %v3431_v10 = vsub.f32 1.0, %v4959_v32  ;;  %v3433_v35 = vmul.f32 %v4959_v32, %v8221_v12 }
 0x80b   :  { %4960 = vpow2.f32 %v3809_v44  ;;  %v3810_v17 = vmul.f32 -1.442695, %v3442_v36 }
 0x80c   :  { %4962 = vtanh.f32 %v3429_v15 }
 0x80d   :  { %4964 = vpow2.f32 %v3810_v17 }
 0x818   :  { %v4961_v26 = vpop.eup %4960 }
 0x819   :  { %v4963_v27 = vpop.eup %4962  ;;  %v3439_v40 = vadd.f32 1.0, %v4961_v26 }
 0x81a   :  { %v3432_v42 = vmul.f32 %v4963_v27, %v3431_v10  ;;  %v4965_v3 = vpop.eup %4964 }
 0x81b   :  { %4966 = vrcp.f32 %v3439_v40  ;;  %v3446_v59 = vadd.f32 1.0, %v4965_v3 }
 0x81c   :  { %v3434_v2 = vadd.f32 %v3433_v35, %v3432_v42 }
 0x81d   :  { %4968 = vrcp.f32 %v3446_v59 }
 0x81e   :  { %3456 = vst [vmem:[%s8496_s11] sm:$0xff] %v3434_v2 }
 0x828   :  { %v4967_v1 = vpop.eup %4966 }
 0x829   :  { %v3449_v5 = vmul.f32 %v4967_v1, %v3411_v46 }
 0x82a   :  { %v4969_v8 = vpop.eup %4968 }
 0x82b   :  { %v3450_v52 = vadd.f32 %v3449_v5, %v9121_v43  ;;  %v3452_v51 = vsub.f32 1.0, %v4969_v8  ;;  %v3454_v22 = vmul.f32 %v4969_v8, %v8290_v47  ;;  %v3569_v47 = vld [vmem:[%s8495_s8 + $0x8] sm:$0xff] }
 0x82c   :  { %4727 = vmatpush3.msra.mxu0 %v3569_v47 }
 0x82d   :  { %4970 = vtanh.f32 %v3450_v52  ;;  %4728 = vmatprep.subr.mxu0 %v8712_v54 }
 0x82e   :  { %4729 = vmatpush3.msra.mxu0 %v3568_v21 }
 0x83a   :  { %v4971_v13 = vpop.eup %4970 }
 0x83b   :  { %v3453_v12 = vmul.f32 %v4971_v13, %v3452_v51 }
 0x83d   :  { %v3455_v57 = vadd.f32 %v3454_v22, %v3453_v12 }
 0x83f   :  { %3811 = vst [vmem:[%s8496_s11 + $0x8] sm:$0xff] %v3455_v57  ;;  %3562 = vmatprep.mubr.f32.mxu1 %v3455_v57 }
 0x840   :  { %3563 = vmatmul.mubr.f32.vlgmr.msra.gmra.mxu1 %v3434_v2 }
 0x900   :  { %v4118_v25 = vpop.f32.mrf.mxu1 }
 0x902   :  { %v4119_v0 = vpop.f32.mrf.mxu1 }
 0x903   :  { %v4120_v48 = vadd.f32 %v4119_v0, %v4118_v25 }
 0x905   :  { %v3565_v63 = vadd.f32 %v4120_v48, %v3812_v23 }
 0x907   :  { %4731 = vmatmul.mubr.f32.vlgmr.msra.gmra.mxu0 %v3565_v63 }
 0x9c7   :  { %v3657_v58 = vpop.f32.mrf.mxu0 }
 0x9c8   :  { %v3658_v4 = vadd.f32 %v3813_v19, %v3657_v58 }
 0x9c9   :  { %v4732_v18 = vpop.f32.mrf.mxu0 }
 0x9ca   :  { %3661 = vst [vmem:[%s8499_s10] sm:$0xff] %v3658_v4 }

</bundles_post_ra>
